<compile_context>
chip_gen: v6e
topology: v6e:2x2x1
jax: 0.10.0
libtpu: 0.0.40
codegen_flags: <defaults>
</compile_context>

<pallas_src>
from typing import NamedTuple

import numpy as np

import jax
import jax.numpy as jnp
from jax.experimental import pallas as pl
from jax.experimental.pallas import tpu as pltpu

CP = 128          # padded channel / lane width carried through the whole net
BN_EPS = 1e-5


def _round_up(n, m):
    return ((n + m - 1) // m) * m


def _round8(n):
    return _round_up(n, 8)


class CNNConfig(NamedTuple):
    k: int            # stem kernel size
    cin_pad: int      # padded input channels for the stem im2col
    k_pad: int        # padded K of the stem matmul
    m_stem_pad: int   # padded row count of the stem output
    n_classes: int


# --------------------------------------------------------------------------
# Compile-time spatial constants (pure numpy -> device constants, built once)
# --------------------------------------------------------------------------
def _conv_gather_np(h, w, k, stride, pad):
    """One-hot gather: S[t] @ X_flat selects, per output pixel, the input pixel
    of tap t (row of zeros for out-of-bounds taps)."""
    ho = (h + 2 * pad - k) // stride + 1
    wo = (w + 2 * pad - k) // stride + 1
    s = np.zeros((k * k, ho * wo, h * w), np.float32)
    for dy in range(k):
        for dx in range(k):
            t = dy * k + dx
            for oy in range(ho):
                for ox in range(wo):
                    iy = oy * stride + dy - pad
                    ix = ox * stride + dx - pad
                    if 0 <= iy < h and 0 <= ix < w:
                        s[t, oy * wo + ox, iy * w + ix] = 1.0
    return s, ho, wo


def _build_spatial_constants(h, w, n_blocks):
    """Row-stacked gather matrices for the maxpool and the stride-2 blocks.
    Each tap block is padded to mo_pad rows (multiple of 8); columns are
    padded to the previous layer's padded row count with zeros, so junk in
    padded activation rows never propagates."""
    m_stem_pad = _round8(h * w)
    m_in_pad = m_stem_pad
    stacked = []
    for _ in range(1 + n_blocks):        # maxpool + each residual block
        s, h, w = _conv_gather_np(h, w, 3, 2, 1)
        mo, mo_pad = h * w, _round8(h * w)
        s = np.pad(s, ((0, 0), (0, mo_pad - mo), (0, m_in_pad - s.shape[2])))
        stacked.append(s.reshape(9 * mo_pad, m_in_pad).astype(np.float32))
        m_in_pad = mo_pad
    # Masked global-mean weights (zero on padded rows of the last block).
    vmean = np.zeros((m_in_pad, CP), np.float32)
    vmean[: h * w, :] = 1.0 / (h * w)
    return m_stem_pad, stacked[0], stacked[1:], vmean


# --------------------------------------------------------------------------
# One-time parameter prep (conv bias + inference-mode BN folded into weights)
# --------------------------------------------------------------------------
def _bn_fold(bn):
    scale = bn["gamma"] / jnp.sqrt(bn["var"] + BN_EPS)
    shift = bn["beta"] - bn["mean"] * scale
    return scale, shift


def _prep_stem(w, b, cin_pad, k_pad):
    cout, cin, k, _ = w.shape
    wt = jnp.transpose(w, (2, 3, 1, 0))                           # (k,k,cin,cout)
    wt = jnp.pad(wt, ((0, 0), (0, 0), (0, cin_pad - cin), (0, CP - cout)))
    wt = wt.reshape(k * k * cin_pad, CP)
    wt = jnp.pad(wt, ((0, k_pad - k * k * cin_pad), (0, 0)))
    bias = jnp.pad(b, (0, CP - cout)).reshape(1, CP)
    return wt.astype(jnp.float32), bias.astype(jnp.float32)


def _prep_block(blk):
    """K-stacked block weights: one (1152, 256) matrix doing the 3x3 conv
    (columns 0:128, all 9 taps along K) and the 1x1 stride-2 downsample
    (columns 128:256, non-zero only at the centre-tap K rows — the centre tap
    of a 3x3/s2/p1 conv reads exactly the 1x1/s2 input pixel)."""
    cout, cin, _, _ = blk["conv_w"].shape
    s1, t1 = _bn_fold(blk["bn1"])
    s2, t2 = _bn_fold(blk["bn2"])
    wm = jnp.transpose(blk["conv_w"], (2, 3, 1, 0)).reshape(9, cin, cout)
    wm = wm * s1[None, None, :]
    wm = jnp.pad(wm, ((0, 0), (0, CP - cin), (0, CP - cout)))       # (9,128,128)
    wd = blk["ds_w"][:, :, 0, 0].T * s2[None, :]                    # (cin,cout)
    wd = jnp.pad(wd, ((0, CP - cin), (0, CP - cout)))               # (128,128)
    w_main = wm.reshape(9 * CP, CP)                                  # (1152,128)
    w_ds = jnp.zeros((9, CP, CP), jnp.float32).at[4].set(wd).reshape(9 * CP, CP)
    w_stack = jnp.concatenate([w_main, w_ds], axis=-1).astype(jnp.float32)
    bm = jnp.pad(blk["conv_b"] * s1 + t1, (0, CP - cout)).reshape(1, CP)
    bd = jnp.pad(blk["ds_b"] * s2 + t2, (0, CP - cout)).reshape(1, CP)
    return w_stack, bm.astype(jnp.float32), bd.astype(jnp.float32)


def _prep_fc(w_t, b):
    c, n = w_t.shape
    wf = jnp.pad(w_t, ((0, CP - c), (0, CP - n))).astype(jnp.float32)
    bf = jnp.pad(b, (0, CP - n)).reshape(1, CP).astype(jnp.float32)
    return wf, bf


def prepare_params(params, image_hw):
    """Run ONCE outside the jitted forward.  Returns (prepped pytree, cfg)."""
    H, W = image_hw
    blocks = params["blocks"]
    assert len(blocks) == 3, "kernel is specialised to the 3-block default"
    k_stem = params["stem_w"].shape[-1]
    cin = params["stem_w"].shape[1]
    cin_pad = _round_up(cin, 4)
    k_pad = _round_up(k_stem * k_stem * cin_pad, 128)

    m_stem_pad, s_pool_np, s_blk_np, vmean_np = _build_spatial_constants(
        H, W, len(blocks))

    w_stem, b_stem = _prep_stem(params["stem_w"], params["stem_b"],
                                cin_pad, k_pad)
    blk_prep = []
    for i, blk in enumerate(blocks):
        w_stack, bm, bd = _prep_block(blk)
        blk_prep.append((jnp.asarray(s_blk_np[i]), w_stack, bm, bd))
    w_fc, b_fc = _prep_fc(params["fc_w"], params["fc_b"])

    prepped = dict(
        w_stem=w_stem, b_stem=b_stem,
        s_pool=jnp.asarray(s_pool_np),
        blocks=blk_prep,
        vmean=jnp.asarray(vmean_np),
        w_fc=w_fc, b_fc=b_fc,
    )
    cfg = CNNConfig(k=k_stem, cin_pad=cin_pad, k_pad=k_pad,
                    m_stem_pad=m_stem_pad, n_classes=params["fc_b"].shape[0])
    return prepped, cfg


def _stem_patches(x_nhwc, k, pad, cin_pad, m_pad, k_pad):
    """im2col for the 7x7 stride-1 stem conv (wrapper side; tiny input)."""
    b, h, w, c = x_nhwc.shape
    xp = jnp.pad(x_nhwc, ((0, 0), (pad, pad), (pad, pad), (0, cin_pad - c)))
    cols = []
    for dy in range(k):
        for dx in range(k):
            cols.append(jax.lax.slice(
                xp, (0, dy, dx, 0), (b, dy + h, dx + w, cin_pad)))
    p = jnp.stack(cols, axis=3).reshape(b, h * w, k * k * cin_pad)
    p = jnp.pad(p, ((0, 0), (0, m_pad - h * w), (0, k_pad - k * k * cin_pad)))
    return p.astype(jnp.float32)


# --------------------------------------------------------------------------
# Fused Pallas kernel: whole forward for ONE sample per grid step (9 matmuls)
# --------------------------------------------------------------------------
def _fused_forward_kernel(
    patches_ref, w_stem_ref, b_stem_ref, s_pool_ref,
    s1_ref, w1_ref, bm1_ref, bd1_ref,
    s2_ref, w2_ref, bm2_ref, bd2_ref,
    s3_ref, w3_ref, bm3_ref, bd3_ref,
    vmean_ref, w_fc_ref, b_fc_ref,
    o_ref,
):
    f32 = jnp.float32

    # ---- Stem: Conv2d(7x7, pad=3) + bias + ReLU as one dense matmul --------
    x = jnp.dot(patches_ref[0], w_stem_ref[...], preferred_element_type=f32)
    x = jnp.maximum(x + b_stem_ref[...], 0.0)                    # (Ms,128) f32

    # ---- MaxPool2d(3, stride=2, padding=1) ---------------------------------
    # ONE stacked one-hot gather matmul (all 9 tap windows stacked along the
    # row axis), then the 9-way max runs on the VPU in f32.  Zero rows for
    # out-of-bounds taps are exact because the input is post-ReLU (>= 0) and
    # every pooling window contains its (always in-bounds) centre element.
    pw = jnp.dot(s_pool_ref[...], x, preferred_element_type=f32)  # (9*M0,128)
    m0 = s_pool_ref.shape[0] // 9
    x = pw[0:m0]
    for t in range(1, 9):
        x = jnp.maximum(x, pw[t * m0:(t + 1) * m0])               # (M0,128)

    # ---- Residual blocks: relu(conv3x3(s2)+BN1) + (conv1x1(s2)+BN2) --------
    def block(xin, s_ref, w_ref, bm_ref, bd_ref):
        # (a) one stacked gather matmul -> all 9 stride-2 tap windows
        pb = jnp.dot(s_ref[...], xin, preferred_element_type=f32)  # (9*Mo,128)
        mo = s_ref.shape[0] // 9
        # (b) lane-concat taps -> (Mo, 9*128); the K-stacked weight matrix
        #     computes the whole 3x3 conv AND the fused 1x1 downsample
        #     (extra 128 output lanes) in a single (Mo,1152)x(1152,256) matmul.
        pcat = jnp.concatenate(
            [pb[t * mo:(t + 1) * mo] for t in range(9)], axis=-1)
        y = jnp.dot(pcat, w_ref[...], preferred_element_type=f32)  # (Mo,256)
        main = jnp.maximum(y[:, :CP] + bm_ref[...], 0.0)           # conv+BN+ReLU
        down = y[:, CP:] + bd_ref[...]                             # 1x1 conv+BN
        return main + down                                         # no ReLU after add

    x = block(x, s1_ref, w1_ref, bm1_ref, bd1_ref)
    x = block(x, s2_ref, w2_ref, bm2_ref, bd2_ref)
    x = block(x, s3_ref, w3_ref, bm3_ref, bd3_ref)

    # ---- Global spatial mean + Linear, fused --------------------------------
    # logits = mean_rows(x) @ Wfc + b == sum_rows((x @ Wfc) * vmean) + b, with
    # vmean zero on padded rows (masked mean).
    t_fc = jnp.dot(x, w_fc_ref[...], preferred_element_type=f32)
    logits = jnp.sum(t_fc * vmean_ref[...], axis=0, keepdims=True) + b_fc_ref[...]
    o_ref[0] = logits


def _const_spec(shape):
    nd = len(shape)
    return pl.BlockSpec(tuple(shape), lambda b, _nd=nd: (0,) * _nd)


# --------------------------------------------------------------------------
# Hot-path forward (jitted): transpose + im2col + ONE pallas_call
# --------------------------------------------------------------------------
def cnn_classifier_forward(prepped, x_nchw, cfg):
    x = jnp.transpose(x_nchw, (0, 2, 3, 1)).astype(jnp.float32)   # NCHW -> NHWC
    B = x.shape[0]

    patches = _stem_patches(x, cfg.k, (cfg.k - 1) // 2, cfg.cin_pad,
                            cfg.m_stem_pad, cfg.k_pad)             # (B, Ms, Kp)

    operands = [patches, prepped["w_stem"], prepped["b_stem"], prepped["s_pool"]]
    for s, w, bm, bd in prepped["blocks"]:
        operands += [s, w, bm, bd]
    operands += [prepped["vmean"], prepped["w_fc"], prepped["b_fc"]]

    in_specs = [pl.BlockSpec((1,) + patches.shape[1:], lambda b: (b, 0, 0))]
    in_specs += [_const_spec(op.shape) for op in operands[1:]]

    out = pl.pallas_call(
        _fused_forward_kernel,
        out_shape=jax.ShapeDtypeStruct((B, 1, CP), jnp.float32),
        grid=(B,),
        in_specs=in_specs,
        out_specs=pl.BlockSpec((1, 1, CP), lambda b: (b, 0, 0)),
        compiler_params=pltpu.CompilerParams(
            dimension_semantics=("parallel",)),                    # 2 TCs on v7x
    )(*operands)

    return out.reshape(B, CP)[:, :cfg.n_classes]


# --------------------------------------------------------------------------
# Parameters (deterministic init, PyTorch layouts / PyTorch BN defaults)
# --------------------------------------------------------------------------
def _conv_init(key, cout, cin, k):
    k1, k2 = jax.random.split(key)
    fan_in = cin * k * k
    w = jax.random.normal(k1, (cout, cin, k, k), jnp.float32) / jnp.sqrt(fan_in)
    b = jax.random.normal(k2, (cout,), jnp.float32) * 0.01
    return w, b


def _bn_init(c):
    # PyTorch BatchNorm2d defaults: weight=1, bias=0, running_mean=0, running_var=1
    return dict(
        gamma=jnp.ones((c,), jnp.float32),
        beta=jnp.zeros((c,), jnp.float32),
        mean=jnp.zeros((c,), jnp.float32),
        var=jnp.ones((c,), jnp.float32),
    )


def init_params(key, layers=(16, 32, 64), n_input_channels=3, n_classes=6):
    keys = jax.random.split(key, 2 + 2 * len(layers))
    params = {}
    c = layers[0]
    params["stem_w"], params["stem_b"] = _conv_init(keys[0], c, n_input_channels, 7)
    blocks = []
    for i, l in enumerate(layers):
        w3, b3 = _conv_init(keys[1 + 2 * i], l, c, 3)
        w1, b1 = _conv_init(keys[2 + 2 * i], l, c, 1)
        blocks.append(dict(conv_w=w3, conv_b=b3, bn1=_bn_init(l),
                           ds_w=w1, ds_b=b1, bn2=_bn_init(l)))
        c = l
    params["blocks"] = blocks
    kfc1, kfc2 = jax.random.split(keys[-1])
    # PyTorch Linear weight layout (out, in); store transposed for the kernel.
    params["fc_w"] = (
        jax.random.normal(kfc1, (n_classes, c), jnp.float32) / jnp.sqrt(c)
    ).T
    params["fc_b"] = jax.random.normal(kfc2, (n_classes,), jnp.float32) * 0.01
    return params


if __name__ == "__main__":
    key = jax.random.PRNGKey(0)
    kp, kx = jax.random.split(key)
    params = init_params(kp, layers=(16, 32, 64), n_input_channels=3, n_classes=6)
    x = jax.random.normal(kx, (2, 3, 16, 16), jnp.float32)   # NCHW, like PyTorch

    # One-time prep (hoisted out of the hot path per the perf review).
    prepped, cfg = prepare_params(params, image_hw=(16, 16))

    fwd = jax.jit(cnn_classifier_forward, static_argnames=("cfg",))
    logits = fwd(prepped, x, cfg=cfg)
    jax.block_until_ready(logits)
    assert logits.shape == (2, 6) and logits.dtype == jnp.float32
    print("KERNEL_OK")
</pallas_src>

<mosaic_0001>
module attributes {stable_mosaic.version = 11 : i64} {
  func.func @_fused_forward_kernel(%arg0: i32, %arg1: memref<1x256x256xf32, #tpu.memory_space<vmem>>, %arg2: memref<256x128xf32, #tpu.memory_space<vmem>>, %arg3: memref<1x128xf32, #tpu.memory_space<vmem>>, %arg4: memref<576x256xf32, #tpu.memory_space<vmem>>, %arg5: memref<144x64xf32, #tpu.memory_space<vmem>>, %arg6: memref<1152x256xf32, #tpu.memory_space<vmem>>, %arg7: memref<1x128xf32, #tpu.memory_space<vmem>>, %arg8: memref<1x128xf32, #tpu.memory_space<vmem>>, %arg9: memref<72x16xf32, #tpu.memory_space<vmem>>, %arg10: memref<1152x256xf32, #tpu.memory_space<vmem>>, %arg11: memref<1x128xf32, #tpu.memory_space<vmem>>, %arg12: memref<1x128xf32, #tpu.memory_space<vmem>>, %arg13: memref<72x8xf32, #tpu.memory_space<vmem>>, %arg14: memref<1152x256xf32, #tpu.memory_space<vmem>>, %arg15: memref<1x128xf32, #tpu.memory_space<vmem>>, %arg16: memref<1x128xf32, #tpu.memory_space<vmem>>, %arg17: memref<8x128xf32, #tpu.memory_space<vmem>>, %arg18: memref<128x128xf32, #tpu.memory_space<vmem>>, %arg19: memref<1x128xf32, #tpu.memory_space<vmem>>, %arg20: memref<1x1x128xf32, #tpu.memory_space<vmem>>) attributes {dimension_semantics = [#tpu.dimension_semantics<parallel>], iteration_bounds = array<i64: 2>, scalar_prefetch = 0 : i64, scratch_operands = 0 : i64, tpu.core_type = #tpu.core_type<tc>, window_params = [{transform_indices = @transform_0, window_bounds = array<i64: 1, 256, 256>}, {pipeline_mode = #tpu.pipeline_mode<synchronous>, transform_indices = @transform_1, window_bounds = array<i64: 256, 128>}, {pipeline_mode = #tpu.pipeline_mode<synchronous>, transform_indices = @transform_2, window_bounds = array<i64: 1, 128>}, {pipeline_mode = #tpu.pipeline_mode<synchronous>, transform_indices = @transform_3, window_bounds = array<i64: 576, 256>}, {pipeline_mode = #tpu.pipeline_mode<synchronous>, transform_indices = @transform_4, window_bounds = array<i64: 144, 64>}, {pipeline_mode = #tpu.pipeline_mode<synchronous>, transform_indices = @transform_5, window_bounds = array<i64: 1152, 256>}, {pipeline_mode = #tpu.pipeline_mode<synchronous>, transform_indices = @transform_6, window_bounds = array<i64: 1, 128>}, {pipeline_mode = #tpu.pipeline_mode<synchronous>, transform_indices = @transform_7, window_bounds = array<i64: 1, 128>}, {pipeline_mode = #tpu.pipeline_mode<synchronous>, transform_indices = @transform_8, window_bounds = array<i64: 72, 16>}, {pipeline_mode = #tpu.pipeline_mode<synchronous>, transform_indices = @transform_9, window_bounds = array<i64: 1152, 256>}, {pipeline_mode = #tpu.pipeline_mode<synchronous>, transform_indices = @transform_10, window_bounds = array<i64: 1, 128>}, {pipeline_mode = #tpu.pipeline_mode<synchronous>, transform_indices = @transform_11, window_bounds = array<i64: 1, 128>}, {pipeline_mode = #tpu.pipeline_mode<synchronous>, transform_indices = @transform_12, window_bounds = array<i64: 72, 8>}, {pipeline_mode = #tpu.pipeline_mode<synchronous>, transform_indices = @transform_13, window_bounds = array<i64: 1152, 256>}, {pipeline_mode = #tpu.pipeline_mode<synchronous>, transform_indices = @transform_14, window_bounds = array<i64: 1, 128>}, {pipeline_mode = #tpu.pipeline_mode<synchronous>, transform_indices = @transform_15, window_bounds = array<i64: 1, 128>}, {pipeline_mode = #tpu.pipeline_mode<synchronous>, transform_indices = @transform_16, window_bounds = array<i64: 8, 128>}, {pipeline_mode = #tpu.pipeline_mode<synchronous>, transform_indices = @transform_17, window_bounds = array<i64: 128, 128>}, {pipeline_mode = #tpu.pipeline_mode<synchronous>, transform_indices = @transform_18, window_bounds = array<i64: 1, 128>}, {transform_indices = @transform_19, window_bounds = array<i64: 1, 1, 128>}]} {
    %c0 = arith.constant 0 : index
    %c0_0 = arith.constant 0 : index
    %c0_1 = arith.constant 0 : index
    %0 = vector.load %arg1[%c0, %c0_0, %c0_1] : memref<1x256x256xf32, #tpu.memory_space<vmem>>, vector<1x256x256xf32>
    %1 = vector.shape_cast %0 : vector<1x256x256xf32> to vector<256x256xf32>
    %c0_2 = arith.constant 0 : index
    %c0_3 = arith.constant 0 : index
    %2 = vector.load %arg2[%c0_2, %c0_3] : memref<256x128xf32, #tpu.memory_space<vmem>>, vector<256x128xf32>
    %cst = arith.constant dense<0.000000e+00> : vector<256x128xf32>
    %3 = tpu.matmul %1, %2, %cst {dimension_numbers = #tpu.dot_dimension_numbers<[1], [0], [0], [1], [0, 0, 1, 1], [], []>} : vector<256x256xf32>, vector<256x128xf32>, vector<256x128xf32> -> vector<256x128xf32>
    %c0_4 = arith.constant 0 : index
    %c0_5 = arith.constant 0 : index
    %4 = vector.load %arg3[%c0_4, %c0_5] : memref<1x128xf32, #tpu.memory_space<vmem>>, vector<1x128xf32>
    %5 = vector.broadcast %4 : vector<1x128xf32> to vector<256x128xf32>
    %6 = arith.addf %3, %5 : vector<256x128xf32>
    %cst_6 = arith.constant 0.000000e+00 : f32
    %7 = vector.broadcast %cst_6 : f32 to vector<256x128xf32>
    %8 = arith.maximumf %6, %7 : vector<256x128xf32>
    %c0_7 = arith.constant 0 : index
    %c0_8 = arith.constant 0 : index
    %9 = vector.load %arg4[%c0_7, %c0_8] : memref<576x256xf32, #tpu.memory_space<vmem>>, vector<576x256xf32>
    %cst_9 = arith.constant dense<0.000000e+00> : vector<576x128xf32>
    %10 = tpu.matmul %9, %8, %cst_9 {dimension_numbers = #tpu.dot_dimension_numbers<[1], [0], [0], [1], [0, 0, 1, 1], [], []>} : vector<576x256xf32>, vector<256x128xf32>, vector<576x128xf32> -> vector<576x128xf32>
    %11 = vector.extract_strided_slice %10 {offsets = [0, 0], sizes = [64, 128], strides = [1, 1]} : vector<576x128xf32> to vector<64x128xf32>
    %12 = vector.extract_strided_slice %10 {offsets = [64, 0], sizes = [64, 128], strides = [1, 1]} : vector<576x128xf32> to vector<64x128xf32>
    %13 = arith.maximumf %11, %12 : vector<64x128xf32>
    %14 = vector.extract_strided_slice %10 {offsets = [128, 0], sizes = [64, 128], strides = [1, 1]} : vector<576x128xf32> to vector<64x128xf32>
    %15 = arith.maximumf %13, %14 : vector<64x128xf32>
    %16 = vector.extract_strided_slice %10 {offsets = [192, 0], sizes = [64, 128], strides = [1, 1]} : vector<576x128xf32> to vector<64x128xf32>
    %17 = arith.maximumf %15, %16 : vector<64x128xf32>
    %18 = vector.extract_strided_slice %10 {offsets = [256, 0], sizes = [64, 128], strides = [1, 1]} : vector<576x128xf32> to vector<64x128xf32>
    %19 = arith.maximumf %17, %18 : vector<64x128xf32>
    %20 = vector.extract_strided_slice %10 {offsets = [320, 0], sizes = [64, 128], strides = [1, 1]} : vector<576x128xf32> to vector<64x128xf32>
    %21 = arith.maximumf %19, %20 : vector<64x128xf32>
    %22 = vector.extract_strided_slice %10 {offsets = [384, 0], sizes = [64, 128], strides = [1, 1]} : vector<576x128xf32> to vector<64x128xf32>
    %23 = arith.maximumf %21, %22 : vector<64x128xf32>
    %24 = vector.extract_strided_slice %10 {offsets = [448, 0], sizes = [64, 128], strides = [1, 1]} : vector<576x128xf32> to vector<64x128xf32>
    %25 = arith.maximumf %23, %24 : vector<64x128xf32>
    %26 = vector.extract_strided_slice %10 {offsets = [512, 0], sizes = [64, 128], strides = [1, 1]} : vector<576x128xf32> to vector<64x128xf32>
    %27 = arith.maximumf %25, %26 : vector<64x128xf32>
    %c0_10 = arith.constant 0 : index
    %c0_11 = arith.constant 0 : index
    %28 = vector.load %arg5[%c0_10, %c0_11] : memref<144x64xf32, #tpu.memory_space<vmem>>, vector<144x64xf32>
    %cst_12 = arith.constant dense<0.000000e+00> : vector<144x128xf32>
    %29 = tpu.matmul %28, %27, %cst_12 {dimension_numbers = #tpu.dot_dimension_numbers<[1], [0], [0], [1], [0, 0, 1, 1], [], []>} : vector<144x64xf32>, vector<64x128xf32>, vector<144x128xf32> -> vector<144x128xf32>
    %30 = vector.extract_strided_slice %29 {offsets = [0, 0], sizes = [16, 128], strides = [1, 1]} : vector<144x128xf32> to vector<16x128xf32>
    %31 = vector.extract_strided_slice %29 {offsets = [16, 0], sizes = [16, 128], strides = [1, 1]} : vector<144x128xf32> to vector<16x128xf32>
    %32 = vector.extract_strided_slice %29 {offsets = [32, 0], sizes = [16, 128], strides = [1, 1]} : vector<144x128xf32> to vector<16x128xf32>
    %33 = vector.extract_strided_slice %29 {offsets = [48, 0], sizes = [16, 128], strides = [1, 1]} : vector<144x128xf32> to vector<16x128xf32>
    %34 = vector.extract_strided_slice %29 {offsets = [64, 0], sizes = [16, 128], strides = [1, 1]} : vector<144x128xf32> to vector<16x128xf32>
    %35 = vector.extract_strided_slice %29 {offsets = [80, 0], sizes = [16, 128], strides = [1, 1]} : vector<144x128xf32> to vector<16x128xf32>
    %36 = vector.extract_strided_slice %29 {offsets = [96, 0], sizes = [16, 128], strides = [1, 1]} : vector<144x128xf32> to vector<16x128xf32>
    %37 = vector.extract_strided_slice %29 {offsets = [112, 0], sizes = [16, 128], strides = [1, 1]} : vector<144x128xf32> to vector<16x128xf32>
    %38 = vector.extract_strided_slice %29 {offsets = [128, 0], sizes = [16, 128], strides = [1, 1]} : vector<144x128xf32> to vector<16x128xf32>
    %39 = tpu.concatenate %30, %31, %32, %33, %34, %35, %36, %37, %38 in 1 : vector<16x128xf32>, vector<16x128xf32>, vector<16x128xf32>, vector<16x128xf32>, vector<16x128xf32>, vector<16x128xf32>, vector<16x128xf32>, vector<16x128xf32>, vector<16x128xf32> -> vector<16x1152xf32>
    %c0_13 = arith.constant 0 : index
    %c0_14 = arith.constant 0 : index
    %40 = vector.load %arg6[%c0_13, %c0_14] : memref<1152x256xf32, #tpu.memory_space<vmem>>, vector<1152x256xf32>
    %cst_15 = arith.constant dense<0.000000e+00> : vector<16x256xf32>
    %41 = tpu.matmul %39, %40, %cst_15 {dimension_numbers = #tpu.dot_dimension_numbers<[1], [0], [0], [1], [0, 0, 1, 1], [], []>} : vector<16x1152xf32>, vector<1152x256xf32>, vector<16x256xf32> -> vector<16x256xf32>
    %42 = vector.extract_strided_slice %41 {offsets = [0, 0], sizes = [16, 128], strides = [1, 1]} : vector<16x256xf32> to vector<16x128xf32>
    %c0_16 = arith.constant 0 : index
    %c0_17 = arith.constant 0 : index
    %43 = vector.load %arg7[%c0_16, %c0_17] : memref<1x128xf32, #tpu.memory_space<vmem>>, vector<1x128xf32>
    %44 = vector.broadcast %43 : vector<1x128xf32> to vector<16x128xf32>
    %45 = arith.addf %42, %44 : vector<16x128xf32>
    %cst_18 = arith.constant 0.000000e+00 : f32
    %46 = vector.broadcast %cst_18 : f32 to vector<16x128xf32>
    %47 = arith.maximumf %45, %46 : vector<16x128xf32>
    %48 = vector.extract_strided_slice %41 {offsets = [0, 128], sizes = [16, 128], strides = [1, 1]} : vector<16x256xf32> to vector<16x128xf32>
    %c0_19 = arith.constant 0 : index
    %c0_20 = arith.constant 0 : index
    %49 = vector.load %arg8[%c0_19, %c0_20] : memref<1x128xf32, #tpu.memory_space<vmem>>, vector<1x128xf32>
    %50 = vector.broadcast %49 : vector<1x128xf32> to vector<16x128xf32>
    %51 = arith.addf %48, %50 : vector<16x128xf32>
    %52 = arith.addf %47, %51 : vector<16x128xf32>
    %c0_21 = arith.constant 0 : index
    %c0_22 = arith.constant 0 : index
    %53 = vector.load %arg9[%c0_21, %c0_22] : memref<72x16xf32, #tpu.memory_space<vmem>>, vector<72x16xf32>
    %cst_23 = arith.constant dense<0.000000e+00> : vector<72x128xf32>
    %54 = tpu.matmul %53, %52, %cst_23 {dimension_numbers = #tpu.dot_dimension_numbers<[1], [0], [0], [1], [0, 0, 1, 1], [], []>} : vector<72x16xf32>, vector<16x128xf32>, vector<72x128xf32> -> vector<72x128xf32>
    %55 = vector.extract_strided_slice %54 {offsets = [0, 0], sizes = [8, 128], strides = [1, 1]} : vector<72x128xf32> to vector<8x128xf32>
    %56 = vector.extract_strided_slice %54 {offsets = [8, 0], sizes = [8, 128], strides = [1, 1]} : vector<72x128xf32> to vector<8x128xf32>
    %57 = vector.extract_strided_slice %54 {offsets = [16, 0], sizes = [8, 128], strides = [1, 1]} : vector<72x128xf32> to vector<8x128xf32>
    %58 = vector.extract_strided_slice %54 {offsets = [24, 0], sizes = [8, 128], strides = [1, 1]} : vector<72x128xf32> to vector<8x128xf32>
    %59 = vector.extract_strided_slice %54 {offsets = [32, 0], sizes = [8, 128], strides = [1, 1]} : vector<72x128xf32> to vector<8x128xf32>
    %60 = vector.extract_strided_slice %54 {offsets = [40, 0], sizes = [8, 128], strides = [1, 1]} : vector<72x128xf32> to vector<8x128xf32>
    %61 = vector.extract_strided_slice %54 {offsets = [48, 0], sizes = [8, 128], strides = [1, 1]} : vector<72x128xf32> to vector<8x128xf32>
    %62 = vector.extract_strided_slice %54 {offsets = [56, 0], sizes = [8, 128], strides = [1, 1]} : vector<72x128xf32> to vector<8x128xf32>
    %63 = vector.extract_strided_slice %54 {offsets = [64, 0], sizes = [8, 128], strides = [1, 1]} : vector<72x128xf32> to vector<8x128xf32>
    %64 = tpu.concatenate %55, %56, %57, %58, %59, %60, %61, %62, %63 in 1 : vector<8x128xf32>, vector<8x128xf32>, vector<8x128xf32>, vector<8x128xf32>, vector<8x128xf32>, vector<8x128xf32>, vector<8x128xf32>, vector<8x128xf32>, vector<8x128xf32> -> vector<8x1152xf32>
    %c0_24 = arith.constant 0 : index
    %c0_25 = arith.constant 0 : index
    %65 = vector.load %arg10[%c0_24, %c0_25] : memref<1152x256xf32, #tpu.memory_space<vmem>>, vector<1152x256xf32>
    %cst_26 = arith.constant dense<0.000000e+00> : vector<8x256xf32>
    %66 = tpu.matmul %64, %65, %cst_26 {dimension_numbers = #tpu.dot_dimension_numbers<[1], [0], [0], [1], [0, 0, 1, 1], [], []>} : vector<8x1152xf32>, vector<1152x256xf32>, vector<8x256xf32> -> vector<8x256xf32>
    %67 = vector.extract_strided_slice %66 {offsets = [0, 0], sizes = [8, 128], strides = [1, 1]} : vector<8x256xf32> to vector<8x128xf32>
    %c0_27 = arith.constant 0 : index
    %c0_28 = arith.constant 0 : index
    %68 = vector.load %arg11[%c0_27, %c0_28] : memref<1x128xf32, #tpu.memory_space<vmem>>, vector<1x128xf32>
    %69 = vector.broadcast %68 : vector<1x128xf32> to vector<8x128xf32>
    %70 = arith.addf %67, %69 : vector<8x128xf32>
    %cst_29 = arith.constant 0.000000e+00 : f32
    %71 = vector.broadcast %cst_29 : f32 to vector<8x128xf32>
    %72 = arith.maximumf %70, %71 : vector<8x128xf32>
    %73 = vector.extract_strided_slice %66 {offsets = [0, 128], sizes = [8, 128], strides = [1, 1]} : vector<8x256xf32> to vector<8x128xf32>
    %c0_30 = arith.constant 0 : index
    %c0_31 = arith.constant 0 : index
    %74 = vector.load %arg12[%c0_30, %c0_31] : memref<1x128xf32, #tpu.memory_space<vmem>>, vector<1x128xf32>
    %75 = vector.broadcast %74 : vector<1x128xf32> to vector<8x128xf32>
    %76 = arith.addf %73, %75 : vector<8x128xf32>
    %77 = arith.addf %72, %76 : vector<8x128xf32>
    %c0_32 = arith.constant 0 : index
    %c0_33 = arith.constant 0 : index
    %78 = vector.load %arg13[%c0_32, %c0_33] : memref<72x8xf32, #tpu.memory_space<vmem>>, vector<72x8xf32>
    %cst_34 = arith.constant dense<0.000000e+00> : vector<72x128xf32>
    %79 = tpu.matmul %78, %77, %cst_34 {dimension_numbers = #tpu.dot_dimension_numbers<[1], [0], [0], [1], [0, 0, 1, 1], [], []>} : vector<72x8xf32>, vector<8x128xf32>, vector<72x128xf32> -> vector<72x128xf32>
    %80 = vector.extract_strided_slice %79 {offsets = [0, 0], sizes = [8, 128], strides = [1, 1]} : vector<72x128xf32> to vector<8x128xf32>
    %81 = vector.extract_strided_slice %79 {offsets = [8, 0], sizes = [8, 128], strides = [1, 1]} : vector<72x128xf32> to vector<8x128xf32>
    %82 = vector.extract_strided_slice %79 {offsets = [16, 0], sizes = [8, 128], strides = [1, 1]} : vector<72x128xf32> to vector<8x128xf32>
    %83 = vector.extract_strided_slice %79 {offsets = [24, 0], sizes = [8, 128], strides = [1, 1]} : vector<72x128xf32> to vector<8x128xf32>
    %84 = vector.extract_strided_slice %79 {offsets = [32, 0], sizes = [8, 128], strides = [1, 1]} : vector<72x128xf32> to vector<8x128xf32>
    %85 = vector.extract_strided_slice %79 {offsets = [40, 0], sizes = [8, 128], strides = [1, 1]} : vector<72x128xf32> to vector<8x128xf32>
    %86 = vector.extract_strided_slice %79 {offsets = [48, 0], sizes = [8, 128], strides = [1, 1]} : vector<72x128xf32> to vector<8x128xf32>
    %87 = vector.extract_strided_slice %79 {offsets = [56, 0], sizes = [8, 128], strides = [1, 1]} : vector<72x128xf32> to vector<8x128xf32>
    %88 = vector.extract_strided_slice %79 {offsets = [64, 0], sizes = [8, 128], strides = [1, 1]} : vector<72x128xf32> to vector<8x128xf32>
    %89 = tpu.concatenate %80, %81, %82, %83, %84, %85, %86, %87, %88 in 1 : vector<8x128xf32>, vector<8x128xf32>, vector<8x128xf32>, vector<8x128xf32>, vector<8x128xf32>, vector<8x128xf32>, vector<8x128xf32>, vector<8x128xf32>, vector<8x128xf32> -> vector<8x1152xf32>
    %c0_35 = arith.constant 0 : index
    %c0_36 = arith.constant 0 : index
    %90 = vector.load %arg14[%c0_35, %c0_36] : memref<1152x256xf32, #tpu.memory_space<vmem>>, vector<1152x256xf32>
    %cst_37 = arith.constant dense<0.000000e+00> : vector<8x256xf32>
    %91 = tpu.matmul %89, %90, %cst_37 {dimension_numbers = #tpu.dot_dimension_numbers<[1], [0], [0], [1], [0, 0, 1, 1], [], []>} : vector<8x1152xf32>, vector<1152x256xf32>, vector<8x256xf32> -> vector<8x256xf32>
    %92 = vector.extract_strided_slice %91 {offsets = [0, 0], sizes = [8, 128], strides = [1, 1]} : vector<8x256xf32> to vector<8x128xf32>
    %c0_38 = arith.constant 0 : index
    %c0_39 = arith.constant 0 : index
    %93 = vector.load %arg15[%c0_38, %c0_39] : memref<1x128xf32, #tpu.memory_space<vmem>>, vector<1x128xf32>
    %94 = vector.broadcast %93 : vector<1x128xf32> to vector<8x128xf32>
    %95 = arith.addf %92, %94 : vector<8x128xf32>
    %cst_40 = arith.constant 0.000000e+00 : f32
    %96 = vector.broadcast %cst_40 : f32 to vector<8x128xf32>
    %97 = arith.maximumf %95, %96 : vector<8x128xf32>
    %98 = vector.extract_strided_slice %91 {offsets = [0, 128], sizes = [8, 128], strides = [1, 1]} : vector<8x256xf32> to vector<8x128xf32>
    %c0_41 = arith.constant 0 : index
    %c0_42 = arith.constant 0 : index
    %99 = vector.load %arg16[%c0_41, %c0_42] : memref<1x128xf32, #tpu.memory_space<vmem>>, vector<1x128xf32>
    %100 = vector.broadcast %99 : vector<1x128xf32> to vector<8x128xf32>
    %101 = arith.addf %98, %100 : vector<8x128xf32>
    %102 = arith.addf %97, %101 : vector<8x128xf32>
    %c0_43 = arith.constant 0 : index
    %c0_44 = arith.constant 0 : index
    %103 = vector.load %arg18[%c0_43, %c0_44] : memref<128x128xf32, #tpu.memory_space<vmem>>, vector<128x128xf32>
    %cst_45 = arith.constant dense<0.000000e+00> : vector<8x128xf32>
    %104 = tpu.matmul %102, %103, %cst_45 {dimension_numbers = #tpu.dot_dimension_numbers<[1], [0], [0], [1], [0, 0, 1, 1], [], []>} : vector<8x128xf32>, vector<128x128xf32>, vector<8x128xf32> -> vector<8x128xf32>
    %c0_46 = arith.constant 0 : index
    %c0_47 = arith.constant 0 : index
    %105 = vector.load %arg17[%c0_46, %c0_47] : memref<8x128xf32, #tpu.memory_space<vmem>>, vector<8x128xf32>
    %106 = arith.mulf %104, %105 : vector<8x128xf32>
    %cst_48 = arith.constant dense<0.000000e+00> : vector<128xf32>
    %107 = vector.multi_reduction <add>, %106, %cst_48 [0] : vector<8x128xf32> to vector<128xf32>
    %108 = vector.shape_cast %107 : vector<128xf32> to vector<1x128xf32>
    %c0_49 = arith.constant 0 : index
    %c0_50 = arith.constant 0 : index
    %109 = vector.load %arg19[%c0_49, %c0_50] : memref<1x128xf32, #tpu.memory_space<vmem>>, vector<1x128xf32>
    %110 = arith.addf %108, %109 : vector<1x128xf32>
    %c0_51 = arith.constant 0 : index
    %c0_52 = arith.constant 0 : index
    %c0_53 = arith.constant 0 : index
    %111 = vector.load %arg20[%c0_51, %c0_52, %c0_53] : memref<1x1x128xf32, #tpu.memory_space<vmem>>, vector<1x1x128xf32>
    %112 = vector.shape_cast %111 : vector<1x1x128xf32> to vector<1x128xf32>
    %113 = vector.shape_cast %110 : vector<1x128xf32> to vector<1x1x128xf32>
    tpu.vector_store %arg20[%c0_51, %c0_52, %c0_53], %113 {strides = array<i32>} : memref<1x1x128xf32, #tpu.memory_space<vmem>>, vector<1x1x128xf32>,
    return
  }
  func.func @transform_0(%arg0: i32) -> (i32, i32, i32) {
    %c0_i32 = arith.constant 0 : i32
    %c0_i32_0 = arith.constant 0 : i32
    %c0_i32_1 = arith.constant 0 : i32
    return %arg0, %c0_i32, %c0_i32_0 : i32, i32, i32
  }
  func.func @transform_1(%arg0: i32) -> (i32, i32) {
    %c0_i32 = arith.constant 0 : i32
    %c0_i32_0 = arith.constant 0 : i32
    %c0_i32_1 = arith.constant 0 : i32
    return %c0_i32, %c0_i32_0 : i32, i32
  }
  func.func @transform_2(%arg0: i32) -> (i32, i32) {
    %c0_i32 = arith.constant 0 : i32
    %c0_i32_0 = arith.constant 0 : i32
    %c0_i32_1 = arith.constant 0 : i32
    return %c0_i32, %c0_i32_0 : i32, i32
  }
  func.func @transform_3(%arg0: i32) -> (i32, i32) {
    %c0_i32 = arith.constant 0 : i32
    %c0_i32_0 = arith.constant 0 : i32
    %c0_i32_1 = arith.constant 0 : i32
    return %c0_i32, %c0_i32_0 : i32, i32
  }
  func.func @transform_4(%arg0: i32) -> (i32, i32) {
    %c0_i32 = arith.constant 0 : i32
    %c0_i32_0 = arith.constant 0 : i32
    %c0_i32_1 = arith.constant 0 : i32
    return %c0_i32, %c0_i32_0 : i32, i32
  }
  func.func @transform_5(%arg0: i32) -> (i32, i32) {
    %c0_i32 = arith.constant 0 : i32
    %c0_i32_0 = arith.constant 0 : i32
    %c0_i32_1 = arith.constant 0 : i32
    return %c0_i32, %c0_i32_0 : i32, i32
  }
  func.func @transform_6(%arg0: i32) -> (i32, i32) {
    %c0_i32 = arith.constant 0 : i32
    %c0_i32_0 = arith.constant 0 : i32
    %c0_i32_1 = arith.constant 0 : i32
    return %c0_i32, %c0_i32_0 : i32, i32
  }
  func.func @transform_7(%arg0: i32) -> (i32, i32) {
    %c0_i32 = arith.constant 0 : i32
    %c0_i32_0 = arith.constant 0 : i32
    %c0_i32_1 = arith.constant 0 : i32
    return %c0_i32, %c0_i32_0 : i32, i32
  }
  func.func @transform_8(%arg0: i32) -> (i32, i32) {
    %c0_i32 = arith.constant 0 : i32
    %c0_i32_0 = arith.constant 0 : i32
    %c0_i32_1 = arith.constant 0 : i32
    return %c0_i32, %c0_i32_0 : i32, i32
  }
  func.func @transform_9(%arg0: i32) -> (i32, i32) {
    %c0_i32 = arith.constant 0 : i32
    %c0_i32_0 = arith.constant 0 : i32
    %c0_i32_1 = arith.constant 0 : i32
    return %c0_i32, %c0_i32_0 : i32, i32
  }
  func.func @transform_10(%arg0: i32) -> (i32, i32) {
    %c0_i32 = arith.constant 0 : i32
    %c0_i32_0 = arith.constant 0 : i32
    %c0_i32_1 = arith.constant 0 : i32
    return %c0_i32, %c0_i32_0 : i32, i32
  }
  func.func @transform_11(%arg0: i32) -> (i32, i32) {
    %c0_i32 = arith.constant 0 : i32
    %c0_i32_0 = arith.constant 0 : i32
    %c0_i32_1 = arith.constant 0 : i32
    return %c0_i32, %c0_i32_0 : i32, i32
  }
  func.func @transform_12(%arg0: i32) -> (i32, i32) {
    %c0_i32 = arith.constant 0 : i32
    %c0_i32_0 = arith.constant 0 : i32
    %c0_i32_1 = arith.constant 0 : i32
    return %c0_i32, %c0_i32_0 : i32, i32
  }
  func.func @transform_13(%arg0: i32) -> (i32, i32) {
    %c0_i32 = arith.constant 0 : i32
    %c0_i32_0 = arith.constant 0 : i32
    %c0_i32_1 = arith.constant 0 : i32
    return %c0_i32, %c0_i32_0 : i32, i32
  }
  func.func @transform_14(%arg0: i32) -> (i32, i32) {
    %c0_i32 = arith.constant 0 : i32
    %c0_i32_0 = arith.constant 0 : i32
    %c0_i32_1 = arith.constant 0 : i32
    return %c0_i32, %c0_i32_0 : i32, i32
  }
  func.func @transform_15(%arg0: i32) -> (i32, i32) {
    %c0_i32 = arith.constant 0 : i32
    %c0_i32_0 = arith.constant 0 : i32
    %c0_i32_1 = arith.constant 0 : i32
    return %c0_i32, %c0_i32_0 : i32, i32
  }
  func.func @transform_16(%arg0: i32) -> (i32, i32) {
    %c0_i32 = arith.constant 0 : i32
    %c0_i32_0 = arith.constant 0 : i32
    %c0_i32_1 = arith.constant 0 : i32
    return %c0_i32, %c0_i32_0 : i32, i32
  }
  func.func @transform_17(%arg0: i32) -> (i32, i32) {
    %c0_i32 = arith.constant 0 : i32
    %c0_i32_0 = arith.constant 0 : i32
    %c0_i32_1 = arith.constant 0 : i32
    return %c0_i32, %c0_i32_0 : i32, i32
  }
  func.func @transform_18(%arg0: i32) -> (i32, i32) {
    %c0_i32 = arith.constant 0 : i32
    %c0_i32_0 = arith.constant 0 : i32
    %c0_i32_1 = arith.constant 0 : i32
    return %c0_i32, %c0_i32_0 : i32, i32
  }
  func.func @transform_19(%arg0: i32) -> (i32, i32, i32) {
    %c0_i32 = arith.constant 0 : i32
    %c0_i32_0 = arith.constant 0 : i32
    %c0_i32_1 = arith.constant 0 : i32
    return %arg0, %c0_i32, %c0_i32_0 : i32, i32, i32
  }
}

</mosaic_0001>

<bundles_post_ra>
// kernel: cnn_classifier_forward.1
= control target key start
LH: loop header
LB: loop body
LE: loop exit
PB: predicated region body
PF: predicated region fallthrough
CT: control target
= control target key end

     0   :  { %s8571_s0 = inlined_call_operand.vmem [shape: f32[2,256,256], index: 0, kind: input, shape index: {}]   ;;  %s8572_s1 = inlined_call_operand.vmem [shape: f32[256,128], index: 1, kind: input, shape index: {}]   ;;  %s8573_s2 = inlined_call_operand.vmem [shape: f32[1,128], index: 2, kind: input, shape index: {}]   ;;  %s8574_s3 = inlined_call_operand.vmem [shape: f32[576,256], index: 3, kind: input, shape index: {}]   ;;  %s8575_s4 = inlined_call_operand.vmem [shape: f32[144,64], index: 4, kind: input, shape index: {}]   ;;  %s8576_s5 = inlined_call_operand.vmem [shape: f32[1152,256], index: 5, kind: input, shape index: {}]   ;;  %s8577_s6 = inlined_call_operand.vmem [shape: f32[1,128], index: 6, kind: input, shape index: {}]   ;;  %s8578_s7 = inlined_call_operand.vmem [shape: f32[1,128], index: 7, kind: input, shape index: {}]   ;;  %s8579_s8 = inlined_call_operand.vmem [shape: f32[72,16], index: 8, kind: input, shape index: {}]   ;;  %s8580_s9 = inlined_call_operand.vmem [shape: f32[1152,256], index: 9, kind: input, shape index: {}]   ;;  %s8581_s10 = inlined_call_operand.vmem [shape: f32[1,128], index: 10, kind: input, shape index: {}]   ;;  %s8582_s11 = inlined_call_operand.vmem [shape: f32[1,128], index: 11, kind: input, shape index: {}]   ;;  %s8583_s12 = inlined_call_operand.vmem [shape: f32[72,8], index: 12, kind: input, shape index: {}]   ;;  %s8584_s13 = inlined_call_operand.vmem [shape: f32[1152,256], index: 13, kind: input, shape index: {}]   ;;  %s8585_s14 = inlined_call_operand.vmem [shape: f32[1,128], index: 14, kind: input, shape index: {}]   ;;  %s8586_s15 = inlined_call_operand.vmem [shape: f32[1,128], index: 15, kind: input, shape index: {}]   ;;  %s8587_s16 = inlined_call_operand.vmem [shape: f32[8,128], index: 16, kind: input, shape index: {}]   ;;  %s8588_s17 = inlined_call_operand.vmem [shape: f32[128,128], index: 17, kind: input, shape index: {}]   ;;  %s8589_s18 = inlined_call_operand.vmem [shape: f32[1,128], index: 18, kind: input, shape index: {}]   ;;  %s8590_s19 = inlined_call_operand.hbm [shape: f32[2,1,128], index: 19, kind: output, shape index: {}]  }
   0x1   :  { %8599 = sst [smem:[#allocation11_spill]] %s8571_s0 }
   0x2   :  { %8600 = sst [smem:[#allocation12_spill]] %s8572_s1 }
   0x3   :  { %8601 = sst [smem:[#allocation13_spill]] %s8573_s2 }
   0x4   :  { %8602 = sst [smem:[#allocation14_spill]] %s8574_s3 }
   0x5   :  { %8603 = sst [smem:[#allocation15_spill]] %s8575_s4 }
   0x6   :  { %8604 = sst [smem:[#allocation16_spill]] %s8576_s5 }
   0x7   :  { %24 = vsyncpa [#allocation3], 0 }
   0x8   :  { %26 = vsyncpa [#allocation3 + $0x1], 0  ;;  %s4758_s0 = smov 0   ;;  %s4760_s30 = smov 0  }
   0x9   :  { %s4762_s20 = smov 0   ;;  %s4764_s21 = smov 0  }
   0xa LB: > { %8605 = sst [smem:[#allocation5_spill]] %s4641_s0  ;;  %s4779_s1 = sadd.s32 4294967295, %s4653_s21   ;;  %s4653_s21 = sphi %s4764_s21, %s8623_s21   ;;  %s4649_s20 = sphi %s4762_s20, %s8628_s20   ;;  %s4645_s30 = sphi %s4760_s30, %s8627_s30   ;;  %s4641_s0 = sphi %s4758_s0, %s8626_s0  }
   0xb   : > { %8606 = sst [smem:[#allocation6_spill]] %s4649_s20  ;;  %s4297_s22 = sadd.s32 4294967294, %s4653_s21  }
   0xc   : > { %8607 = sst [smem:[#allocation7_spill]] %s4653_s21  ;;  %s4783_s2 = sadd.s32 1, %s4653_s21  }
   0xd   : > { %8608 = sst [smem:[#allocation8_spill]] %s4783_s2  ;;  %s443_s23 = sadd.s32 1, %s4649_s20 }
   0xe   : > { %s440_s24 = ssub.s32 %s4653_s21, %s4783_s2  ;;  %p453_p0 = scmp.ne.s32.totalorder %s4649_s20, %s4645_s30 }
   0xf   : > { %p441_p1 = scmp.eq.s32.totalorder %s440_s24, 0  ;;  %p454_p2 = scmp.eq.s32.totalorder %s4779_s1, 1 }
  0x10   : > { %p459_p3 = scmp.ne.s32.totalorder %s4645_s30, %s4641_s0  ;;  %p460_p4 = scmp.eq.s32.totalorder %s4297_s22, 1 }
  0x11   : > { %s4794_s25 = scalar_select %p441_p1, %s4649_s20, %s443_s23  }
  0x12   : > { %p4796_p5 = por %p454_p2, %p453_p0  ;;  %p4800_p6 = por %p460_p4, %p459_p3 }
  0x13   : > { %8609 = sst [smem:[#allocation9_spill]] %s4794_s25  ;;  %p4300_p7 = scmp.ge.s32.totalorder %s4653_s21, 1 }
  0x14   : > { %s8611_s26 = scalar_select %p4800_p6, 1, 0 }
  0x15   : > { %p540_p8 = scmp.lt.s32.totalorder %s4653_s21, 3 }
  0x16   : > { %8612 = sst [smem:[#allocation10_spill]] %s8611_s26 }
  0x17   : > { %p541_p9 = pnand %p4300_p7, %p540_p8 }
  0x18   : > { %s8613_s29 = sld [smem:[#allocation12_spill]] (!%p541_p9)  ;;  %p595_p10 = scmp.lt.s32.totalorder (!%p541_p9), %s4779_s1, 1 }
  0x19   : > { %544 = sbr.rel (%p541_p9) target bundleno = 2693 (0xa85), region = 96  ;;  %s8614_s21 = sld [smem:[#allocation11_spill]] (!%p541_p9) }
  0x1a   : > { %s8617_s23 = sld [smem:[#allocation13_spill]] (!%p541_p9)  ;;  %s593_s2 = sand.u32 (!%p541_p9), 1, %s4645_s30  }
  0x1b   : > { %s8618_s4 = sld [smem:[#allocation15_spill]] (!%p541_p9)  ;;  %s4346_s0 = sshll.u32 (!%p541_p9), %s4779_s1, 4 }
  0x1c   : > { %s8619_s5 = sld [smem:[#allocation16_spill]] (!%p541_p9)  ;;  %s4240_s25 = scalar_lea.hbm (!%p541_p9), %s8590_s19, %s4346_s0 }
  0x1e   : > { %v679_v0 = vld [vmem:[%s8613_s29 + $0x78] sm:$0xff]  ;;  %v4655_v1 = vmov 0.0   ;;  %v678_v2 = vld [vmem:[%s8613_s29 + $0x70] sm:$0xff]  ;;  %s596_s24 = scalar_select %p595_p10, %s4779_s1, 1  ;;  %v677_v3 = vld [vmem:[%s8613_s29 + $0x68] sm:$0xff]  ;;  %vm1611_vm0 = vcmask 523264  }
  0x1f   : > { %703 = vmatprep.subr.mxu0 %v4655_v1  ;;  %1104 = vmatprep.subr.mxu1 %v4655_v1  ;;  %v676_v4 = vld [vmem:[%s8613_s29 + $0x60] sm:$0xff]  ;;  %v675_v5 = vld [vmem:[%s8613_s29 + $0x58] sm:$0xff]  ;;  %v674_v6 = vld [vmem:[%s8613_s29 + $0x50] sm:$0xff]  ;;  %vm4656_vm1 = vmmov 0   ;;  %vm2525_vm2 = vcmask 130048   ;;  %vm3333_vm3 = vcmask 64512  }
  0x20   : > { %704 = vmatpush1.msra.mxu0 %v679_v0  ;;  %s4349_s27 = sshll.u32 %s596_s24, 9  ;;  %v673_v8 = vld [vmem:[%s8613_s29 + $0x48] sm:$0xff]  ;;  %v672_v9 = vld [vmem:[%s8613_s29 + $0x40] sm:$0xff]  ;;  %v671_v10 = vld [vmem:[%s8613_s29 + $0x38] sm:$0xff]  ;;  %s4230_s24 = scalar_lea.sflag [#allocation3], %s593_s2 }
  0x21   : > { %705 = vmatprep.subr.mxu0 %v4655_v1  ;;  %s4831_s20 = scalar_lea.vmem %s8614_s21, %s4349_s27  ;;  %v670_v11 = vld [vmem:[%s8613_s29 + $0x30] sm:$0xff]  ;;  %v669_v12 = vld [vmem:[%s8613_s29 + $0x28] sm:$0xff]  ;;  %v668_v13 = vld [vmem:[%s8613_s29 + $0x20] sm:$0xff]  ;;  %s8615_s21 = sld [smem:[#allocation14_spill]] }
  0x22   : > { %706 = vmatpush1.msra.mxu0 %v678_v2  ;;  %v601_v7 = vld [vmem:[%s4831_s20 + $0x8] sm:$0xff]  ;;  %v667_v14 = vld [vmem:[%s8613_s29 + $0x18] sm:$0xff]  ;;  %v666_v15 = vld [vmem:[%s8613_s29 + $0x10] sm:$0xff] }
  0x23   : > { %707 = vmatprep.subr.mxu0 %v4655_v1  ;;  %767 = vmatprep.mubr.f32.mxu0 %v601_v7  ;;  %v665_v16 = vld [vmem:[%s8613_s29 + $0x8] sm:$0xff]  ;;  %v664_v17 = vld [vmem:[%s8613_s29] sm:$0xff]  ;;  %v695_v18 = vld [vmem:[%s8613_s29 + $0xf8] sm:$0xff] }
  0x24   : > { %708 = vmatpush1.msra.mxu0 %v677_v3  ;;  %v694_v19 = vld [vmem:[%s8613_s29 + $0xf0] sm:$0xff]  ;;  %v693_v20 = vld [vmem:[%s8613_s29 + $0xe8] sm:$0xff]  ;;  %v692_v21 = vld [vmem:[%s8613_s29 + $0xe0] sm:$0xff] }
  0x25   : > { %709 = vmatprep.subr.mxu0 %v4655_v1  ;;  %v691_v22 = vld [vmem:[%s8613_s29 + $0xd8] sm:$0xff]  ;;  %v690_v23 = vld [vmem:[%s8613_s29 + $0xd0] sm:$0xff]  ;;  %v689_v24 = vld [vmem:[%s8613_s29 + $0xc8] sm:$0xff] }
  0x26   : > { %710 = vmatpush1.msra.mxu0 %v676_v4  ;;  %v688_v25 = vld [vmem:[%s8613_s29 + $0xc0] sm:$0xff]  ;;  %v687_v26 = vld [vmem:[%s8613_s29 + $0xb8] sm:$0xff]  ;;  %v686_v27 = vld [vmem:[%s8613_s29 + $0xb0] sm:$0xff] }
  0x27   : > { %711 = vmatprep.subr.mxu0 %v4655_v1  ;;  %v685_v28 = vld [vmem:[%s8613_s29 + $0xa8] sm:$0xff]  ;;  %v684_v29 = vld [vmem:[%s8613_s29 + $0xa0] sm:$0xff]  ;;  %v683_v30 = vld [vmem:[%s8613_s29 + $0x98] sm:$0xff]  ;;  %s8616_s26 = smov %s8615_s21 }
  0x28   : > { %712 = vmatpush1.msra.mxu0 %v675_v5  ;;  %v682_v31 = vld [vmem:[%s8613_s29 + $0x90] sm:$0xff]  ;;  %v681_v32 = vld [vmem:[%s8613_s29 + $0x88] sm:$0xff]  ;;  %v680_v33 = vld [vmem:[%s8613_s29 + $0x80] sm:$0xff] }
  0x29   : > { %713 = vmatprep.subr.mxu0 %v4655_v1  ;;  %v600_v34 = vld [vmem:[%s4831_s20] sm:$0xff]  ;;  %v603_v35 = vld [vmem:[%s4831_s20 + $0x18] sm:$0xff]  ;;  %v602_v36 = vld [vmem:[%s4831_s20 + $0x10] sm:$0xff] }
  0x2a   : > { %714 = vmatpush1.msra.mxu0 %v674_v6  ;;  %v605_v37 = vld [vmem:[%s4831_s20 + $0x28] sm:$0xff]  ;;  %v604_v38 = vld [vmem:[%s4831_s20 + $0x20] sm:$0xff]  ;;  %v607_v39 = vld [vmem:[%s4831_s20 + $0x38] sm:$0xff] }
  0x2b   : > { %715 = vmatprep.subr.mxu0 %v4655_v1  ;;  %v606_v40 = vld [vmem:[%s4831_s20 + $0x30] sm:$0xff]  ;;  %v609_v41 = vld [vmem:[%s4831_s20 + $0x48] sm:$0xff]  ;;  %v608_v42 = vld [vmem:[%s4831_s20 + $0x40] sm:$0xff] }
  0x2c   : > { %716 = vmatpush1.msra.mxu0 %v673_v8  ;;  %v611_v43 = vld [vmem:[%s4831_s20 + $0x58] sm:$0xff]  ;;  %v610_v44 = vld [vmem:[%s4831_s20 + $0x50] sm:$0xff]  ;;  %v613_v45 = vld [vmem:[%s4831_s20 + $0x68] sm:$0xff] }
  0x2d   : > { %717 = vmatprep.subr.mxu0 %v4655_v1  ;;  %v612_v46 = vld [vmem:[%s4831_s20 + $0x60] sm:$0xff]  ;;  %v615_v47 = vld [vmem:[%s4831_s20 + $0x78] sm:$0xff]  ;;  %v614_v48 = vld [vmem:[%s4831_s20 + $0x70] sm:$0xff] }
  0x2e   : > { %718 = vmatpush1.msra.mxu0 %v672_v9  ;;  %v617_v49 = vld [vmem:[%s4831_s20 + $0x88] sm:$0xff]  ;;  %v616_v50 = vld [vmem:[%s4831_s20 + $0x80] sm:$0xff]  ;;  %v619_v51 = vld [vmem:[%s4831_s20 + $0x98] sm:$0xff] }
  0x2f   : > { %719 = vmatprep.subr.mxu0 %v4655_v1  ;;  %v618_v52 = vld [vmem:[%s4831_s20 + $0x90] sm:$0xff]  ;;  %v621_v53 = vld [vmem:[%s4831_s20 + $0xa8] sm:$0xff]  ;;  %v620_v54 = vld [vmem:[%s4831_s20 + $0xa0] sm:$0xff] }
  0x30   : > { %720 = vmatpush1.msra.mxu0 %v671_v10  ;;  %v623_v55 = vld [vmem:[%s4831_s20 + $0xb8] sm:$0xff]  ;;  %v622_v56 = vld [vmem:[%s4831_s20 + $0xb0] sm:$0xff]  ;;  %v625_v57 = vld [vmem:[%s4831_s20 + $0xc8] sm:$0xff] }
  0x31   : > { %721 = vmatprep.subr.mxu0 %v4655_v1  ;;  %v624_v58 = vld [vmem:[%s4831_s20 + $0xc0] sm:$0xff]  ;;  %v627_v59 = vld [vmem:[%s4831_s20 + $0xd8] sm:$0xff]  ;;  %v626_v60 = vld [vmem:[%s4831_s20 + $0xd0] sm:$0xff] }
  0x32   : > { %722 = vmatpush1.msra.mxu0 %v670_v11  ;;  %v629_v61 = vld [vmem:[%s4831_s20 + $0xe8] sm:$0xff]  ;;  %v628_v62 = vld [vmem:[%s4831_s20 + $0xe0] sm:$0xff]  ;;  %v631_v63 = vld [vmem:[%s4831_s20 + $0xf8] sm:$0xff] }
  0x33   : > { %723 = vmatprep.subr.mxu0 %v4655_v1  ;;  %v630_v0 = vld [vmem:[%s4831_s20 + $0xf0] sm:$0xff]  ;;  %v633_v2 = vld [vmem:[%s4831_s20 + $0x108] sm:$0xff]  ;;  %v632_v3 = vld [vmem:[%s4831_s20 + $0x100] sm:$0xff] }
  0x34   : > { %724 = vmatpush1.msra.mxu0 %v669_v12  ;;  %v635_v4 = vld [vmem:[%s4831_s20 + $0x118] sm:$0xff]  ;;  %v634_v5 = vld [vmem:[%s4831_s20 + $0x110] sm:$0xff]  ;;  %v637_v6 = vld [vmem:[%s4831_s20 + $0x128] sm:$0xff] }
  0x35   : > { %725 = vmatprep.subr.mxu0 %v4655_v1  ;;  %v636_v7 = vld [vmem:[%s4831_s20 + $0x120] sm:$0xff]  ;;  %v639_v8 = vld [vmem:[%s4831_s20 + $0x138] sm:$0xff]  ;;  %v638_v9 = vld [vmem:[%s4831_s20 + $0x130] sm:$0xff] }
  0x36   : > { %726 = vmatpush1.msra.mxu0 %v668_v13  ;;  %v641_v10 = vld [vmem:[%s4831_s20 + $0x148] sm:$0xff]  ;;  %v640_v11 = vld [vmem:[%s4831_s20 + $0x140] sm:$0xff]  ;;  %v643_v12 = vld [vmem:[%s4831_s20 + $0x158] sm:$0xff] }
  0x37   : > { %727 = vmatprep.subr.mxu0 %v4655_v1  ;;  %v642_v13 = vld [vmem:[%s4831_s20 + $0x150] sm:$0xff] }
  0x38   : > { %728 = vmatpush1.msra.mxu0 %v667_v14  ;;  %v645_v14 = vld [vmem:[%s4831_s20 + $0x168] sm:$0xff] }
  0x39   : > { %729 = vmatprep.subr.mxu0 %v4655_v1 }
  0x3a   : > { %730 = vmatpush1.msra.mxu0 %v666_v15  ;;  %v644_v15 = vld [vmem:[%s4831_s20 + $0x160] sm:$0xff] }
  0x3b   : > { %731 = vmatprep.subr.mxu0 %v4655_v1 }
  0x3c   : > { %732 = vmatpush1.msra.mxu0 %v665_v16  ;;  %v647_v16 = vld [vmem:[%s4831_s20 + $0x178] sm:$0xff] }
  0x3d   : > { %733 = vmatprep.subr.mxu0 %v4655_v1 }
  0x3e   : > { %734 = vmatpush1.msra.mxu0 %v664_v17  ;;  %v646_v17 = vld [vmem:[%s4831_s20 + $0x170] sm:$0xff] }
  0x3f   : > { %735 = vmatprep.subr.mxu0 %v4655_v1 }
  0x40   : > { %736 = vmatpush2.msra.mxu0 %v695_v18  ;;  %v649_v18 = vld [vmem:[%s4831_s20 + $0x188] sm:$0xff] }
  0x41   : > { %737 = vmatprep.subr.mxu0 %v4655_v1 }
  0x42   : > { %738 = vmatpush2.msra.mxu0 %v694_v19  ;;  %v648_v19 = vld [vmem:[%s4831_s20 + $0x180] sm:$0xff] }
  0x43   : > { %739 = vmatprep.subr.mxu0 %v4655_v1 }
  0x44   : > { %740 = vmatpush2.msra.mxu0 %v693_v20  ;;  %v651_v20 = vld [vmem:[%s4831_s20 + $0x198] sm:$0xff] }
  0x45   : > { %741 = vmatprep.subr.mxu0 %v4655_v1 }
  0x46   : > { %742 = vmatpush2.msra.mxu0 %v692_v21  ;;  %v650_v21 = vld [vmem:[%s4831_s20 + $0x190] sm:$0xff] }
  0x47   : > { %743 = vmatprep.subr.mxu0 %v4655_v1 }
  0x48   : > { %744 = vmatpush2.msra.mxu0 %v691_v22  ;;  %v653_v22 = vld [vmem:[%s4831_s20 + $0x1a8] sm:$0xff] }
  0x49   : > { %745 = vmatprep.subr.mxu0 %v4655_v1 }
  0x4a   : > { %746 = vmatpush2.msra.mxu0 %v690_v23  ;;  %v652_v23 = vld [vmem:[%s4831_s20 + $0x1a0] sm:$0xff] }
  0x4b   : > { %747 = vmatprep.subr.mxu0 %v4655_v1 }
  0x4c   : > { %748 = vmatpush2.msra.mxu0 %v689_v24  ;;  %v655_v24 = vld [vmem:[%s4831_s20 + $0x1b8] sm:$0xff] }
  0x4d   : > { %749 = vmatprep.subr.mxu0 %v4655_v1 }
  0x4e   : > { %750 = vmatpush2.msra.mxu0 %v688_v25  ;;  %v654_v25 = vld [vmem:[%s4831_s20 + $0x1b0] sm:$0xff] }
  0x4f   : > { %751 = vmatprep.subr.mxu0 %v4655_v1 }
  0x50   : > { %752 = vmatpush2.msra.mxu0 %v687_v26  ;;  %v657_v26 = vld [vmem:[%s4831_s20 + $0x1c8] sm:$0xff] }
  0x51   : > { %753 = vmatprep.subr.mxu0 %v4655_v1 }
  0x52   : > { %754 = vmatpush2.msra.mxu0 %v686_v27  ;;  %v656_v27 = vld [vmem:[%s4831_s20 + $0x1c0] sm:$0xff] }
  0x53   : > { %755 = vmatprep.subr.mxu0 %v4655_v1 }
  0x54   : > { %756 = vmatpush2.msra.mxu0 %v685_v28  ;;  %v659_v28 = vld [vmem:[%s4831_s20 + $0x1d8] sm:$0xff] }
  0x55   : > { %757 = vmatprep.subr.mxu0 %v4655_v1 }
  0x56   : > { %758 = vmatpush2.msra.mxu0 %v684_v29  ;;  %v658_v29 = vld [vmem:[%s4831_s20 + $0x1d0] sm:$0xff] }
  0x57   : > { %759 = vmatprep.subr.mxu0 %v4655_v1 }
  0x58   : > { %760 = vmatpush2.msra.mxu0 %v683_v30  ;;  %v661_v30 = vld [vmem:[%s4831_s20 + $0x1e8] sm:$0xff] }
  0x59   : > { %761 = vmatprep.subr.mxu0 %v4655_v1 }
  0x5a   : > { %762 = vmatpush2.msra.mxu0 %v682_v31  ;;  %v660_v31 = vld [vmem:[%s4831_s20 + $0x1e0] sm:$0xff] }
  0x5b   : > { %763 = vmatprep.subr.mxu0 %v4655_v1 }
  0x5c   : > { %764 = vmatpush2.msra.mxu0 %v681_v32  ;;  %v663_v32 = vld [vmem:[%s4831_s20 + $0x1f8] sm:$0xff] }
  0x5d   : > { %765 = vmatprep.subr.mxu0 %v4655_v1 }
  0x5e   : > { %766 = vmatpush2.msra.mxu0 %v680_v33  ;;  %v662_v33 = vld [vmem:[%s4831_s20 + $0x1f0] sm:$0xff] }
  0x5f   : > { %768 = vmatmul.mubr.f32.vlgmr.msra.gmra.mxu0 %v600_v34 }
  0x60   : > { %772 = vmatprep.mubr.f32.mxu0 %v603_v35 }
  0x63   : > { %773 = vmatmul.mubr.f32.gmra.mxu0 %v602_v36 }
  0x64   : > { %777 = vmatprep.mubr.f32.mxu0 %v605_v37 }
  0x67   : > { %778 = vmatmul.mubr.f32.gmra.mxu0 %v604_v38 }
  0x68   : > { %782 = vmatprep.mubr.f32.mxu0 %v607_v39 }
  0x6b   : > { %783 = vmatmul.mubr.f32.gmra.mxu0 %v606_v40 }
  0x6c   : > { %787 = vmatprep.mubr.f32.mxu0 %v609_v41 }
  0x6f   : > { %788 = vmatmul.mubr.f32.gmra.mxu0 %v608_v42 }
  0x70   : > { %792 = vmatprep.mubr.f32.mxu0 %v611_v43 }
  0x73   : > { %793 = vmatmul.mubr.f32.gmra.mxu0 %v610_v44 }
  0x74   : > { %797 = vmatprep.mubr.f32.mxu0 %v613_v45 }
  0x77   : > { %798 = vmatmul.mubr.f32.gmra.mxu0 %v612_v46 }
  0x78   : > { %802 = vmatprep.mubr.f32.mxu0 %v615_v47 }
  0x7b   : > { %803 = vmatmul.mubr.f32.gmra.mxu0 %v614_v48 }
  0x7c   : > { %807 = vmatprep.mubr.f32.mxu0 %v617_v49 }
  0x7f   : > { %808 = vmatmul.mubr.f32.gmra.mxu0 %v616_v50  ;;  %v961_v50 = vld [vmem:[%s8615_s21 + $0x8] sm:$0xff]  ;;  %s594_s21 = scalar_lea.vmem [#allocation2], %s593_s2 }
  0x80   : > { %812 = vmatprep.mubr.f32.mxu0 %v619_v51  ;;  %1168 = vmatprep.mubr.f32.mxu1 %v961_v50  ;;  %s4242_s27 = sshll.u32 %s594_s21, 4  ;;  %s4243_s27 = int_to_ptr.vmem [resolvable:$true] %s4242_s27 }
  0x83   : > { %813 = vmatmul.mubr.f32.gmra.mxu0 %v618_v52 }
  0x84   : > { %817 = vmatprep.mubr.f32.mxu0 %v621_v53 }
  0x87   : > { %818 = vmatmul.mubr.f32.gmra.mxu0 %v620_v54 }
  0x88   : > { %822 = vmatprep.mubr.f32.mxu0 %v623_v55 }
  0x8b   : > { %823 = vmatmul.mubr.f32.gmra.mxu0 %v622_v56 }
  0x8c   : > { %827 = vmatprep.mubr.f32.mxu0 %v625_v57 }
  0x8f   : > { %828 = vmatmul.mubr.f32.gmra.mxu0 %v624_v58 }
  0x90   : > { %832 = vmatprep.mubr.f32.mxu0 %v627_v59 }
  0x93   : > { %833 = vmatmul.mubr.f32.gmra.mxu0 %v626_v60 }
  0x94   : > { %837 = vmatprep.mubr.f32.mxu0 %v629_v61 }
  0x97   : > { %838 = vmatmul.mubr.f32.gmra.mxu0 %v628_v62 }
  0x98   : > { %842 = vmatprep.mubr.f32.mxu0 %v631_v63 }
  0x9b   : > { %843 = vmatmul.mubr.f32.gmra.mxu0 %v630_v0 }
  0x9c   : > { %847 = vmatprep.mubr.f32.mxu0 %v633_v2  ;;  %v5024_v2 = vld [vmem:[%s8617_s23] ss:$0 sm:$0xff] }
  0x9f   : > { %848 = vmatmul.mubr.f32.gmra.mxu0 %v632_v3 }
  0xa0   : > { %852 = vmatprep.mubr.f32.mxu0 %v635_v4 }
  0xa3   : > { %853 = vmatmul.mubr.f32.gmra.mxu0 %v634_v5 }
  0xa4   : > { %857 = vmatprep.mubr.f32.mxu0 %v637_v6 }
  0xa7   : > { %858 = vmatmul.mubr.f32.gmra.mxu0 %v636_v7 }
  0xa8   : > { %862 = vmatprep.mubr.f32.mxu0 %v639_v8 }
  0xab   : > { %863 = vmatmul.mubr.f32.gmra.mxu0 %v638_v9 }
  0xac   : > { %867 = vmatprep.mubr.f32.mxu0 %v641_v10 }
  0xaf   : > { %868 = vmatmul.mubr.f32.gmra.mxu0 %v640_v11 }
  0xb0   : > { %872 = vmatprep.mubr.f32.mxu0 %v643_v12 }
  0xb3   : > { %873 = vmatmul.mubr.f32.gmra.mxu0 %v642_v13 }
  0xb4   : > { %877 = vmatprep.mubr.f32.mxu0 %v645_v14 }
  0xb7   : > { %878 = vmatmul.mubr.f32.gmra.mxu0 %v644_v15 }
  0xb8   : > { %882 = vmatprep.mubr.f32.mxu0 %v647_v16 }
  0xbb   : > { %883 = vmatmul.mubr.f32.gmra.mxu0 %v646_v17 }
  0xbc   : > { %887 = vmatprep.mubr.f32.mxu0 %v649_v18 }
  0xbf   : > { %888 = vmatmul.mubr.f32.gmra.mxu0 %v648_v19 }
  0xc0   : > { %892 = vmatprep.mubr.f32.mxu0 %v651_v20 }
  0xc3   : > { %893 = vmatmul.mubr.f32.gmra.mxu0 %v650_v21 }
  0xc4   : > { %897 = vmatprep.mubr.f32.mxu0 %v653_v22 }
  0xc7   : > { %898 = vmatmul.mubr.f32.gmra.mxu0 %v652_v23 }
  0xc8   : > { %902 = vmatprep.mubr.f32.mxu0 %v655_v24 }
  0xcb   : > { %903 = vmatmul.mubr.f32.gmra.mxu0 %v654_v25 }
  0xcc   : > { %907 = vmatprep.mubr.f32.mxu0 %v657_v26 }
  0xcf   : > { %908 = vmatmul.mubr.f32.gmra.mxu0 %v656_v27 }
  0xd0   : > { %912 = vmatprep.mubr.f32.mxu0 %v659_v28 }
  0xd3   : > { %913 = vmatmul.mubr.f32.gmra.mxu0 %v658_v29 }
  0xd4   : > { %917 = vmatprep.mubr.f32.mxu0 %v661_v30 }
  0xd7   : > { %918 = vmatmul.mubr.f32.gmra.mxu0 %v660_v31 }
  0xd8   : > { %922 = vmatprep.mubr.f32.mxu0 %v663_v32 }
  0xdb   : > { %923 = vmatmul.mubr.f32.gmra.mxu0 %v662_v33 }
 0x11f   : > { %v5006_v34 = vpop.f32.mrf.mxu0 }
 0x121   : > { %v771_v35 = vpop.f32.mrf.mxu0 }
 0x123   : > { %v5008_v36 = vpop.f32.mrf.mxu0 }
 0x125   : > { %v776_v37 = vpop.f32.mrf.mxu0 }
 0x127   : > { %v5010_v38 = vpop.f32.mrf.mxu0 }
 0x129   : > { %v781_v39 = vpop.f32.mrf.mxu0 }
 0x12b   : > { %v5012_v40 = vpop.f32.mrf.mxu0 }
 0x12d   : > { %v786_v41 = vpop.f32.mrf.mxu0 }
 0x12e   : > { %v785_v41 = vadd.f32 %v5024_v2, %v5012_v40 }
 0x12f   : > { %v5014_v42 = vpop.f32.mrf.mxu0 }
 0x130   : > { %v790_v35 = vadd.f32 %v5024_v2, %v5014_v42 }
 0x131   : > { %v791_v43 = vpop.f32.mrf.mxu0 }
 0x133   : > { %v5016_v44 = vpop.f32.mrf.mxu0 }
 0x134   : > { %v795_v31 = vadd.f32 %v5024_v2, %v5016_v44 }
 0x135   : > { %v796_v45 = vpop.f32.mrf.mxu0 }
 0x136   : > { %v933_v43 = vmax.f32 %v795_v31, 0.0  ;;  %v780_v45 = vadd.f32 %v5024_v2, %v5010_v38 }
 0x137   : > { %v799_v46 = vpop.f32.mrf.mxu0 }
 0x138   : > { %v800_v28 = vadd.f32 %v5024_v2, %v799_v46  ;;  %v932_v46 = vmax.f32 %v790_v35, 0.0  ;;  %v930_v50 = vmax.f32 %v780_v45, 0.0 }
 0x139   : > { %v801_v47 = vpop.f32.mrf.mxu0 }
 0x13a   : > { %v934_v37 = vmax.f32 %v800_v28, 0.0  ;;  %v775_v47 = vadd.f32 %v5024_v2, %v5008_v36 }
 0x13b   : > { %v804_v48 = vpop.f32.mrf.mxu0 }
 0x13c   : > { %v805_v25 = vadd.f32 %v5024_v2, %v804_v48  ;;  %v931_v48 = vmax.f32 %v785_v41, 0.0  ;;  %v929_v38 = vmax.f32 %v775_v47, 0.0  ;;  %v967_v47 = vld [vmem:[%s8616_s26 + $0x38] sm:$0xff] }
 0x13d   : > { %v806_v49 = vpop.f32.mrf.mxu0 }
 0x13e   : > { %v935_v32 = vmax.f32 %v805_v25, 0.0  ;;  %v770_v49 = vadd.f32 %v5024_v2, %v5006_v34 }
 0x13f   : > { %v809_v51 = vpop.f32.mrf.mxu0 }
 0x140   : > { %v810_v22 = vadd.f32 %v5024_v2, %v809_v51 }
 0x141   : > { %v811_v52 = vpop.f32.mrf.mxu0 }
 0x142   : > { %v936_v29 = vmax.f32 %v810_v22, 0.0 }
 0x143   : > { %v814_v53 = vpop.f32.mrf.mxu0 }
 0x144   : > { %v815_v19 = vadd.f32 %v5024_v2, %v814_v53  ;;  %v928_v53 = vmax.f32 %v770_v49, 0.0  ;;  %v968_v49 = vld [vmem:[%s8616_s26 + $0x40] sm:$0xff] }
 0x145   : > { %v816_v54 = vpop.f32.mrf.mxu0 }
 0x146   : > { %v937_v26 = vmax.f32 %v815_v19, 0.0 }
 0x147   : > { %v819_v55 = vpop.f32.mrf.mxu0 }
 0x148   : > { %v820_v16 = vadd.f32 %v5024_v2, %v819_v55 }
 0x149   : > { %v821_v56 = vpop.f32.mrf.mxu0 }
 0x14a   : > { %v938_v23 = vmax.f32 %v820_v16, 0.0 }
 0x14b   : > { %v824_v57 = vpop.f32.mrf.mxu0 }
 0x14c   : > { %v825_v13 = vadd.f32 %v5024_v2, %v824_v57 }
 0x14d   : > { %v826_v58 = vpop.f32.mrf.mxu0 }
 0x14e   : > { %v939_v20 = vmax.f32 %v825_v13, 0.0 }
 0x14f   : > { %v829_v59 = vpop.f32.mrf.mxu0 }
 0x150   : > { %v830_v10 = vadd.f32 %v5024_v2, %v829_v59 }
 0x151   : > { %v831_v60 = vpop.f32.mrf.mxu0 }
 0x152   : > { %v940_v17 = vmax.f32 %v830_v10, 0.0 }
 0x153   : > { %v834_v61 = vpop.f32.mrf.mxu0 }
 0x154   : > { %v835_v7 = vadd.f32 %v5024_v2, %v834_v61 }
 0x155   : > { %v836_v62 = vpop.f32.mrf.mxu0 }
 0x156   : > { %v941_v14 = vmax.f32 %v835_v7, 0.0 }
 0x157   : > { %v839_v63 = vpop.f32.mrf.mxu0 }
 0x158   : > { %v840_v4 = vadd.f32 %v5024_v2, %v839_v63 }
 0x159   : > { %v841_v0 = vpop.f32.mrf.mxu0 }
 0x15a   : > { %v942_v11 = vmax.f32 %v840_v4, 0.0 }
 0x15b   : > { %v844_v3 = vpop.f32.mrf.mxu0 }
 0x15c   : > { %v845_v5 = vadd.f32 %v5024_v2, %v844_v3 }
 0x15d   : > { %v846_v6 = vpop.f32.mrf.mxu0 }
 0x15e   : > { %v943_v8 = vmax.f32 %v845_v5, 0.0 }
 0x15f   : > { %v5029_v9 = vpop.f32.mrf.mxu0 }
 0x160   : > { %1105 = vmatpush1.msra.mxu1 %v943_v8 }
 0x161   : > { %v851_v12 = vpop.f32.mrf.mxu0  ;;  %1106 = vmatprep.subr.mxu1 %v4655_v1 }
 0x162   : > { %1107 = vmatpush1.msra.mxu1 %v942_v11 }
 0x163   : > { %v5034_v15 = vpop.f32.mrf.mxu0  ;;  %1108 = vmatprep.subr.mxu1 %v4655_v1 }
 0x164   : > { %1109 = vmatpush1.msra.mxu1 %v941_v14 }
 0x165   : > { %v856_v18 = vpop.f32.mrf.mxu0  ;;  %1110 = vmatprep.subr.mxu1 %v4655_v1 }
 0x166   : > { %1111 = vmatpush1.msra.mxu1 %v940_v17 }
 0x167   : > { %v5040_v21 = vpop.f32.mrf.mxu0  ;;  %1112 = vmatprep.subr.mxu1 %v4655_v1 }
 0x168   : > { %1113 = vmatpush1.msra.mxu1 %v939_v20 }
 0x169   : > { %v861_v24 = vpop.f32.mrf.mxu0  ;;  %1114 = vmatprep.subr.mxu1 %v4655_v1 }
 0x16a   : > { %1115 = vmatpush1.msra.mxu1 %v938_v23 }
 0x16b   : > { %v5046_v27 = vpop.f32.mrf.mxu0  ;;  %1116 = vmatprep.subr.mxu1 %v4655_v1 }
 0x16c   : > { %1117 = vmatpush1.msra.mxu1 %v937_v26  ;;  %v865_v35 = vadd.f32 %v5024_v2, %v5046_v27  ;;  %v850_v27 = vadd.f32 %v5024_v2, %v5029_v9  ;;  %v962_v9 = vld [vmem:[%s8616_s26 + $0x10] sm:$0xff] }
 0x16d   : > { %v866_v30 = vpop.f32.mrf.mxu0  ;;  %1118 = vmatprep.subr.mxu1 %v4655_v1 }
 0x16e   : > { %1119 = vmatpush1.msra.mxu1 %v936_v29 }
 0x16f   : > { %v5053_v33 = vpop.f32.mrf.mxu0  ;;  %1120 = vmatprep.subr.mxu1 %v4655_v1 }
 0x170   : > { %1121 = vmatpush1.msra.mxu1 %v935_v32  ;;  %v870_v31 = vadd.f32 %v5024_v2, %v5053_v33  ;;  %v855_v33 = vadd.f32 %v5024_v2, %v5034_v15  ;;  %v960_v15 = vld [vmem:[%s8616_s26] sm:$0xff] }
 0x171   : > { %v871_v39 = vpop.f32.mrf.mxu0  ;;  %1122 = vmatprep.subr.mxu1 %v4655_v1 }
 0x172   : > { %1123 = vmatpush1.msra.mxu1 %v934_v37  ;;  %v860_v39 = vadd.f32 %v5024_v2, %v5040_v21  ;;  %v948_v41 = vmax.f32 %v870_v31, 0.0  ;;  %v945_v45 = vmax.f32 %v855_v33, 0.0  ;;  %v944_v21 = vmax.f32 %v850_v27, 0.0  ;;  %v1013_v31 = vld [vmem:[%s8616_s26 + $0x1a8] sm:$0xff]  ;;  %v1019_v33 = vld [vmem:[%s8616_s26 + $0x1d8] sm:$0xff] }
 0x173   : > { %v5061_v44 = vpop.f32.mrf.mxu0  ;;  %1124 = vmatprep.subr.mxu1 %v4655_v1  ;;  %v1021_v27 = vld [vmem:[%s8616_s26 + $0x1e8] sm:$0xff] }
 0x174   : > { %1125 = vmatpush1.msra.mxu1 %v933_v43  ;;  %v875_v29 = vadd.f32 %v5024_v2, %v5061_v44  ;;  %v947_v43 = vmax.f32 %v865_v35, 0.0  ;;  %v946_v44 = vmax.f32 %v860_v39, 0.0  ;;  %v1015_v35 = vld [vmem:[%s8616_s26 + $0x1b8] sm:$0xff]  ;;  %v1017_v39 = vld [vmem:[%s8616_s26 + $0x1c8] sm:$0xff] }
 0x175   : > { %v876_v42 = vpop.f32.mrf.mxu0  ;;  %1126 = vmatprep.subr.mxu1 %v4655_v1 }
 0x176   : > { %1127 = vmatpush1.msra.mxu1 %v932_v46  ;;  %v949_v37 = vmax.f32 %v875_v29, 0.0  ;;  %v965_v46 = vld [vmem:[%s8616_s26 + $0x28] sm:$0xff]  ;;  %v964_v42 = vld [vmem:[%s8616_s26 + $0x20] sm:$0xff]  ;;  %v1011_v29 = vld [vmem:[%s8616_s26 + $0x198] sm:$0xff] }
 0x177   : > { %v879_v40 = vpop.f32.mrf.mxu0  ;;  %1128 = vmatprep.subr.mxu1 %v4655_v1 }
 0x178   : > { %1129 = vmatpush1.msra.mxu1 %v931_v48  ;;  %v880_v26 = vadd.f32 %v5024_v2, %v879_v40  ;;  %v966_v48 = vld [vmem:[%s8616_s26 + $0x30] sm:$0xff]  ;;  %v969_v40 = vld [vmem:[%s8616_s26 + $0x48] sm:$0xff] }
 0x179   : > { %v881_v51 = vpop.f32.mrf.mxu0  ;;  %1130 = vmatprep.subr.mxu1 %v4655_v1 }
 0x17a   : > { %1131 = vmatpush1.msra.mxu1 %v930_v50  ;;  %v950_v32 = vmax.f32 %v880_v26, 0.0  ;;  %v971_v50 = vld [vmem:[%s8616_s26 + $0x58] sm:$0xff]  ;;  %v970_v51 = vld [vmem:[%s8616_s26 + $0x50] sm:$0xff]  ;;  %v1009_v26 = vld [vmem:[%s8616_s26 + $0x188] sm:$0xff] }
 0x17b   : > { %v884_v52 = vpop.f32.mrf.mxu0  ;;  %1132 = vmatprep.subr.mxu1 %v4655_v1 }
 0x17c   : > { %1133 = vmatpush1.msra.mxu1 %v929_v38  ;;  %v885_v24 = vadd.f32 %v5024_v2, %v884_v52  ;;  %v973_v38 = vld [vmem:[%s8616_s26 + $0x68] sm:$0xff]  ;;  %v972_v52 = vld [vmem:[%s8616_s26 + $0x60] sm:$0xff] }
 0x17d   : > { %v886_v36 = vpop.f32.mrf.mxu0  ;;  %1134 = vmatprep.subr.mxu1 %v4655_v1 }
 0x17e   : > { %1135 = vmatpush1.msra.mxu1 %v928_v53  ;;  %v951_v30 = vmax.f32 %v885_v24, 0.0  ;;  %v975_v53 = vld [vmem:[%s8616_s26 + $0x78] sm:$0xff]  ;;  %v974_v36 = vld [vmem:[%s8616_s26 + $0x70] sm:$0xff] }
 0x17f   : > { %v889_v54 = vpop.f32.mrf.mxu0  ;;  %1136 = vmatprep.subr.mxu1 %v4655_v1  ;;  %v1007_v24 = vld [vmem:[%s8616_s26 + $0x178] sm:$0xff] }
 0x180   : > { %v890_v22 = vadd.f32 %v5024_v2, %v889_v54  ;;  %v977_v54 = vld [vmem:[%s8616_s26 + $0x88] sm:$0xff] }
 0x181   : > { %v891_v34 = vpop.f32.mrf.mxu0 }
 0x182   : > { %v952_v28 = vmax.f32 %v890_v22, 0.0  ;;  %v976_v34 = vld [vmem:[%s8616_s26 + $0x80] sm:$0xff]  ;;  %v1005_v22 = vld [vmem:[%s8616_s26 + $0x168] sm:$0xff] }
 0x183   : > { %v894_v55 = vpop.f32.mrf.mxu0 }
 0x184   : > { %v895_v19 = vadd.f32 %v5024_v2, %v894_v55  ;;  %v979_v55 = vld [vmem:[%s8616_s26 + $0x98] sm:$0xff] }
 0x185   : > { %v896_v56 = vpop.f32.mrf.mxu0 }
 0x186   : > { %v953_v25 = vmax.f32 %v895_v19, 0.0  ;;  %v978_v56 = vld [vmem:[%s8616_s26 + $0x90] sm:$0xff]  ;;  %v1003_v19 = vld [vmem:[%s8616_s26 + $0x158] sm:$0xff] }
 0x187   : > { %v899_v57 = vpop.f32.mrf.mxu0 }
 0x188   : > { %v900_v17 = vadd.f32 %v5024_v2, %v899_v57  ;;  %v981_v57 = vld [vmem:[%s8616_s26 + $0xa8] sm:$0xff] }
 0x189   : > { %v901_v58 = vpop.f32.mrf.mxu0 }
 0x18a   : > { %v954_v23 = vmax.f32 %v900_v17, 0.0  ;;  %v980_v58 = vld [vmem:[%s8616_s26 + $0xa0] sm:$0xff]  ;;  %v1001_v17 = vld [vmem:[%s8616_s26 + $0x148] sm:$0xff] }
 0x18b   : > { %v904_v59 = vpop.f32.mrf.mxu0 }
 0x18c   : > { %v905_v14 = vadd.f32 %v5024_v2, %v904_v59  ;;  %v983_v59 = vld [vmem:[%s8616_s26 + $0xb8] sm:$0xff] }
 0x18d   : > { %v906_v60 = vpop.f32.mrf.mxu0 }
 0x18e   : > { %v955_v20 = vmax.f32 %v905_v14, 0.0  ;;  %v982_v60 = vld [vmem:[%s8616_s26 + $0xb0] sm:$0xff]  ;;  %v999_v14 = vld [vmem:[%s8616_s26 + $0x138] sm:$0xff] }
 0x18f   : > { %v909_v61 = vpop.f32.mrf.mxu0 }
 0x190   : > { %v910_v12 = vadd.f32 %v5024_v2, %v909_v61  ;;  %v985_v61 = vld [vmem:[%s8616_s26 + $0xc8] sm:$0xff] }
 0x191   : > { %v911_v62 = vpop.f32.mrf.mxu0 }
 0x192   : > { %v956_v18 = vmax.f32 %v910_v12, 0.0  ;;  %v984_v62 = vld [vmem:[%s8616_s26 + $0xc0] sm:$0xff]  ;;  %v997_v12 = vld [vmem:[%s8616_s26 + $0x128] sm:$0xff] }
 0x193   : > { %v914_v63 = vpop.f32.mrf.mxu0 }
 0x194   : > { %v915_v10 = vadd.f32 %v5024_v2, %v914_v63  ;;  %v987_v63 = vld [vmem:[%s8616_s26 + $0xd8] sm:$0xff] }
 0x195   : > { %v916_v0 = vpop.f32.mrf.mxu0 }
 0x196   : > { %v957_v16 = vmax.f32 %v915_v10, 0.0  ;;  %v986_v0 = vld [vmem:[%s8616_s26 + $0xd0] sm:$0xff]  ;;  %v995_v10 = vld [vmem:[%s8616_s26 + $0x118] sm:$0xff] }
 0x197   : > { %v919_v3 = vpop.f32.mrf.mxu0 }
 0x198   : > { %v920_v6 = vadd.f32 %v5024_v2, %v919_v3  ;;  %v989_v3 = vld [vmem:[%s8616_s26 + $0xe8] sm:$0xff] }
 0x199   : > { %v921_v4 = vpop.f32.mrf.mxu0 }
 0x19a   : > { %v958_v13 = vmax.f32 %v920_v6, 0.0  ;;  %v988_v4 = vld [vmem:[%s8616_s26 + $0xe0] sm:$0xff]  ;;  %v990_v6 = vld [vmem:[%s8616_s26 + $0xf0] sm:$0xff] }
 0x19b   : > { %v924_v5 = vpop.f32.mrf.mxu0 }
 0x19c   : > { %v925_v7 = vadd.f32 %v5024_v2, %v924_v5  ;;  %v963_v2 = vld [vmem:[%s8616_s26 + $0x18] sm:$0xff] }
 0x19d   : > { %v926_v8 = vpop.f32.mrf.mxu0  ;;  %v991_v5 = vld [vmem:[%s8616_s26 + $0xf8] sm:$0xff] }
 0x19e   : > { %v959_v11 = vmax.f32 %v925_v7, 0.0  ;;  %v993_v7 = vld [vmem:[%s8616_s26 + $0x108] sm:$0xff]  ;;  %v992_v8 = vld [vmem:[%s8616_s26 + $0x100] sm:$0xff] }
 0x1a0   : > { %1137 = vmatpush2.msra.mxu1 %v959_v11  ;;  %v994_v11 = vld [vmem:[%s8616_s26 + $0x110] sm:$0xff] }
 0x1a1   : > { %1138 = vmatprep.subr.mxu1 %v4655_v1 }
 0x1a2   : > { %1139 = vmatpush2.msra.mxu1 %v958_v13  ;;  %v996_v13 = vld [vmem:[%s8616_s26 + $0x120] sm:$0xff] }
 0x1a3   : > { %1140 = vmatprep.subr.mxu1 %v4655_v1 }
 0x1a4   : > { %1141 = vmatpush2.msra.mxu1 %v957_v16  ;;  %v998_v16 = vld [vmem:[%s8616_s26 + $0x130] sm:$0xff] }
 0x1a5   : > { %1142 = vmatprep.subr.mxu1 %v4655_v1 }
 0x1a6   : > { %1143 = vmatpush2.msra.mxu1 %v956_v18  ;;  %v1000_v18 = vld [vmem:[%s8616_s26 + $0x140] sm:$0xff] }
 0x1a7   : > { %1144 = vmatprep.subr.mxu1 %v4655_v1 }
 0x1a8   : > { %1145 = vmatpush2.msra.mxu1 %v955_v20  ;;  %v1002_v20 = vld [vmem:[%s8616_s26 + $0x150] sm:$0xff] }
 0x1a9   : > { %1146 = vmatprep.subr.mxu1 %v4655_v1 }
 0x1aa   : > { %1147 = vmatpush2.msra.mxu1 %v954_v23  ;;  %v1004_v23 = vld [vmem:[%s8616_s26 + $0x160] sm:$0xff] }
 0x1ab   : > { %1148 = vmatprep.subr.mxu1 %v4655_v1 }
 0x1ac   : > { %1149 = vmatpush2.msra.mxu1 %v953_v25  ;;  %v1006_v25 = vld [vmem:[%s8616_s26 + $0x170] sm:$0xff] }
 0x1ad   : > { %1150 = vmatprep.subr.mxu1 %v4655_v1 }
 0x1ae   : > { %1151 = vmatpush2.msra.mxu1 %v952_v28  ;;  %v1008_v28 = vld [vmem:[%s8616_s26 + $0x180] sm:$0xff] }
 0x1af   : > { %1152 = vmatprep.subr.mxu1 %v4655_v1 }
 0x1b0   : > { %1153 = vmatpush2.msra.mxu1 %v951_v30  ;;  %v1010_v30 = vld [vmem:[%s8616_s26 + $0x190] sm:$0xff] }
 0x1b1   : > { %1154 = vmatprep.subr.mxu1 %v4655_v1 }
 0x1b2   : > { %1155 = vmatpush2.msra.mxu1 %v950_v32  ;;  %v1012_v32 = vld [vmem:[%s8616_s26 + $0x1a0] sm:$0xff] }
 0x1b3   : > { %1156 = vmatprep.subr.mxu1 %v4655_v1 }
 0x1b4   : > { %1157 = vmatpush2.msra.mxu1 %v949_v37  ;;  %v1014_v37 = vld [vmem:[%s8616_s26 + $0x1b0] sm:$0xff] }
 0x1b5   : > { %1158 = vmatprep.subr.mxu1 %v4655_v1 }
 0x1b6   : > { %1159 = vmatpush2.msra.mxu1 %v948_v41  ;;  %v1016_v41 = vld [vmem:[%s8616_s26 + $0x1c0] sm:$0xff] }
 0x1b7   : > { %1160 = vmatprep.subr.mxu1 %v4655_v1 }
 0x1b8   : > { %1161 = vmatpush2.msra.mxu1 %v947_v43  ;;  %v1018_v43 = vld [vmem:[%s8616_s26 + $0x1d0] sm:$0xff] }
 0x1b9   : > { %1162 = vmatprep.subr.mxu1 %v4655_v1 }
 0x1ba   : > { %1163 = vmatpush2.msra.mxu1 %v946_v44  ;;  %v1020_v44 = vld [vmem:[%s8616_s26 + $0x1e0] sm:$0xff] }
 0x1bb   : > { %1164 = vmatprep.subr.mxu1 %v4655_v1 }
 0x1bc   : > { %1165 = vmatpush2.msra.mxu1 %v945_v45  ;;  %v1023_v45 = vld [vmem:[%s8616_s26 + $0x1f8] sm:$0xff] }
 0x1bd   : > { %1166 = vmatprep.subr.mxu1 %v4655_v1 }
 0x1be   : > { %1167 = vmatpush2.msra.mxu1 %v944_v21  ;;  %v1022_v21 = vld [vmem:[%s8616_s26 + $0x1f0] sm:$0xff] }
 0x1bf   : > { %1169 = vmatmul.mubr.f32.vlgmr.msra.gmra.mxu1 %v960_v15  ;;  %v1025_v15 = vld [vmem:[%s8616_s26 + $0x208] sm:$0xff] }
 0x1c0   : > { %1173 = vmatprep.mubr.f32.mxu1 %v963_v2  ;;  %v1024_v2 = vld [vmem:[%s8616_s26 + $0x200] sm:$0xff] }
 0x1c3   : > { %1174 = vmatmul.mubr.f32.gmra.mxu1 %v962_v9  ;;  %v1027_v9 = vld [vmem:[%s8616_s26 + $0x218] sm:$0xff] }
 0x1c4   : > { %1178 = vmatprep.mubr.f32.mxu1 %v965_v46  ;;  %v1026_v46 = vld [vmem:[%s8616_s26 + $0x210] sm:$0xff] }
 0x1c7   : > { %1179 = vmatmul.mubr.f32.gmra.mxu1 %v964_v42  ;;  %v1029_v42 = vld [vmem:[%s8616_s26 + $0x228] sm:$0xff] }
 0x1c8   : > { %1183 = vmatprep.mubr.f32.mxu1 %v967_v47  ;;  %v1028_v47 = vld [vmem:[%s8616_s26 + $0x220] sm:$0xff] }
 0x1cb   : > { %1184 = vmatmul.mubr.f32.gmra.mxu1 %v966_v48  ;;  %v1031_v48 = vld [vmem:[%s8616_s26 + $0x238] sm:$0xff] }
 0x1cc   : > { %1188 = vmatprep.mubr.f32.mxu1 %v969_v40  ;;  %v1030_v40 = vld [vmem:[%s8616_s26 + $0x230] sm:$0xff] }
 0x1cf   : > { %1189 = vmatmul.mubr.f32.gmra.mxu1 %v968_v49  ;;  %v1033_v49 = vld [vmem:[%s8616_s26 + $0x248] sm:$0xff] }
 0x1d0   : > { %1193 = vmatprep.mubr.f32.mxu1 %v971_v50  ;;  %v1032_v50 = vld [vmem:[%s8616_s26 + $0x240] sm:$0xff] }
 0x1d3   : > { %1194 = vmatmul.mubr.f32.gmra.mxu1 %v970_v51  ;;  %v1035_v51 = vld [vmem:[%s8616_s26 + $0x258] sm:$0xff] }
 0x1d4   : > { %1198 = vmatprep.mubr.f32.mxu1 %v973_v38  ;;  %v1034_v38 = vld [vmem:[%s8616_s26 + $0x250] sm:$0xff] }
 0x1d7   : > { %1199 = vmatmul.mubr.f32.gmra.mxu1 %v972_v52  ;;  %v1037_v52 = vld [vmem:[%s8616_s26 + $0x268] sm:$0xff] }
 0x1d8   : > { %1203 = vmatprep.mubr.f32.mxu1 %v975_v53  ;;  %v1036_v53 = vld [vmem:[%s8616_s26 + $0x260] sm:$0xff] }
 0x1db   : > { %1204 = vmatmul.mubr.f32.gmra.mxu1 %v974_v36  ;;  %v1039_v36 = vld [vmem:[%s8616_s26 + $0x278] sm:$0xff] }
 0x1dc   : > { %1208 = vmatprep.mubr.f32.mxu1 %v977_v54  ;;  %v1038_v54 = vld [vmem:[%s8616_s26 + $0x270] sm:$0xff] }
 0x1df   : > { %1209 = vmatmul.mubr.f32.gmra.mxu1 %v976_v34  ;;  %v1041_v34 = vld [vmem:[%s8616_s26 + $0x288] sm:$0xff] }
 0x1e0   : > { %1213 = vmatprep.mubr.f32.mxu1 %v979_v55  ;;  %v1040_v55 = vld [vmem:[%s8616_s26 + $0x280] sm:$0xff] }
 0x1e3   : > { %1214 = vmatmul.mubr.f32.gmra.mxu1 %v978_v56  ;;  %v1043_v56 = vld [vmem:[%s8616_s26 + $0x298] sm:$0xff] }
 0x1e4   : > { %1218 = vmatprep.mubr.f32.mxu1 %v981_v57  ;;  %v1042_v57 = vld [vmem:[%s8616_s26 + $0x290] sm:$0xff] }
 0x1e7   : > { %1219 = vmatmul.mubr.f32.gmra.mxu1 %v980_v58  ;;  %v1045_v58 = vld [vmem:[%s8616_s26 + $0x2a8] sm:$0xff] }
 0x1e8   : > { %1223 = vmatprep.mubr.f32.mxu1 %v983_v59  ;;  %v1044_v59 = vld [vmem:[%s8616_s26 + $0x2a0] sm:$0xff] }
 0x1eb   : > { %1224 = vmatmul.mubr.f32.gmra.mxu1 %v982_v60  ;;  %v1047_v60 = vld [vmem:[%s8616_s26 + $0x2b8] sm:$0xff] }
 0x1ec   : > { %1228 = vmatprep.mubr.f32.mxu1 %v985_v61  ;;  %v1046_v61 = vld [vmem:[%s8616_s26 + $0x2b0] sm:$0xff] }
 0x1ef   : > { %1229 = vmatmul.mubr.f32.gmra.mxu1 %v984_v62  ;;  %v1049_v62 = vld [vmem:[%s8616_s26 + $0x2c8] sm:$0xff] }
 0x1f0   : > { %1233 = vmatprep.mubr.f32.mxu1 %v987_v63  ;;  %v1048_v63 = vld [vmem:[%s8616_s26 + $0x2c0] sm:$0xff] }
 0x1f3   : > { %1234 = vmatmul.mubr.f32.gmra.mxu1 %v986_v0  ;;  %v1051_v0 = vld [vmem:[%s8616_s26 + $0x2d8] sm:$0xff] }
 0x1f4   : > { %1238 = vmatprep.mubr.f32.mxu1 %v989_v3  ;;  %v1050_v3 = vld [vmem:[%s8616_s26 + $0x2d0] sm:$0xff] }
 0x1f7   : > { %1239 = vmatmul.mubr.f32.gmra.mxu1 %v988_v4  ;;  %v1053_v4 = vld [vmem:[%s8616_s26 + $0x2e8] sm:$0xff] }
 0x1f8   : > { %1243 = vmatprep.mubr.f32.mxu1 %v991_v5  ;;  %v1052_v5 = vld [vmem:[%s8616_s26 + $0x2e0] sm:$0xff] }
 0x1fb   : > { %1244 = vmatmul.mubr.f32.gmra.mxu1 %v990_v6  ;;  %v1055_v6 = vld [vmem:[%s8616_s26 + $0x2f8] sm:$0xff] }
 0x1fc   : > { %1248 = vmatprep.mubr.f32.mxu1 %v993_v7  ;;  %v1054_v7 = vld [vmem:[%s8616_s26 + $0x2f0] sm:$0xff] }
 0x1ff   : > { %1249 = vmatmul.mubr.f32.gmra.mxu1 %v992_v8  ;;  %v1057_v8 = vld [vmem:[%s8616_s26 + $0x308] sm:$0xff] }
 0x200   : > { %1253 = vmatprep.mubr.f32.mxu1 %v995_v10  ;;  %v1056_v10 = vld [vmem:[%s8616_s26 + $0x300] sm:$0xff] }
 0x203   : > { %1254 = vmatmul.mubr.f32.gmra.mxu1 %v994_v11  ;;  %v1059_v11 = vld [vmem:[%s8616_s26 + $0x318] sm:$0xff] }
 0x204   : > { %1258 = vmatprep.mubr.f32.mxu1 %v997_v12 }
 0x207   : > { %1259 = vmatmul.mubr.f32.gmra.mxu1 %v996_v13  ;;  %v1058_v13 = vld [vmem:[%s8616_s26 + $0x310] sm:$0xff] }
 0x208   : > { %1263 = vmatprep.mubr.f32.mxu1 %v999_v14 }
 0x20b   : > { %1264 = vmatmul.mubr.f32.gmra.mxu1 %v998_v16  ;;  %v1061_v16 = vld [vmem:[%s8616_s26 + $0x328] sm:$0xff] }
 0x20c   : > { %1268 = vmatprep.mubr.f32.mxu1 %v1001_v17 }
 0x20f   : > { %1269 = vmatmul.mubr.f32.gmra.mxu1 %v1000_v18  ;;  %v1060_v18 = vld [vmem:[%s8616_s26 + $0x320] sm:$0xff] }
 0x210   : > { %1273 = vmatprep.mubr.f32.mxu1 %v1003_v19 }
 0x213   : > { %1274 = vmatmul.mubr.f32.gmra.mxu1 %v1002_v20  ;;  %v1063_v20 = vld [vmem:[%s8616_s26 + $0x338] sm:$0xff] }
 0x214   : > { %1278 = vmatprep.mubr.f32.mxu1 %v1005_v22 }
 0x217   : > { %1279 = vmatmul.mubr.f32.gmra.mxu1 %v1004_v23  ;;  %v1062_v23 = vld [vmem:[%s8616_s26 + $0x330] sm:$0xff] }
 0x218   : > { %1283 = vmatprep.mubr.f32.mxu1 %v1007_v24 }
 0x21b   : > { %1284 = vmatmul.mubr.f32.gmra.mxu1 %v1006_v25  ;;  %v1065_v25 = vld [vmem:[%s8616_s26 + $0x348] sm:$0xff] }
 0x21c   : > { %1288 = vmatprep.mubr.f32.mxu1 %v1009_v26 }
 0x21f   : > { %1289 = vmatmul.mubr.f32.gmra.mxu1 %v1008_v28  ;;  %v1064_v28 = vld [vmem:[%s8616_s26 + $0x340] sm:$0xff] }
 0x220   : > { %1293 = vmatprep.mubr.f32.mxu1 %v1011_v29 }
 0x223   : > { %1294 = vmatmul.mubr.f32.gmra.mxu1 %v1010_v30  ;;  %v1067_v30 = vld [vmem:[%s8616_s26 + $0x358] sm:$0xff] }
 0x224   : > { %1298 = vmatprep.mubr.f32.mxu1 %v1013_v31 }
 0x227   : > { %1299 = vmatmul.mubr.f32.gmra.mxu1 %v1012_v32  ;;  %v1066_v32 = vld [vmem:[%s8616_s26 + $0x350] sm:$0xff] }
 0x228   : > { %1303 = vmatprep.mubr.f32.mxu1 %v1015_v35 }
 0x22b   : > { %1304 = vmatmul.mubr.f32.gmra.mxu1 %v1014_v37  ;;  %v1069_v37 = vld [vmem:[%s8616_s26 + $0x368] sm:$0xff] }
 0x22c   : > { %1308 = vmatprep.mubr.f32.mxu1 %v1017_v39 }
 0x22f   : > { %1309 = vmatmul.mubr.f32.gmra.mxu1 %v1016_v41  ;;  %v1068_v41 = vld [vmem:[%s8616_s26 + $0x360] sm:$0xff] }
 0x230   : > { %1313 = vmatprep.mubr.f32.mxu1 %v1019_v33 }
 0x233   : > { %1314 = vmatmul.mubr.f32.gmra.mxu1 %v1018_v43  ;;  %v1071_v43 = vld [vmem:[%s8616_s26 + $0x378] sm:$0xff] }
 0x234   : > { %1318 = vmatprep.mubr.f32.mxu1 %v1021_v27 }
 0x237   : > { %1319 = vmatmul.mubr.f32.gmra.mxu1 %v1020_v44  ;;  %v1070_v44 = vld [vmem:[%s8616_s26 + $0x370] sm:$0xff] }
 0x238   : > { %1323 = vmatprep.mubr.f32.mxu1 %v1023_v45 }
 0x23b   : > { %1324 = vmatmul.mubr.f32.gmra.mxu1 %v1022_v21  ;;  %v1073_v21 = vld [vmem:[%s8616_s26 + $0x388] sm:$0xff] }
 0x23c   : > { %1328 = vmatprep.mubr.f32.mxu1 %v1025_v15 }
 0x23f   : > { %1329 = vmatmul.mubr.f32.gmra.mxu1 %v1024_v2  ;;  %v1072_v2 = vld [vmem:[%s8616_s26 + $0x380] sm:$0xff] }
 0x240   : > { %1333 = vmatprep.mubr.f32.mxu1 %v1027_v9 }
 0x243   : > { %1334 = vmatmul.mubr.f32.gmra.mxu1 %v1026_v46  ;;  %v1075_v46 = vld [vmem:[%s8616_s26 + $0x398] sm:$0xff] }
 0x244   : > { %1338 = vmatprep.mubr.f32.mxu1 %v1029_v42 }
 0x247   : > { %1339 = vmatmul.mubr.f32.gmra.mxu1 %v1028_v47 }
 0x248   : > { %1343 = vmatprep.mubr.f32.mxu1 %v1031_v48  ;;  %v1074_v48 = vld [vmem:[%s8616_s26 + $0x390] sm:$0xff] }
 0x24b   : > { %1344 = vmatmul.mubr.f32.gmra.mxu1 %v1030_v40 }
 0x24c   : > { %1348 = vmatprep.mubr.f32.mxu1 %v1033_v49  ;;  %v1077_v49 = vld [vmem:[%s8616_s26 + $0x3a8] sm:$0xff] }
 0x24f   : > { %1349 = vmatmul.mubr.f32.gmra.mxu1 %v1032_v50 }
 0x250   : > { %1353 = vmatprep.mubr.f32.mxu1 %v1035_v51 }
 0x253   : > { %1354 = vmatmul.mubr.f32.gmra.mxu1 %v1034_v38  ;;  %v1076_v38 = vld [vmem:[%s8616_s26 + $0x3a0] sm:$0xff] }
 0x254   : > { %1358 = vmatprep.mubr.f32.mxu1 %v1037_v52 }
 0x257   : > { %1359 = vmatmul.mubr.f32.gmra.mxu1 %v1036_v53  ;;  %v1079_v53 = vld [vmem:[%s8616_s26 + $0x3b8] sm:$0xff] }
 0x258   : > { %1363 = vmatprep.mubr.f32.mxu1 %v1039_v36 }
 0x25b   : > { %1364 = vmatmul.mubr.f32.gmra.mxu1 %v1038_v54 }
 0x25c   : > { %1368 = vmatprep.mubr.f32.mxu1 %v1041_v34  ;;  %v1078_v34 = vld [vmem:[%s8616_s26 + $0x3b0] sm:$0xff] }
 0x25f   : > { %1369 = vmatmul.mubr.f32.gmra.mxu1 %v1040_v55 }
 0x260   : > { %1373 = vmatprep.mubr.f32.mxu1 %v1043_v56  ;;  %v1081_v56 = vld [vmem:[%s8616_s26 + $0x3c8] sm:$0xff] }
 0x263   : > { %1374 = vmatmul.mubr.f32.gmra.mxu1 %v1042_v57 }
 0x264   : > { %1378 = vmatprep.mubr.f32.mxu1 %v1045_v58 }
 0x267   : > { %1379 = vmatmul.mubr.f32.gmra.mxu1 %v1044_v59  ;;  %v1080_v59 = vld [vmem:[%s8616_s26 + $0x3c0] sm:$0xff] }
 0x268   : > { %1383 = vmatprep.mubr.f32.mxu1 %v1047_v60 }
 0x26b   : > { %1384 = vmatmul.mubr.f32.gmra.mxu1 %v1046_v61  ;;  %v1083_v61 = vld [vmem:[%s8616_s26 + $0x3d8] sm:$0xff] }
 0x26c   : > { %1388 = vmatprep.mubr.f32.mxu1 %v1049_v62 }
 0x26f   : > { %1389 = vmatmul.mubr.f32.gmra.mxu1 %v1048_v63 }
 0x270   : > { %1393 = vmatprep.mubr.f32.mxu1 %v1051_v0  ;;  %v1082_v0 = vld [vmem:[%s8616_s26 + $0x3d0] sm:$0xff] }
 0x273   : > { %1394 = vmatmul.mubr.f32.gmra.mxu1 %v1050_v3 }
 0x274   : > { %1398 = vmatprep.mubr.f32.mxu1 %v1053_v4  ;;  %v1085_v4 = vld [vmem:[%s8616_s26 + $0x3e8] sm:$0xff] }
 0x277   : > { %1399 = vmatmul.mubr.f32.gmra.mxu1 %v1052_v5 }
 0x278   : > { %1403 = vmatprep.mubr.f32.mxu1 %v1055_v6 }
 0x27b   : > { %1404 = vmatmul.mubr.f32.gmra.mxu1 %v1054_v7  ;;  %v1084_v7 = vld [vmem:[%s8616_s26 + $0x3e0] sm:$0xff] }
 0x27c   : > { %1408 = vmatprep.mubr.f32.mxu1 %v1057_v8 }
 0x27f   : > { %v5407_v12 = vpop.f32.mrf.mxu1  ;;  %1409 = vmatmul.mubr.f32.gmra.mxu1 %v1056_v10  ;;  %v1087_v10 = vld [vmem:[%s8616_s26 + $0x3f8] sm:$0xff] }
 0x280   : > { %1413 = vmatprep.mubr.f32.mxu1 %v1059_v11 }
 0x281   : > { %v1172_v14 = vpop.f32.mrf.mxu1 }
 0x283   : > { %v5415_v17 = vpop.f32.mrf.mxu1  ;;  %1414 = vmatmul.mubr.f32.gmra.mxu1 %v1058_v13  ;;  %v1086_v13 = vld [vmem:[%s8616_s26 + $0x3f0] sm:$0xff] }
 0x284   : > { %1418 = vmatprep.mubr.f32.mxu1 %v1061_v16  ;;  %v1089_v16 = vld [vmem:[%s8616_s26 + $0x408] sm:$0xff] }
 0x285   : > { %v1177_v19 = vpop.f32.mrf.mxu1 }
 0x286   : > { %v1088_v19 = vld [vmem:[%s8616_s26 + $0x400] sm:$0xff] }
 0x287   : > { %v5423_v22 = vpop.f32.mrf.mxu1  ;;  %1419 = vmatmul.mubr.f32.gmra.mxu1 %v1060_v18 }
 0x288   : > { %1423 = vmatprep.mubr.f32.mxu1 %v1063_v20 }
 0x289   : > { %v1182_v24 = vpop.f32.mrf.mxu1 }
 0x28b   : > { %v5431_v26 = vpop.f32.mrf.mxu1  ;;  %1424 = vmatmul.mubr.f32.gmra.mxu1 %v1062_v23 }
 0x28c   : > { %1428 = vmatprep.mubr.f32.mxu1 %v1065_v25  ;;  %v1090_v25 = vld [vmem:[%s8616_s26 + $0x410] sm:$0xff] }
 0x28d   : > { %v1187_v29 = vpop.f32.mrf.mxu1 }
 0x28f   : > { %v5439_v31 = vpop.f32.mrf.mxu1  ;;  %1429 = vmatmul.mubr.f32.gmra.mxu1 %v1064_v28  ;;  %v1093_v28 = vld [vmem:[%s8616_s26 + $0x428] sm:$0xff] }
 0x290   : > { %1433 = vmatprep.mubr.f32.mxu1 %v1067_v30 }
 0x291   : > { %v1192_v35 = vpop.f32.mrf.mxu1 }
 0x292   : > { %v1095_v35 = vld [vmem:[%s8616_s26 + $0x438] sm:$0xff] }
 0x293   : > { %v5447_v39 = vpop.f32.mrf.mxu1  ;;  %1434 = vmatmul.mubr.f32.gmra.mxu1 %v1066_v32 }
 0x294   : > { %1438 = vmatprep.mubr.f32.mxu1 %v1069_v37 }
 0x295   : > { %v1197_v33 = vpop.f32.mrf.mxu1 }
 0x297   : > { %v5455_v27 = vpop.f32.mrf.mxu1  ;;  %1439 = vmatmul.mubr.f32.gmra.mxu1 %v1068_v41  ;;  %v1094_v41 = vld [vmem:[%s8616_s26 + $0x430] sm:$0xff] }
 0x298   : > { %1443 = vmatprep.mubr.f32.mxu1 %v1071_v43  ;;  %v1097_v43 = vld [vmem:[%s8616_s26 + $0x448] sm:$0xff] }
 0x299   : > { %v1202_v45 = vpop.f32.mrf.mxu1 }
 0x29a   : > { %v1096_v45 = vld [vmem:[%s8616_s26 + $0x440] sm:$0xff] }
 0x29b   : > { %v5463_v15 = vpop.f32.mrf.mxu1  ;;  %1444 = vmatmul.mubr.f32.gmra.mxu1 %v1070_v44 }
 0x29c   : > { %1448 = vmatprep.mubr.f32.mxu1 %v1073_v21 }
 0x29d   : > { %v1207_v9 = vpop.f32.mrf.mxu1 }
 0x29f   : > { %v1210_v42 = vpop.f32.mrf.mxu1  ;;  %1449 = vmatmul.mubr.f32.gmra.mxu1 %v1072_v2 }
 0x2a0   : > { %v1529_v47 = vmax.f32 %v5407_v12, %v1210_v42  ;;  %1453 = vmatprep.mubr.f32.mxu1 %v1075_v46  ;;  %v1098_v46 = vld [vmem:[%s8616_s26 + $0x450] sm:$0xff] }
 0x2a1   : > { %v1212_v40 = vpop.f32.mrf.mxu1 }
 0x2a3   : > { %v1215_v50 = vpop.f32.mrf.mxu1  ;;  %1454 = vmatmul.mubr.f32.gmra.mxu1 %v1074_v48 }
 0x2a4   : > { %v1530_v51 = vmax.f32 %v5415_v17, %v1215_v50  ;;  %1458 = vmatprep.mubr.f32.mxu1 %v1077_v49  ;;  %v1100_v49 = vld [vmem:[%s8616_s26 + $0x460] sm:$0xff] }
 0x2a5   : > { %v1217_v52 = vpop.f32.mrf.mxu1 }
 0x2a7   : > { %v1220_v36 = vpop.f32.mrf.mxu1  ;;  %1459 = vmatmul.mubr.f32.gmra.mxu1 %v1076_v38 }
 0x2a8   : > { %v1531_v54 = vmax.f32 %v5423_v22, %v1220_v36  ;;  %1463 = vmatprep.mubr.f32.mxu1 %v1079_v53  ;;  %v1091_v22 = vld [vmem:[%s8616_s26 + $0x418] sm:$0xff]  ;;  %v1102_v53 = vld [vmem:[%s8616_s26 + $0x470] sm:$0xff] }
 0x2a9   : > { %v1222_v55 = vpop.f32.mrf.mxu1 }
 0x2ab   : > { %v1225_v57 = vpop.f32.mrf.mxu1  ;;  %1464 = vmatmul.mubr.f32.gmra.mxu1 %v1078_v34 }
 0x2ac   : > { %v1532_v58 = vmax.f32 %v5431_v26, %v1225_v57  ;;  %1468 = vmatprep.mubr.f32.mxu1 %v1081_v56 }
 0x2ad   : > { %v1227_v60 = vpop.f32.mrf.mxu1 }
 0x2af   : > { %v1230_v62 = vpop.f32.mrf.mxu1  ;;  %1469 = vmatmul.mubr.f32.gmra.mxu1 %v1080_v59 }
 0x2b0   : > { %v1533_v63 = vmax.f32 %v5439_v31, %v1230_v62  ;;  %1473 = vmatprep.mubr.f32.mxu1 %v1083_v61  ;;  %v1092_v31 = vld [vmem:[%s8616_s26 + $0x420] sm:$0xff] }
 0x2b1   : > { %v1232_v3 = vpop.f32.mrf.mxu1 }
 0x2b3   : > { %v1235_v5 = vpop.f32.mrf.mxu1  ;;  %1474 = vmatmul.mubr.f32.gmra.mxu1 %v1082_v0 }
 0x2b4   : > { %v1534_v6 = vmax.f32 %v5447_v39, %v1235_v5  ;;  %1478 = vmatprep.mubr.f32.mxu1 %v1085_v4 }
 0x2b5   : > { %v1237_v8 = vpop.f32.mrf.mxu1 }
 0x2b7   : > { %v1240_v11 = vpop.f32.mrf.mxu1  ;;  %1479 = vmatmul.mubr.f32.gmra.mxu1 %v1084_v7 }
 0x2b8   : > { %v1535_v12 = vmax.f32 %v5455_v27, %v1240_v11  ;;  %1483 = vmatprep.mubr.f32.mxu1 %v1087_v10 }
 0x2b9   : > { %v1242_v14 = vpop.f32.mrf.mxu1 }
 0x2bb   : > { %v1245_v17 = vpop.f32.mrf.mxu1  ;;  %1484 = vmatmul.mubr.f32.gmra.mxu1 %v1086_v13 }
 0x2bc   : > { %v1536_v18 = vmax.f32 %v5463_v15, %v1245_v17  ;;  %1488 = vmatprep.mubr.f32.mxu1 %v1089_v16  ;;  %v1099_v15 = vld [vmem:[%s8616_s26 + $0x458] sm:$0xff] }
 0x2bd   : > { %v1247_v20 = vpop.f32.mrf.mxu1 }
 0x2bf   : > { %v1250_v23 = vpop.f32.mrf.mxu1  ;;  %1489 = vmatmul.mubr.f32.gmra.mxu1 %v1088_v19 }
 0x2c0   : > { %v5527_v24 = vmax.f32 %v1529_v47, %v1250_v23  ;;  %1493 = vmatprep.mubr.f32.mxu1 %v1091_v22  ;;  %v1101_v47 = vld [vmem:[%s8616_s26 + $0x468] sm:$0xff] }
 0x2c1   : > { %v1252_v26 = vpop.f32.mrf.mxu1 }
 0x2c3   : > { %v1255_v29 = vpop.f32.mrf.mxu1  ;;  %1494 = vmatmul.mubr.f32.gmra.mxu1 %v1090_v25 }
 0x2c4   : > { %v5535_v30 = vmax.f32 %v1530_v51, %v1255_v29  ;;  %1498 = vmatprep.mubr.f32.mxu1 %v1093_v28  ;;  %v1103_v51 = vld [vmem:[%s8616_s26 + $0x478] sm:$0xff] }
 0x2c5   : > { %v1257_v32 = vpop.f32.mrf.mxu1 }
 0x2c7   : > { %v1260_v37 = vpop.f32.mrf.mxu1  ;;  %1499 = vmatmul.mubr.f32.gmra.mxu1 %v1092_v31 }
 0x2c8   : > { %v5543_v39 = vmax.f32 %v1531_v54, %v1260_v37  ;;  %1503 = vmatprep.mubr.f32.mxu1 %v1095_v35 }
 0x2c9   : > { %v1262_v33 = vpop.f32.mrf.mxu1 }
 0x2cb   : > { %v1265_v27 = vpop.f32.mrf.mxu1  ;;  %1504 = vmatmul.mubr.f32.gmra.mxu1 %v1094_v41 }
 0x2cc   : > { %v5551_v44 = vmax.f32 %v1532_v58, %v1265_v27  ;;  %1508 = vmatprep.mubr.f32.mxu1 %v1097_v43 }
 0x2cd   : > { %v1267_v21 = vpop.f32.mrf.mxu1 }
 0x2cf   : > { %v1270_v2 = vpop.f32.mrf.mxu1  ;;  %1509 = vmatmul.mubr.f32.gmra.mxu1 %v1096_v45 }
 0x2d0   : > { %v1541_v9 = vmax.f32 %v1533_v63, %v1270_v2  ;;  %1513 = vmatprep.mubr.f32.mxu1 %v1099_v15 }
 0x2d1   : > { %v1272_v42 = vpop.f32.mrf.mxu1 }
 0x2d3   : > { %v1275_v48 = vpop.f32.mrf.mxu1  ;;  %1514 = vmatmul.mubr.f32.gmra.mxu1 %v1098_v46 }
 0x2d4   : > { %v1542_v40 = vmax.f32 %v1534_v6, %v1275_v48  ;;  %1518 = vmatprep.mubr.f32.mxu1 %v1101_v47 }
 0x2d5   : > { %v1277_v50 = vpop.f32.mrf.mxu1 }
 0x2d7   : > { %v1280_v38 = vpop.f32.mrf.mxu1  ;;  %1519 = vmatmul.mubr.f32.gmra.mxu1 %v1100_v49 }
 0x2d8   : > { %v1543_v52 = vmax.f32 %v1535_v12, %v1280_v38  ;;  %1523 = vmatprep.mubr.f32.mxu1 %v1103_v51 }
 0x2d9   : > { %v1282_v36 = vpop.f32.mrf.mxu1 }
 0x2da   : > { %v1593_v36 = vld [vmem:[%s8618_s4] sm:$0xff] }
 0x2db   : > { %v1285_v54 = vpop.f32.mrf.mxu1  ;;  %1524 = vmatmul.mubr.f32.gmra.mxu1 %v1102_v53  ;;  %4430 = vmatprep.mubr.msk.f32.mxu0 %vm1611_vm0, %v1593_v36 }
 0x2dc   : > { %v1544_v34 = vmax.f32 %v1536_v18, %v1285_v54 }
 0x2dd   : > { %v1287_v55 = vpop.f32.mrf.mxu1 }
 0x2df   : > { %v1290_v56 = vpop.f32.mrf.mxu1 }
 0x2e0   : > { %v1545_v57 = vmax.f32 %v5527_v24, %v1290_v56 }
 0x2e1   : > { %v1292_v58 = vpop.f32.mrf.mxu1 }
 0x2e3   : > { %v1295_v59 = vpop.f32.mrf.mxu1 }
 0x2e4   : > { %v1546_v60 = vmax.f32 %v5535_v30, %v1295_v59 }
 0x2e5   : > { %v1297_v61 = vpop.f32.mrf.mxu1 }
 0x2e7   : > { %v1300_v62 = vpop.f32.mrf.mxu1 }
 0x2e8   : > { %v1547_v63 = vmax.f32 %v5543_v39, %v1300_v62 }
 0x2e9   : > { %v1302_v0 = vpop.f32.mrf.mxu1 }
 0x2eb   : > { %v1305_v3 = vpop.f32.mrf.mxu1 }
 0x2ec   : > { %v1548_v4 = vmax.f32 %v5551_v44, %v1305_v3 }
 0x2ed   : > { %v1307_v5 = vpop.f32.mrf.mxu1 }
 0x2ef   : > { %v1310_v6 = vpop.f32.mrf.mxu1 }
 0x2f0   : > { %v1549_v7 = vmax.f32 %v1541_v9, %v1310_v6 }
 0x2f1   : > { %v1312_v8 = vpop.f32.mrf.mxu1 }
 0x2f2   : > { %v1979_v8 = vld [vmem:[%s8619_s5 + $0x4f0] sm:$0xff] }
 0x2f3   : > { %v1315_v10 = vpop.f32.mrf.mxu1 }
 0x2f4   : > { %v1550_v11 = vmax.f32 %v1542_v40, %v1315_v10 }
 0x2f5   : > { %v1317_v12 = vpop.f32.mrf.mxu1 }
 0x2f7   : > { %v1320_v13 = vpop.f32.mrf.mxu1 }
 0x2f8   : > { %v1551_v14 = vmax.f32 %v1543_v52, %v1320_v13 }
 0x2f9   : > { %v1322_v16 = vpop.f32.mrf.mxu1 }
 0x2fb   : > { %v1325_v17 = vpop.f32.mrf.mxu1 }
 0x2fc   : > { %v1552_v18 = vmax.f32 %v1544_v34, %v1325_v17  ;;  %v1978_v17 = vld [vmem:[%s8619_s5 + $0x4e8] sm:$0xff] }
 0x2fd   : > { %v1327_v19 = vpop.f32.mrf.mxu1 }
 0x2ff   : > { %v1330_v20 = vpop.f32.mrf.mxu1 }
 0x300   : > { %v1553_v22 = vmax.f32 %v1545_v57, %v1330_v20 }
 0x301   : > { %v1332_v23 = vpop.f32.mrf.mxu1 }
 0x303   : > { %v1335_v24 = vpop.f32.mrf.mxu1 }
 0x304   : > { %v1554_v25 = vmax.f32 %v1546_v60, %v1335_v24 }
 0x305   : > { %v1337_v26 = vpop.f32.mrf.mxu1 }
 0x306   : > { %v1975_v26 = vld [vmem:[%s8619_s5 + $0x4d0] sm:$0xff] }
 0x307   : > { %v1340_v28 = vpop.f32.mrf.mxu1 }
 0x308   : > { %v1555_v29 = vmax.f32 %v1547_v63, %v1340_v28 }
 0x309   : > { %v1342_v30 = vpop.f32.mrf.mxu1 }
 0x30a   : > { %v1974_v30 = vld [vmem:[%s8619_s5 + $0x4c8] sm:$0xff] }
 0x30b   : > { %v1345_v31 = vpop.f32.mrf.mxu1 }
 0x30c   : > { %v1556_v32 = vmax.f32 %v1548_v4, %v1345_v31 }
 0x30d   : > { %v1347_v35 = vpop.f32.mrf.mxu1 }
 0x30f   : > { %v1350_v37 = vpop.f32.mrf.mxu1 }
 0x310   : > { %v1557_v39 = vmax.f32 %v1549_v7, %v1350_v37  ;;  %v1980_v7 = vld [vmem:[%s8619_s5 + $0x4f8] sm:$0xff] }
 0x311   : > { %v1352_v41 = vpop.f32.mrf.mxu1  ;;  %2263 = vmatprep.subr.mxu1 %v1980_v7 }
 0x312   : > { %2264 = vmatpush1.msra.mxu1 %v1979_v8 }
 0x313   : > { %v1355_v33 = vpop.f32.mrf.mxu1  ;;  %2265 = vmatprep.subr.mxu1 %v1978_v17 }
 0x314   : > { %v5578_v43 = vmax.f32 %v1550_v11, %v1355_v33  ;;  %v1971_v33 = vld [vmem:[%s8619_s5 + $0x4b0] sm:$0xff] }
 0x315   : > { %v1357_v27 = vpop.f32.mrf.mxu1 }
 0x317   : > { %v1360_v44 = vpop.f32.mrf.mxu1 }
 0x318   : > { %v5580_v45 = vmax.f32 %v1551_v14, %v1360_v44  ;;  %v1970_v44 = vld [vmem:[%s8619_s5 + $0x4a8] sm:$0xff] }
 0x319   : > { %v1362_v21 = vpop.f32.mrf.mxu1 }
 0x31b   : > { %v1365_v15 = vpop.f32.mrf.mxu1 }
 0x31c   : > { %v5582_v2 = vmax.f32 %v1552_v18, %v1365_v15  ;;  %v1977_v18 = vld [vmem:[%s8619_s5 + $0x4e0] sm:$0xff]  ;;  %v1968_v15 = vld [vmem:[%s8619_s5 + $0x498] sm:$0xff] }
 0x31d   : > { %v1367_v9 = vpop.f32.mrf.mxu1  ;;  %2266 = vmatpush1.msra.mxu1 %v1977_v18 }
 0x31f   : > { %v1370_v46 = vpop.f32.mrf.mxu1 }
 0x320   : > { %v1561_v42 = vmax.f32 %v1553_v22, %v1370_v46  ;;  %v1967_v46 = vld [vmem:[%s8619_s5 + $0x490] sm:$0xff] }
 0x321   : > { %v1372_v47 = vpop.f32.mrf.mxu1 }
 0x323   : > { %v1375_v48 = vpop.f32.mrf.mxu1 }
 0x324   : > { %v1562_v40 = vmax.f32 %v1554_v25, %v1375_v48  ;;  %v1976_v25 = vld [vmem:[%s8619_s5 + $0x4d8] sm:$0xff]  ;;  %v1966_v48 = vld [vmem:[%s8619_s5 + $0x488] sm:$0xff] }
 0x325   : > { %v1377_v49 = vpop.f32.mrf.mxu1  ;;  %2267 = vmatprep.subr.mxu1 %v1976_v25 }
 0x326   : > { %2268 = vmatpush1.msra.mxu1 %v1975_v26  ;;  %v1965_v49 = vld [vmem:[%s8619_s5 + $0x480] sm:$0xff] }
 0x327   : > { %v1380_v50 = vpop.f32.mrf.mxu1  ;;  %2269 = vmatprep.subr.mxu1 %v1974_v30 }
 0x328   : > { %v1563_v51 = vmax.f32 %v1555_v29, %v1380_v50 }
 0x329   : > { %v1382_v38 = vpop.f32.mrf.mxu1 }
 0x32b   : > { %v1385_v52 = vpop.f32.mrf.mxu1 }
 0x32c   : > { %v1564_v53 = vmax.f32 %v1556_v32, %v1385_v52  ;;  %v1973_v32 = vld [vmem:[%s8619_s5 + $0x4c0] sm:$0xff] }
 0x32d   : > { %v1387_v54 = vpop.f32.mrf.mxu1  ;;  %2270 = vmatpush1.msra.mxu1 %v1973_v32 }
 0x32f   : > { %v1390_v34 = vpop.f32.mrf.mxu1 }
 0x330   : > { %v1565_v55 = vmax.f32 %v1557_v39, %v1390_v34  ;;  %v1972_v39 = vld [vmem:[%s8619_s5 + $0x4b8] sm:$0xff] }
 0x331   : > { %v1392_v56 = vpop.f32.mrf.mxu1  ;;  %2271 = vmatprep.subr.mxu1 %v1972_v39 }
 0x332   : > { %2272 = vmatpush1.msra.mxu1 %v1971_v33  ;;  %v1850_v33 = vld [vmem:[%s8619_s5 + $0xe8] sm:$0xff] }
 0x333   : > { %v1395_v57 = vpop.f32.mrf.mxu1  ;;  %2273 = vmatprep.subr.mxu1 %v1970_v44  ;;  %v1848_v44 = vld [vmem:[%s8619_s5 + $0xd8] sm:$0xff] }
 0x334   : > { %v1566_v58 = vmax.f32 %v5578_v43, %v1395_v57 }
 0x335   : > { %v1397_v59 = vpop.f32.mrf.mxu1 }
 0x337   : > { %v1400_v60 = vpop.f32.mrf.mxu1 }
 0x338   : > { %v1567_v61 = vmax.f32 %v5580_v45, %v1400_v60  ;;  %v1969_v45 = vld [vmem:[%s8619_s5 + $0x4a0] sm:$0xff] }
 0x339   : > { %v1402_v62 = vpop.f32.mrf.mxu1  ;;  %2274 = vmatpush1.msra.mxu1 %v1969_v45  ;;  %v1597_v45 = vld [vmem:[%s8618_s4 + $0x20] sm:$0xff] }
 0x33a   : > { %2275 = vmatprep.subr.mxu1 %v1968_v15  ;;  %v1846_v15 = vld [vmem:[%s8619_s5 + $0xc8] sm:$0xff] }
 0x33b   : > { %v5590_v63 = vpop.f32.mrf.mxu1  ;;  %2276 = vmatpush1.msra.mxu1 %v1967_v46  ;;  %v1598_v46 = vld [vmem:[%s8618_s4 + $0x28] sm:$0xff] }
 0x33c   : > { %v1568_v0 = vmax.f32 %v5582_v2, %v5590_v63  ;;  %2277 = vmatprep.subr.mxu1 %v1966_v48  ;;  %v1843_v48 = vld [vmem:[%s8619_s5 + $0xb0] sm:$0xff] }
 0x33d   : > { %v1407_v3 = vpop.f32.mrf.mxu1  ;;  %2278 = vmatpush1.msra.mxu1 %v1965_v49  ;;  %v1841_v49 = vld [vmem:[%s8619_s5 + $0xa0] sm:$0xff] }
 0x33f   : > { %v1410_v4 = vpop.f32.mrf.mxu1 }
 0x340   : > { %v5594_v5 = vmax.f32 %v1561_v42, %v1410_v4 }
 0x341   : > { %v1412_v6 = vpop.f32.mrf.mxu1 }
 0x343   : > { %v1415_v10 = vpop.f32.mrf.mxu1 }
 0x344   : > { %v5602_v11 = vmax.f32 %v1562_v40, %v1415_v10 }
 0x345   : > { %v1417_v12 = vpop.f32.mrf.mxu1 }
 0x347   : > { %v1420_v13 = vpop.f32.mrf.mxu1 }
 0x348   : > { %v5604_v14 = vmax.f32 %v1563_v51, %v1420_v13 }
 0x349   : > { %v1422_v16 = vpop.f32.mrf.mxu1 }
 0x34b   : > { %v1425_v19 = vpop.f32.mrf.mxu1 }
 0x34c   : > { %v5612_v20 = vmax.f32 %v1564_v53, %v1425_v19 }
 0x34d   : > { %v1427_v22 = vpop.f32.mrf.mxu1 }
 0x34f   : > { %v1430_v23 = vpop.f32.mrf.mxu1 }
 0x350   : > { %v5614_v24 = vmax.f32 %v1565_v55, %v1430_v23 }
 0x351   : > { %v1432_v28 = vpop.f32.mrf.mxu1 }
 0x353   : > { %v1435_v29 = vpop.f32.mrf.mxu1 }
 0x354   : > { %v5625_v31 = vmax.f32 %v1566_v58, %v1435_v29 }
 0x355   : > { %v1437_v35 = vpop.f32.mrf.mxu1 }
 0x357   : > { %v1440_v37 = vpop.f32.mrf.mxu1 }
 0x358   : > { %v1575_v41 = vmax.f32 %v1567_v61, %v1440_v37 }
 0x359   : > { %v1442_v43 = vpop.f32.mrf.mxu1 }
 0x35a   : > { %v1849_v43 = vld [vmem:[%s8619_s5 + $0xe0] sm:$0xff] }
 0x35b   : > { %v1445_v27 = vpop.f32.mrf.mxu1 }
 0x35c   : > { %v1576_v18 = vmax.f32 %v1568_v0, %v1445_v27  ;;  %v1596_v27 = vld [vmem:[%s8618_s4 + $0x18] sm:$0xff] }
 0x35d   : > { %v1447_v21 = vpop.f32.mrf.mxu1 }
 0x35e   : > { %v1847_v21 = vld [vmem:[%s8619_s5 + $0xd0] sm:$0xff] }
 0x35f   : > { %v5645_v9 = vpop.f32.mrf.mxu1 }
 0x360   : > { %v1577_v42 = vmax.f32 %v5594_v5, %v5645_v9  ;;  %v1851_v5 = vld [vmem:[%s8619_s5 + $0xf0] sm:$0xff]  ;;  %v1845_v9 = vld [vmem:[%s8619_s5 + $0xc0] sm:$0xff] }
 0x361   : > { %v1452_v47 = vpop.f32.mrf.mxu1 }
 0x362   : > { %v1599_v47 = vld [vmem:[%s8618_s4 + $0x30] sm:$0xff] }
 0x363   : > { %v1455_v40 = vpop.f32.mrf.mxu1 }
 0x364   : > { %v1578_v50 = vmax.f32 %v5602_v11, %v1455_v40  ;;  %v1842_v40 = vld [vmem:[%s8619_s5 + $0xa8] sm:$0xff] }
 0x365   : > { %v1457_v51 = vpop.f32.mrf.mxu1 }
 0x366   : > { %v1840_v51 = vld [vmem:[%s8619_s5 + $0x98] sm:$0xff] }
 0x367   : > { %v1460_v38 = vpop.f32.mrf.mxu1 }
 0x368   : > { %v1579_v63 = vmax.f32 %v5604_v14, %v1460_v38  ;;  %v1852_v14 = vld [vmem:[%s8619_s5 + $0xf8] sm:$0xff]  ;;  %v1601_v38 = vld [vmem:[%s8618_s4 + $0x40] sm:$0xff] }
 0x369   : > { %v1462_v52 = vpop.f32.mrf.mxu1 }
 0x36a   : > { %v1839_v52 = vld [vmem:[%s8619_s5 + $0x90] sm:$0xff] }
 0x36b   : > { %v1465_v53 = vpop.f32.mrf.mxu1 }
 0x36c   : > { %v1580_v37 = vmax.f32 %v5612_v20, %v1465_v53  ;;  %v1594_v20 = vld [vmem:[%s8618_s4 + $0x8] sm:$0xff] }
 0x36d   : > { %v1467_v36 = vpop.f32.mrf.mxu1  ;;  %v1838_v53 = vld [vmem:[%s8619_s5 + $0x88] sm:$0xff] }
 0x36e   : > { %v1837_v36 = vld [vmem:[%s8619_s5 + $0x80] sm:$0xff] }
 0x36f   : > { %v1470_v54 = vpop.f32.mrf.mxu1 }
 0x370   : > { %v1581_v32 = vmax.f32 %v5614_v24, %v1470_v54  ;;  %v1602_v54 = vld [vmem:[%s8618_s4 + $0x48] sm:$0xff] }
 0x371   : > { %v1472_v34 = vpop.f32.mrf.mxu1 }
 0x372   : > { %v1836_v34 = vld [vmem:[%s8619_s5 + $0x78] sm:$0xff] }
 0x373   : > { %v1475_v55 = vpop.f32.mrf.mxu1 }
 0x374   : > { %v1582_v29 = vmax.f32 %v5625_v31, %v1475_v55  ;;  %v1603_v55 = vld [vmem:[%s8618_s4 + $0x50] sm:$0xff] }
 0x375   : > { %v1477_v56 = vpop.f32.mrf.mxu1 }
 0x376   : > { %v1835_v56 = vld [vmem:[%s8619_s5 + $0x70] sm:$0xff] }
 0x377   : > { %v1480_v57 = vpop.f32.mrf.mxu1 }
 0x378   : > { %v1583_v25 = vmax.f32 %v1575_v41, %v1480_v57  ;;  %v1595_v41 = vld [vmem:[%s8618_s4 + $0x10] sm:$0xff]  ;;  %v1834_v57 = vld [vmem:[%s8619_s5 + $0x68] sm:$0xff] }
 0x379   : > { %v1482_v58 = vpop.f32.mrf.mxu1 }
 0x37a   : > { %v1833_v58 = vld [vmem:[%s8619_s5 + $0x60] sm:$0xff] }
 0x37b   : > { %v1485_v59 = vpop.f32.mrf.mxu1 }
 0x37c   : > { %v1584_v22 = vmax.f32 %v1576_v18, %v1485_v59  ;;  %v1604_v59 = vld [vmem:[%s8618_s4 + $0x58] sm:$0xff]  ;;  %v1823_v18 = vld [vmem:[%s8619_s5 + $0x10] sm:$0xff] }
 0x37d   : > { %v1487_v60 = vpop.f32.mrf.mxu1 }
 0x37e   : > { %v1832_v60 = vld [vmem:[%s8619_s5 + $0x58] sm:$0xff] }
 0x37f   : > { %v1490_v61 = vpop.f32.mrf.mxu1 }
 0x380   : > { %v1585_v24 = vmax.f32 %v1577_v42, %v1490_v61  ;;  %v1844_v42 = vld [vmem:[%s8619_s5 + $0xb8] sm:$0xff]  ;;  %v1605_v61 = vld [vmem:[%s8618_s4 + $0x60] sm:$0xff] }
 0x381   : > { %v1492_v62 = vpop.f32.mrf.mxu1 }
 0x382   : > { %v1831_v62 = vld [vmem:[%s8619_s5 + $0x50] sm:$0xff] }
 0x383   : > { %v1495_v3 = vpop.f32.mrf.mxu1 }
 0x384   : > { %v1586_v31 = vmax.f32 %v1578_v50, %v1495_v3  ;;  %v1600_v50 = vld [vmem:[%s8618_s4 + $0x38] sm:$0xff]  ;;  %v1830_v3 = vld [vmem:[%s8619_s5 + $0x48] sm:$0xff] }
 0x385   : > { %v1497_v4 = vpop.f32.mrf.mxu1 }
 0x386   : > { %v1829_v4 = vld [vmem:[%s8619_s5 + $0x40] sm:$0xff] }
 0x387   : > { %v1500_v6 = vpop.f32.mrf.mxu1 }
 0x388   : > { %v1587_v39 = vmax.f32 %v1579_v63, %v1500_v6  ;;  %v1606_v6 = vld [vmem:[%s8618_s4 + $0x68] sm:$0xff]  ;;  %v1875_v63 = vld [vmem:[%s8619_s5 + $0x1b0] sm:$0xff] }
 0x389   : > { %v1502_v7 = vpop.f32.mrf.mxu1 }
 0x38a   : > { %v1828_v7 = vld [vmem:[%s8619_s5 + $0x38] sm:$0xff] }
 0x38b   : > { %v1505_v8 = vpop.f32.mrf.mxu1 }
 0x38c   : > { %v1588_v0 = vmax.f32 %v1580_v37, %v1505_v8  ;;  %v1607_v8 = vld [vmem:[%s8618_s4 + $0x70] sm:$0xff]  ;;  %v1877_v37 = vld [vmem:[%s8619_s5 + $0x1c0] sm:$0xff] }
 0x38d   : > { %v1507_v10 = vpop.f32.mrf.mxu1 }
 0x38e   : > { %v1827_v10 = vld [vmem:[%s8619_s5 + $0x30] sm:$0xff] }
 0x38f   : > { %v1510_v11 = vpop.f32.mrf.mxu1 }
 0x390   : > { %v1589_v2 = vmax.f32 %v1581_v32, %v1510_v11  ;;  %v1826_v11 = vld [vmem:[%s8619_s5 + $0x28] sm:$0xff]  ;;  %v1879_v32 = vld [vmem:[%s8619_s5 + $0x1d0] sm:$0xff] }
 0x391   : > { %v1512_v12 = vpop.f32.mrf.mxu1 }
 0x392   : > { %v1825_v12 = vld [vmem:[%s8619_s5 + $0x20] sm:$0xff] }
 0x393   : > { %v1515_v13 = vpop.f32.mrf.mxu1 }
 0x394   : > { %v1590_v35 = vmax.f32 %v1582_v29, %v1515_v13  ;;  %v1608_v13 = vld [vmem:[%s8618_s4 + $0x78] sm:$0xff]  ;;  %v1881_v29 = vld [vmem:[%s8619_s5 + $0x1e0] sm:$0xff] }
 0x395   : > { %v1517_v16 = vpop.f32.mrf.mxu1 }
 0x396   : > { %v1824_v16 = vld [vmem:[%s8619_s5 + $0x18] sm:$0xff] }
 0x397   : > { %v1520_v17 = vpop.f32.mrf.mxu1 }
 0x398   : > { %v1591_v30 = vmax.f32 %v1583_v25, %v1520_v17  ;;  %v1609_v17 = vld [vmem:[%s8618_s4 + $0x80] sm:$0xff]  ;;  %v1884_v25 = vld [vmem:[%s8619_s5 + $0x1f8] sm:$0xff] }
 0x399   : > { %v1522_v19 = vpop.f32.mrf.mxu1 }
 0x39a   : > { %v1822_v19 = vld [vmem:[%s8619_s5 + $0x8] sm:$0xff] }
 0x39b   : > { %v1525_v23 = vpop.f32.mrf.mxu1 }
 0x39c   : > { %v1592_v26 = vmax.f32 %v1584_v22, %v1525_v23  ;;  %v1821_v22 = vld [vmem:[%s8619_s5] sm:$0xff]  ;;  %v1610_v23 = vld [vmem:[%s8618_s4 + $0x88] sm:$0xff]  ;;  %s4593_s4 = scalar_lea.vmem %s4243_s27, 16 }
 0x39d   : > { %v1527_v28 = vpop.f32.mrf.mxu1  ;;  %p4594_p11 = scmp.ne.s32.totalorder %s4243_s27, %s4593_s4 }
 0x39e   : > { %4414 = vmatprep.subr.mxu0 %v1592_v26  ;;  %v1882_v28 = vld [vmem:[%s8619_s5 + $0x1e8] sm:$0xff] }
 0x39f   : > { %4415 = vmatpush3.msra.mxu0 %v1592_v26  ;;  %v1883_v26 = vld [vmem:[%s8619_s5 + $0x1f0] sm:$0xff]  ;;  %p4595_p12 = pnand %p4594_p11, %p4796_p5 }
 0x3a0   : > { %4416 = vmatprep.subr.mxu0 %v1591_v30 }
 0x3a1   : > { %4417 = vmatpush3.msra.mxu0 %v1591_v30  ;;  %v1880_v30 = vld [vmem:[%s8619_s5 + $0x1d8] sm:$0xff]  ;;  %p4596_p13 = pneg %p4595_p12 }
 0x3a2   : > { %4418 = vmatprep.subr.mxu0 %v1590_v35 }
 0x3a3   : > { %4419 = vmatpush3.msra.mxu0 %v1590_v35  ;;  %v1878_v35 = vld [vmem:[%s8619_s5 + $0x1c8] sm:$0xff] }
 0x3a4   : > { %4420 = vmatprep.subr.mxu0 %v1589_v2 }
 0x3a5   : > { %4421 = vmatpush3.msra.mxu0 %v1589_v2  ;;  %v1876_v2 = vld [vmem:[%s8619_s5 + $0x1b8] sm:$0xff] }
 0x3a6   : > { %4422 = vmatprep.subr.mxu0 %v1588_v0 }
 0x3a7   : > { %4423 = vmatpush3.msra.mxu0 %v1588_v0  ;;  %v1874_v0 = vld [vmem:[%s8619_s5 + $0x1a8] sm:$0xff] }
 0x3a8   : > { %4424 = vmatprep.subr.mxu0 %v1587_v39 }
 0x3a9   : > { %4425 = vmatpush3.msra.mxu0 %v1587_v39  ;;  %v1873_v39 = vld [vmem:[%s8619_s5 + $0x1a0] sm:$0xff] }
 0x3aa   : > { %4426 = vmatprep.subr.mxu0 %v1586_v31 }
 0x3ab   : > { %4427 = vmatpush3.msra.mxu0 %v1586_v31  ;;  %v1872_v31 = vld [vmem:[%s8619_s5 + $0x198] sm:$0xff] }
 0x3ac   : > { %4428 = vmatprep.subr.mxu0 %v1585_v24 }
 0x3ad   : > { %4429 = vmatpush3.msra.mxu0 %v1585_v24  ;;  %v1871_v24 = vld [vmem:[%s8619_s5 + $0x190] sm:$0xff] }
 0x3ae   : > { %4431 = vmatmul.mubr.msk.f32.vlgmr.msra.gmra.mxu0 %vm1611_vm0, %v1594_v20  ;;  %2109 = vmatprep.subr.mxu0 %v1852_v14  ;;  %v1870_v20 = vld [vmem:[%s8619_s5 + $0x188] sm:$0xff]  ;;  %v1869_v14 = vld [vmem:[%s8619_s5 + $0x180] sm:$0xff] }
 0x3af   : > { %4433 = vmatprep.mubr.msk.f32.mxu0 %vm1611_vm0, %v1595_v41  ;;  %2110 = vmatpush1.msra.mxu0 %v1851_v5  ;;  %v1868_v41 = vld [vmem:[%s8619_s5 + $0x178] sm:$0xff]  ;;  %v1867_v5 = vld [vmem:[%s8619_s5 + $0x170] sm:$0xff] }
 0x3b0   : > { %2111 = vmatprep.subr.mxu0 %v1850_v33  ;;  %v1866_v33 = vld [vmem:[%s8619_s5 + $0x168] sm:$0xff] }
 0x3b1   : > { %2112 = vmatpush1.msra.mxu0 %v1849_v43  ;;  %v1865_v43 = vld [vmem:[%s8619_s5 + $0x160] sm:$0xff] }
 0x3b2   : > { %4434 = vmatmul.mubr.msk.f32.gmra.mxu0 %vm1611_vm0, %v1596_v27  ;;  %2113 = vmatprep.subr.mxu0 %v1848_v44  ;;  %v1864_v27 = vld [vmem:[%s8619_s5 + $0x158] sm:$0xff]  ;;  %v1863_v44 = vld [vmem:[%s8619_s5 + $0x150] sm:$0xff] }
 0x3b3   : > { %4436 = vmatprep.mubr.msk.f32.mxu0 %vm1611_vm0, %v1597_v45  ;;  %2114 = vmatpush1.msra.mxu0 %v1847_v21  ;;  %v1862_v45 = vld [vmem:[%s8619_s5 + $0x148] sm:$0xff]  ;;  %v1861_v21 = vld [vmem:[%s8619_s5 + $0x140] sm:$0xff] }
 0x3b4   : > { %2115 = vmatprep.subr.mxu0 %v1846_v15  ;;  %v1860_v15 = vld [vmem:[%s8619_s5 + $0x138] sm:$0xff] }
 0x3b5   : > { %2116 = vmatpush1.msra.mxu0 %v1845_v9  ;;  %v1859_v9 = vld [vmem:[%s8619_s5 + $0x130] sm:$0xff] }
 0x3b6   : > { %4437 = vmatmul.mubr.msk.f32.gmra.mxu0 %vm1611_vm0, %v1598_v46  ;;  %2117 = vmatprep.subr.mxu0 %v1844_v42  ;;  %v1858_v46 = vld [vmem:[%s8619_s5 + $0x128] sm:$0xff]  ;;  %v1857_v42 = vld [vmem:[%s8619_s5 + $0x120] sm:$0xff] }
 0x3b7   : > { %4439 = vmatprep.mubr.msk.f32.mxu0 %vm1611_vm0, %v1599_v47  ;;  %2118 = vmatpush1.msra.mxu0 %v1843_v48  ;;  %v1964_v47 = vld [vmem:[%s8619_s5 + $0x478] sm:$0xff] }
 0x3b8   : > { %2119 = vmatprep.subr.mxu0 %v1842_v40  ;;  %v1856_v48 = vld [vmem:[%s8619_s5 + $0x118] sm:$0xff]  ;;  %v1963_v40 = vld [vmem:[%s8619_s5 + $0x470] sm:$0xff]  ;;  %2279 = vmatprep.subr.mxu1 %v1964_v47 }
 0x3b9   : > { %2120 = vmatpush1.msra.mxu0 %v1841_v49  ;;  %v1855_v49 = vld [vmem:[%s8619_s5 + $0x110] sm:$0xff]  ;;  %2280 = vmatpush1.msra.mxu1 %v1963_v40  ;;  %v1910_v40 = vld [vmem:[%s8619_s5 + $0x2c8] sm:$0xff] }
 0x3ba   : > { %4440 = vmatmul.mubr.msk.f32.gmra.mxu0 %vm1611_vm0, %v1600_v50  ;;  %2121 = vmatprep.subr.mxu0 %v1840_v51  ;;  %v1854_v50 = vld [vmem:[%s8619_s5 + $0x108] sm:$0xff]  ;;  %v1853_v51 = vld [vmem:[%s8619_s5 + $0x100] sm:$0xff]  ;;  %v1911_v47 = vld [vmem:[%s8619_s5 + $0x2d0] sm:$0xff] }
 0x3bb   : > { %4442 = vmatprep.mubr.msk.f32.mxu0 %vm1611_vm0, %v1601_v38  ;;  %2122 = vmatpush1.msra.mxu0 %v1839_v52  ;;  %v1916_v38 = vld [vmem:[%s8619_s5 + $0x2f8] sm:$0xff]  ;;  %v1962_v52 = vld [vmem:[%s8619_s5 + $0x468] sm:$0xff] }
 0x3bc   : > { %2123 = vmatprep.subr.mxu0 %v1838_v53  ;;  %2281 = vmatprep.subr.mxu1 %v1962_v52  ;;  %v1961_v53 = vld [vmem:[%s8619_s5 + $0x460] sm:$0xff] }
 0x3bd   : > { %2124 = vmatpush1.msra.mxu0 %v1837_v36  ;;  %2282 = vmatpush1.msra.mxu1 %v1961_v53  ;;  %v1960_v36 = vld [vmem:[%s8619_s5 + $0x458] sm:$0xff]  ;;  %v1906_v53 = vld [vmem:[%s8619_s5 + $0x2a8] sm:$0xff] }
 0x3be   : > { %4443 = vmatmul.mubr.msk.f32.gmra.mxu0 %vm1611_vm0, %v1602_v54  ;;  %2125 = vmatprep.subr.mxu0 %v1836_v34  ;;  %v1959_v54 = vld [vmem:[%s8619_s5 + $0x450] sm:$0xff]  ;;  %v1958_v34 = vld [vmem:[%s8619_s5 + $0x448] sm:$0xff] }
 0x3bf   : > { %4445 = vmatprep.mubr.msk.f32.mxu0 %vm1611_vm0, %v1603_v55  ;;  %2126 = vmatpush1.msra.mxu0 %v1835_v56  ;;  %v1957_v55 = vld [vmem:[%s8619_s5 + $0x440] sm:$0xff]  ;;  %v1956_v56 = vld [vmem:[%s8619_s5 + $0x438] sm:$0xff] }
 0x3c0   : > { %2127 = vmatprep.subr.mxu0 %v1834_v57  ;;  %2283 = vmatprep.subr.mxu1 %v1960_v36  ;;  %v1955_v57 = vld [vmem:[%s8619_s5 + $0x430] sm:$0xff]  ;;  %v1905_v36 = vld [vmem:[%s8619_s5 + $0x2a0] sm:$0xff] }
 0x3c1   : > { %2128 = vmatpush1.msra.mxu0 %v1833_v58  ;;  %2284 = vmatpush1.msra.mxu1 %v1959_v54  ;;  %v1954_v58 = vld [vmem:[%s8619_s5 + $0x428] sm:$0xff] }
 0x3c2   : > { %4446 = vmatmul.mubr.msk.f32.gmra.mxu0 %vm1611_vm0, %v1604_v59  ;;  %2129 = vmatprep.subr.mxu0 %v1832_v60  ;;  %v1953_v59 = vld [vmem:[%s8619_s5 + $0x420] sm:$0xff]  ;;  %v1952_v60 = vld [vmem:[%s8619_s5 + $0x418] sm:$0xff] }
 0x3c3   : > { %4448 = vmatprep.mubr.msk.f32.mxu0 %vm1611_vm0, %v1605_v61  ;;  %2130 = vmatpush1.msra.mxu0 %v1831_v62  ;;  %v1951_v61 = vld [vmem:[%s8619_s5 + $0x410] sm:$0xff]  ;;  %v1950_v62 = vld [vmem:[%s8619_s5 + $0x408] sm:$0xff] }
 0x3c4   : > { %2131 = vmatprep.subr.mxu0 %v1830_v3  ;;  %2285 = vmatprep.subr.mxu1 %v1958_v34  ;;  %v1949_v3 = vld [vmem:[%s8619_s5 + $0x400] sm:$0xff]  ;;  %v1904_v34 = vld [vmem:[%s8619_s5 + $0x298] sm:$0xff] }
 0x3c5   : > { %2132 = vmatpush1.msra.mxu0 %v1829_v4  ;;  %2286 = vmatpush1.msra.mxu1 %v1957_v55  ;;  %v2012_v4 = vld [vmem:[%s8619_s5 + $0x5f8] sm:$0xff]  ;;  %v1903_v55 = vld [vmem:[%s8619_s5 + $0x290] sm:$0xff] }
 0x3c6   : > { %4449 = vmatmul.mubr.msk.f32.gmra.mxu0 %vm1611_vm0, %v1606_v6  ;;  %2133 = vmatprep.subr.mxu0 %v1828_v7  ;;  %v2011_v6 = vld [vmem:[%s8619_s5 + $0x5f0] sm:$0xff]  ;;  %v2010_v7 = vld [vmem:[%s8619_s5 + $0x5e8] sm:$0xff] }
 0x3c7   : > { %4451 = vmatprep.mubr.msk.f32.mxu0 %vm1611_vm0, %v1607_v8  ;;  %2134 = vmatpush1.msra.mxu0 %v1827_v10  ;;  %v2009_v8 = vld [vmem:[%s8619_s5 + $0x5e0] sm:$0xff]  ;;  %v2008_v10 = vld [vmem:[%s8619_s5 + $0x5d8] sm:$0xff] }
 0x3c8   : > { %2135 = vmatprep.subr.mxu0 %v1826_v11  ;;  %2287 = vmatprep.subr.mxu1 %v1956_v56  ;;  %v2007_v11 = vld [vmem:[%s8619_s5 + $0x5d0] sm:$0xff] }
 0x3c9   : > { %2136 = vmatpush1.msra.mxu0 %v1825_v12  ;;  %2288 = vmatpush1.msra.mxu1 %v1955_v57  ;;  %v2006_v12 = vld [vmem:[%s8619_s5 + $0x5c8] sm:$0xff] }
 0x3ca   : > { %4452 = vmatmul.mubr.msk.f32.gmra.mxu0 %vm1611_vm0, %v1608_v13  ;;  %2137 = vmatprep.subr.mxu0 %v1824_v16  ;;  %v2005_v13 = vld [vmem:[%s8619_s5 + $0x5c0] sm:$0xff]  ;;  %v2004_v16 = vld [vmem:[%s8619_s5 + $0x5b8] sm:$0xff]  ;;  %v1902_v57 = vld [vmem:[%s8619_s5 + $0x288] sm:$0xff] }
 0x3cb   : > { %4454 = vmatprep.mubr.msk.f32.mxu0 %vm1611_vm0, %v1609_v17  ;;  %2138 = vmatpush1.msra.mxu0 %v1823_v18  ;;  %v2003_v17 = vld [vmem:[%s8619_s5 + $0x5b0] sm:$0xff]  ;;  %v2002_v18 = vld [vmem:[%s8619_s5 + $0x5a8] sm:$0xff] }
 0x3cc   : > { %2139 = vmatprep.subr.mxu0 %v1822_v19  ;;  %2289 = vmatprep.subr.mxu1 %v1954_v58  ;;  %v2001_v19 = vld [vmem:[%s8619_s5 + $0x5a0] sm:$0xff] }
 0x3cd   : > { %2140 = vmatpush1.msra.mxu0 %v1821_v22  ;;  %2290 = vmatpush1.msra.mxu1 %v1953_v59  ;;  %v2000_v22 = vld [vmem:[%s8619_s5 + $0x598] sm:$0xff]  ;;  %v1901_v58 = vld [vmem:[%s8619_s5 + $0x280] sm:$0xff] }
 0x3ce   : > { %4455 = vmatmul.mubr.msk.f32.gmra.mxu0 %vm1611_vm0, %v1610_v23  ;;  %2141 = vmatprep.subr.mxu0 %v1884_v25  ;;  %v1999_v23 = vld [vmem:[%s8619_s5 + $0x590] sm:$0xff]  ;;  %v1998_v25 = vld [vmem:[%s8619_s5 + $0x588] sm:$0xff] }
 0x3cf   : > { %2142 = vmatpush2.msra.mxu0 %v1883_v26  ;;  %2291 = vmatprep.subr.mxu1 %v1952_v60  ;;  %v1997_v26 = vld [vmem:[%s8619_s5 + $0x580] sm:$0xff]  ;;  %v1900_v60 = vld [vmem:[%s8619_s5 + $0x278] sm:$0xff] }
 0x3d0   : > { %2143 = vmatprep.subr.mxu0 %v1882_v28  ;;  %2292 = vmatpush1.msra.mxu1 %v1951_v61  ;;  %v1996_v28 = vld [vmem:[%s8619_s5 + $0x578] sm:$0xff]  ;;  %v1899_v61 = vld [vmem:[%s8619_s5 + $0x270] sm:$0xff] }
 0x3d1   : > { %2144 = vmatpush2.msra.mxu0 %v1881_v29  ;;  %2293 = vmatprep.subr.mxu1 %v1950_v62  ;;  %v1995_v29 = vld [vmem:[%s8619_s5 + $0x570] sm:$0xff] }
 0x3d2   : > { %2145 = vmatprep.subr.mxu0 %v1880_v30  ;;  %2294 = vmatpush1.msra.mxu1 %v1949_v3  ;;  %v1994_v30 = vld [vmem:[%s8619_s5 + $0x568] sm:$0xff]  ;;  %v2107_v3 = vld [vmem:[%s8619_s5 + $0x8f0] sm:$0xff] }
 0x3d3   : > { %2146 = vmatpush2.msra.mxu0 %v1879_v32  ;;  %2295 = vmatprep.subr.mxu1 %v2012_v4  ;;  %v1993_v32 = vld [vmem:[%s8619_s5 + $0x560] sm:$0xff]  ;;  %v1898_v4 = vld [vmem:[%s8619_s5 + $0x268] sm:$0xff] }
 0x3d4   : > { %2147 = vmatprep.subr.mxu0 %v1878_v35  ;;  %2296 = vmatpush2.msra.mxu1 %v2011_v6  ;;  %v1992_v35 = vld [vmem:[%s8619_s5 + $0x558] sm:$0xff]  ;;  %v2106_v6 = vld [vmem:[%s8619_s5 + $0x8e8] sm:$0xff] }
 0x3d5   : > { %2148 = vmatpush2.msra.mxu0 %v1877_v37  ;;  %2297 = vmatprep.subr.mxu1 %v2010_v7  ;;  %v1991_v37 = vld [vmem:[%s8619_s5 + $0x550] sm:$0xff]  ;;  %v1897_v7 = vld [vmem:[%s8619_s5 + $0x260] sm:$0xff] }
 0x3d6   : > { %2149 = vmatprep.subr.mxu0 %v1876_v2  ;;  %2298 = vmatpush2.msra.mxu1 %v2009_v8  ;;  %v1990_v2 = vld [vmem:[%s8619_s5 + $0x548] sm:$0xff]  ;;  %v1896_v8 = vld [vmem:[%s8619_s5 + $0x258] sm:$0xff] }
 0x3d7   : > { %2150 = vmatpush2.msra.mxu0 %v1875_v63  ;;  %2299 = vmatprep.subr.mxu1 %v2008_v10  ;;  %v1989_v63 = vld [vmem:[%s8619_s5 + $0x540] sm:$0xff] }
 0x3d8   : > { %2151 = vmatprep.subr.mxu0 %v1874_v0  ;;  %2300 = vmatpush2.msra.mxu1 %v2007_v11  ;;  %v1988_v0 = vld [vmem:[%s8619_s5 + $0x538] sm:$0xff]  ;;  %v2105_v10 = vld [vmem:[%s8619_s5 + $0x8e0] sm:$0xff]  ;;  %v1895_v11 = vld [vmem:[%s8619_s5 + $0x250] sm:$0xff] }
 0x3d9   : > { %2152 = vmatpush2.msra.mxu0 %v1873_v39  ;;  %2301 = vmatprep.subr.mxu1 %v2006_v12  ;;  %v1987_v39 = vld [vmem:[%s8619_s5 + $0x530] sm:$0xff]  ;;  %v1894_v12 = vld [vmem:[%s8619_s5 + $0x248] sm:$0xff] }
 0x3da   : > { %2153 = vmatprep.subr.mxu0 %v1872_v31  ;;  %2302 = vmatpush2.msra.mxu1 %v2005_v13  ;;  %v1986_v31 = vld [vmem:[%s8619_s5 + $0x528] sm:$0xff]  ;;  %v2104_v13 = vld [vmem:[%s8619_s5 + $0x8d8] sm:$0xff] }
 0x3db   : > { %2154 = vmatpush2.msra.mxu0 %v1871_v24  ;;  %2303 = vmatprep.subr.mxu1 %v2004_v16  ;;  %v1985_v24 = vld [vmem:[%s8619_s5 + $0x520] sm:$0xff] }
 0x3dc   : > { %2155 = vmatprep.subr.mxu0 %v1870_v20  ;;  %2304 = vmatpush2.msra.mxu1 %v2003_v17  ;;  %v1984_v20 = vld [vmem:[%s8619_s5 + $0x518] sm:$0xff]  ;;  %v1893_v16 = vld [vmem:[%s8619_s5 + $0x240] sm:$0xff]  ;;  %v2103_v17 = vld [vmem:[%s8619_s5 + $0x8d0] sm:$0xff] }
 0x3dd   : > { %2156 = vmatpush2.msra.mxu0 %v1869_v14  ;;  %2305 = vmatprep.subr.mxu1 %v2002_v18  ;;  %v1983_v14 = vld [vmem:[%s8619_s5 + $0x510] sm:$0xff]  ;;  %v1892_v18 = vld [vmem:[%s8619_s5 + $0x238] sm:$0xff] }
 0x3de   : > { %2157 = vmatprep.subr.mxu0 %v1868_v41  ;;  %2306 = vmatpush2.msra.mxu1 %v2001_v19  ;;  %v1982_v41 = vld [vmem:[%s8619_s5 + $0x508] sm:$0xff] }
 0x3df   : > { %2158 = vmatpush2.msra.mxu0 %v1867_v5  ;;  %2307 = vmatprep.subr.mxu1 %v2000_v22  ;;  %v1981_v5 = vld [vmem:[%s8619_s5 + $0x500] sm:$0xff]  ;;  %v2102_v19 = vld [vmem:[%s8619_s5 + $0x8c8] sm:$0xff]  ;;  %v1891_v22 = vld [vmem:[%s8619_s5 + $0x230] sm:$0xff] }
 0x3e0   : > { %2159 = vmatprep.subr.mxu0 %v1866_v33  ;;  %2308 = vmatpush2.msra.mxu1 %v1999_v23  ;;  %v2108_v33 = vld [vmem:[%s8619_s5 + $0x8f8] sm:$0xff]  ;;  %v2101_v23 = vld [vmem:[%s8619_s5 + $0x8c0] sm:$0xff] }
 0x3e1   : > { %2160 = vmatpush2.msra.mxu0 %v1865_v43  ;;  %2309 = vmatprep.subr.mxu1 %v1998_v25  ;;  %v1890_v25 = vld [vmem:[%s8619_s5 + $0x228] sm:$0xff] }
 0x3e2   : > { %2161 = vmatprep.subr.mxu0 %v1864_v27  ;;  %2310 = vmatpush2.msra.mxu1 %v1997_v26  ;;  %v2100_v26 = vld [vmem:[%s8619_s5 + $0x8b8] sm:$0xff] }
 0x3e3   : > { %2162 = vmatpush2.msra.mxu0 %v1863_v44  ;;  %2311 = vmatprep.subr.mxu1 %v1996_v28  ;;  %v1889_v28 = vld [vmem:[%s8619_s5 + $0x220] sm:$0xff] }
 0x3e4   : > { %2163 = vmatprep.subr.mxu0 %v1862_v45  ;;  %2312 = vmatpush2.msra.mxu1 %v1995_v29  ;;  %v2099_v29 = vld [vmem:[%s8619_s5 + $0x8b0] sm:$0xff] }
 0x3e5   : > { %2164 = vmatpush2.msra.mxu0 %v1861_v21  ;;  %2313 = vmatprep.subr.mxu1 %v1994_v30  ;;  %v1915_v21 = vld [vmem:[%s8619_s5 + $0x2f0] sm:$0xff]  ;;  %v1888_v30 = vld [vmem:[%s8619_s5 + $0x218] sm:$0xff] }
 0x3e6   : > { %2165 = vmatprep.subr.mxu0 %v1860_v15  ;;  %2314 = vmatpush2.msra.mxu1 %v1993_v32  ;;  %v1914_v15 = vld [vmem:[%s8619_s5 + $0x2e8] sm:$0xff] }
 0x3e7   : > { %2166 = vmatpush2.msra.mxu0 %v1859_v9  ;;  %2315 = vmatprep.subr.mxu1 %v1992_v35  ;;  %v1913_v9 = vld [vmem:[%s8619_s5 + $0x2e0] sm:$0xff]  ;;  %v2098_v32 = vld [vmem:[%s8619_s5 + $0x8a8] sm:$0xff]  ;;  %v1887_v35 = vld [vmem:[%s8619_s5 + $0x210] sm:$0xff] }
 0x3e8   : > { %2167 = vmatprep.subr.mxu0 %v1858_v46  ;;  %2316 = vmatpush2.msra.mxu1 %v1991_v37  ;;  %v2097_v37 = vld [vmem:[%s8619_s5 + $0x8a0] sm:$0xff] }
 0x3e9   : > { %2168 = vmatpush2.msra.mxu0 %v1857_v42  ;;  %2317 = vmatprep.subr.mxu1 %v1990_v2  ;;  %v1912_v42 = vld [vmem:[%s8619_s5 + $0x2d8] sm:$0xff]  ;;  %v1886_v2 = vld [vmem:[%s8619_s5 + $0x208] sm:$0xff] }
 0x3ea   : > { %2169 = vmatprep.subr.mxu0 %v1856_v48  ;;  %2318 = vmatpush2.msra.mxu1 %v1989_v63  ;;  %v2096_v63 = vld [vmem:[%s8619_s5 + $0x898] sm:$0xff] }
 0x3eb   : > { %2170 = vmatpush2.msra.mxu0 %v1855_v49  ;;  %2319 = vmatprep.subr.mxu1 %v1988_v0  ;;  %v1909_v49 = vld [vmem:[%s8619_s5 + $0x2c0] sm:$0xff] }
 0x3ec   : > { %2171 = vmatprep.subr.mxu0 %v1854_v50  ;;  %2320 = vmatpush2.msra.mxu1 %v1987_v39  ;;  %v1885_v0 = vld [vmem:[%s8619_s5 + $0x200] sm:$0xff]  ;;  %v2095_v39 = vld [vmem:[%s8619_s5 + $0x890] sm:$0xff] }
 0x3ed   : > { %2172 = vmatpush2.msra.mxu0 %v1853_v51  ;;  %2321 = vmatprep.subr.mxu1 %v1986_v31  ;;  %v1908_v51 = vld [vmem:[%s8619_s5 + $0x2b8] sm:$0xff] }
 0x3ee   : > { %2186 = vmatprep.subr.mxu0 %v1916_v38  ;;  %2322 = vmatpush2.msra.mxu1 %v1985_v24  ;;  %v1907_v38 = vld [vmem:[%s8619_s5 + $0x2b0] sm:$0xff]  ;;  %v1948_v24 = vld [vmem:[%s8619_s5 + $0x3f8] sm:$0xff] }
 0x3ef   : > { %2323 = vmatprep.subr.mxu1 %v1984_v20  ;;  %v2094_v20 = vld [vmem:[%s8619_s5 + $0x888] sm:$0xff] }
 0x3f0   : > { %2324 = vmatpush2.msra.mxu1 %v1983_v14  ;;  %v1947_v14 = vld [vmem:[%s8619_s5 + $0x3f0] sm:$0xff] }
 0x3f1   : > { %2325 = vmatprep.subr.mxu1 %v1982_v41  ;;  %v2093_v41 = vld [vmem:[%s8619_s5 + $0x880] sm:$0xff] }
 0x3f2   : > { %2326 = vmatpush2.msra.mxu1 %v1981_v5  ;;  %v1946_v5 = vld [vmem:[%s8619_s5 + $0x3e8] sm:$0xff] }
 0x3f3   : > { %2417 = vmatprep.subr.mxu1 %v2108_v33  ;;  %v2092_v33 = vld [vmem:[%s8619_s5 + $0x878] sm:$0xff] }
 0x46e   : > { %v4432_v43 = vpop.f32.mrf.mxu0 }
 0x470   : > { %v1732_v27 = vpop.f32.mrf.mxu0 }
 0x472   : > { %v4435_v44 = vpop.f32.mrf.mxu0 }
 0x474   : > { %v1742_v45 = vpop.f32.mrf.mxu0 }
 0x475   : > { %2173 = vmatprep.mubr.f32.mxu0 %v1742_v45  ;;  %v1944_v45 = vld [vmem:[%s8619_s5 + $0x3d8] sm:$0xff] }
 0x476   : > { %2174 = vmatmul.mubr.f32.vlgmr.msra.gmra.mxu0 %v1732_v27  ;;  %v6088_v46 = vpop.f32.mrf.mxu0  ;;  %v2091_v27 = vld [vmem:[%s8619_s5 + $0x870] sm:$0xff] }
 0x477   : > { %2187 = vmatpush1.msra.mxu0 %v1915_v21  ;;  %2179 = vmatprep.mubr.f32.mxu0 %v4435_v44  ;;  %v2090_v21 = vld [vmem:[%s8619_s5 + $0x868] sm:$0xff] }
 0x478   : > { %2188 = vmatprep.subr.mxu0 %v1914_v15  ;;  %v6096_v48 = vpop.f32.mrf.mxu0  ;;  %v1943_v15 = vld [vmem:[%s8619_s5 + $0x3d0] sm:$0xff] }
 0x479   : > { %2189 = vmatpush1.msra.mxu0 %v1913_v9  ;;  %v2089_v9 = vld [vmem:[%s8619_s5 + $0x860] sm:$0xff] }
 0x47a   : > { %2190 = vmatprep.subr.mxu0 %v1912_v42  ;;  %v6104_v50 = vpop.f32.mrf.mxu0  ;;  %2180 = vmatmul.mubr.f32.gmra.mxu0 %v4432_v43  ;;  %v1945_v43 = vld [vmem:[%s8619_s5 + $0x3e0] sm:$0xff]  ;;  %v1942_v42 = vld [vmem:[%s8619_s5 + $0x3c8] sm:$0xff] }
 0x47b   : > { %2191 = vmatpush1.msra.mxu0 %v1911_v47  ;;  %v2088_v47 = vld [vmem:[%s8619_s5 + $0x858] sm:$0xff] }
 0x47c   : > { %2192 = vmatprep.subr.mxu0 %v1910_v40  ;;  %v1762_v52 = vpop.f32.mrf.mxu0  ;;  %v1941_v40 = vld [vmem:[%s8619_s5 + $0x3c0] sm:$0xff] }
 0x47d   : > { %2193 = vmatpush1.msra.mxu0 %v1909_v49  ;;  %2250 = vmatprep.mubr.f32.mxu0 %v1762_v52  ;;  %v2087_v49 = vld [vmem:[%s8619_s5 + $0x850] sm:$0xff]  ;;  %v2086_v52 = vld [vmem:[%s8619_s5 + $0x848] sm:$0xff] }
 0x47e   : > { %2194 = vmatprep.subr.mxu0 %v1908_v51  ;;  %v4444_v54 = vpop.f32.mrf.mxu0 }
 0x47f   : > { %2195 = vmatpush1.msra.mxu0 %v1907_v38  ;;  %v1940_v38 = vld [vmem:[%s8619_s5 + $0x3b8] sm:$0xff] }
 0x480   : > { %2196 = vmatprep.subr.mxu0 %v1906_v53  ;;  %v1772_v56 = vpop.f32.mrf.mxu0  ;;  %v1939_v53 = vld [vmem:[%s8619_s5 + $0x3b0] sm:$0xff] }
 0x481   : > { %2197 = vmatpush1.msra.mxu0 %v1905_v36  ;;  %v2085_v36 = vld [vmem:[%s8619_s5 + $0x840] sm:$0xff] }
 0x482   : > { %2198 = vmatprep.subr.mxu0 %v1904_v34  ;;  %v4447_v59 = vpop.f32.mrf.mxu0  ;;  %v2084_v34 = vld [vmem:[%s8619_s5 + $0x838] sm:$0xff] }
 0x483   : > { %2199 = vmatpush1.msra.mxu0 %v1903_v55  ;;  %v1937_v55 = vld [vmem:[%s8619_s5 + $0x3a0] sm:$0xff] }
 0x484   : > { %2200 = vmatprep.subr.mxu0 %v1902_v57  ;;  %v1782_v62 = vpop.f32.mrf.mxu0 }
 0x485   : > { %2201 = vmatpush1.msra.mxu0 %v1901_v58  ;;  %2327 = vmatprep.mubr.f32.mxu1 %v1782_v62  ;;  %v1936_v58 = vld [vmem:[%s8619_s5 + $0x398] sm:$0xff]  ;;  %v1934_v62 = vld [vmem:[%s8619_s5 + $0x388] sm:$0xff] }
 0x486   : > { %2202 = vmatprep.subr.mxu0 %v1900_v60  ;;  %2328 = vmatmul.mubr.f32.vlgmr.msra.gmra.mxu1 %v1772_v56  ;;  %v6217_v31 = vpop.f32.mrf.mxu0  ;;  %v2083_v56 = vld [vmem:[%s8619_s5 + $0x830] sm:$0xff] }
 0x487   : > { %2203 = vmatpush1.msra.mxu0 %v1899_v61  ;;  %2418 = vmatpush1.msra.mxu1 %v2107_v3  ;;  %v1935_v60 = vld [vmem:[%s8619_s5 + $0x390] sm:$0xff]  ;;  %v2081_v61 = vld [vmem:[%s8619_s5 + $0x820] sm:$0xff]  ;;  %v2080_v3 = vld [vmem:[%s8619_s5 + $0x818] sm:$0xff] }
 0x488   : > { %2204 = vmatprep.subr.mxu0 %v1898_v4  ;;  %2419 = vmatprep.subr.mxu1 %v2106_v6  ;;  %v6243_v44 = vpop.f32.mrf.mxu0  ;;  %v1933_v4 = vld [vmem:[%s8619_s5 + $0x380] sm:$0xff] }
 0x489   : > { %2205 = vmatpush1.msra.mxu0 %v1897_v7  ;;  %2333 = vmatprep.mubr.f32.mxu1 %v4447_v59  ;;  %v2082_v59 = vld [vmem:[%s8619_s5 + $0x828] sm:$0xff]  ;;  %v2079_v7 = vld [vmem:[%s8619_s5 + $0x810] sm:$0xff] }
 0x48a   : > { %2206 = vmatprep.subr.mxu0 %v1896_v8  ;;  %2420 = vmatpush1.msra.mxu1 %v2105_v10  ;;  %v6269_v51 = vpop.f32.mrf.mxu0  ;;  %v1932_v8 = vld [vmem:[%s8619_s5 + $0x378] sm:$0xff]  ;;  %v2078_v10 = vld [vmem:[%s8619_s5 + $0x808] sm:$0xff] }
 0x48b   : > { %2207 = vmatpush1.msra.mxu0 %v1895_v11  ;;  %2334 = vmatmul.mubr.f32.gmra.mxu1 %v4444_v54  ;;  %v1938_v54 = vld [vmem:[%s8619_s5 + $0x3a8] sm:$0xff]  ;;  %v1931_v11 = vld [vmem:[%s8619_s5 + $0x370] sm:$0xff] }
 0x48c   : > { %2208 = vmatprep.subr.mxu0 %v1894_v12  ;;  %2421 = vmatprep.subr.mxu1 %v2104_v13  ;;  %v6295_v57 = vpop.f32.mrf.mxu0  ;;  %v2077_v12 = vld [vmem:[%s8619_s5 + $0x800] sm:$0xff]  ;;  %v1930_v13 = vld [vmem:[%s8619_s5 + $0x368] sm:$0xff] }
 0x48d   : > { %2209 = vmatpush1.msra.mxu0 %v1893_v16  ;;  %2422 = vmatpush1.msra.mxu1 %v2103_v17  ;;  %v1929_v16 = vld [vmem:[%s8619_s5 + $0x360] sm:$0xff] }
 0x48e   : > { %2210 = vmatprep.subr.mxu0 %v1892_v18  ;;  %2423 = vmatprep.subr.mxu1 %v2102_v19  ;;  %v4456_v6 = vpop.f32.mrf.mxu0  ;;  %v1928_v18 = vld [vmem:[%s8619_s5 + $0x358] sm:$0xff]  ;;  %v1927_v19 = vld [vmem:[%s8619_s5 + $0x350] sm:$0xff] }
 0x48f   : > { %2211 = vmatpush1.msra.mxu0 %v1891_v22  ;;  %2424 = vmatpush1.msra.mxu1 %v2101_v23  ;;  %v1926_v22 = vld [vmem:[%s8619_s5 + $0x348] sm:$0xff]  ;;  %v1925_v23 = vld [vmem:[%s8619_s5 + $0x340] sm:$0xff] }
 0x490   : > { %2212 = vmatprep.subr.mxu0 %v1890_v25  ;;  %2425 = vmatprep.subr.mxu1 %v2100_v26  ;;  %v1812_v17 = vpop.f32.mrf.mxu0  ;;  %v1924_v25 = vld [vmem:[%s8619_s5 + $0x338] sm:$0xff]  ;;  %v1923_v26 = vld [vmem:[%s8619_s5 + $0x330] sm:$0xff] }
 0x491   : > { %2213 = vmatpush1.msra.mxu0 %v1889_v28  ;;  %2426 = vmatpush1.msra.mxu1 %v2099_v29  ;;  %v1922_v28 = vld [vmem:[%s8619_s5 + $0x328] sm:$0xff]  ;;  %v1921_v29 = vld [vmem:[%s8619_s5 + $0x320] sm:$0xff] }
 0x492   : > { %2214 = vmatprep.subr.mxu0 %v1888_v30  ;;  %2427 = vmatprep.subr.mxu1 %v2098_v32  ;;  %v1920_v30 = vld [vmem:[%s8619_s5 + $0x318] sm:$0xff]  ;;  %v1919_v32 = vld [vmem:[%s8619_s5 + $0x310] sm:$0xff] }
 0x493   : > { %2215 = vmatpush1.msra.mxu0 %v1887_v35  ;;  %2428 = vmatpush1.msra.mxu1 %v2097_v37  ;;  %v1918_v35 = vld [vmem:[%s8619_s5 + $0x308] sm:$0xff]  ;;  %v1917_v37 = vld [vmem:[%s8619_s5 + $0x300] sm:$0xff] }
 0x494   : > { %2216 = vmatprep.subr.mxu0 %v1886_v2  ;;  %2429 = vmatprep.subr.mxu1 %v2096_v63  ;;  %v2044_v2 = vld [vmem:[%s8619_s5 + $0x6f8] sm:$0xff]  ;;  %v2043_v63 = vld [vmem:[%s8619_s5 + $0x6f0] sm:$0xff] }
 0x495   : > { %2217 = vmatpush1.msra.mxu0 %v1885_v0  ;;  %2430 = vmatpush1.msra.mxu1 %v2095_v39  ;;  %v2042_v0 = vld [vmem:[%s8619_s5 + $0x6e8] sm:$0xff]  ;;  %v2041_v39 = vld [vmem:[%s8619_s5 + $0x6e0] sm:$0xff] }
 0x496   : > { %2218 = vmatprep.subr.mxu0 %v1948_v24  ;;  %2431 = vmatprep.subr.mxu1 %v2094_v20  ;;  %v2040_v24 = vld [vmem:[%s8619_s5 + $0x6d8] sm:$0xff]  ;;  %v2039_v20 = vld [vmem:[%s8619_s5 + $0x6d0] sm:$0xff] }
 0x497   : > { %2219 = vmatpush2.msra.mxu0 %v1947_v14  ;;  %2432 = vmatpush1.msra.mxu1 %v2093_v41  ;;  %v2037_v14 = vld [vmem:[%s8619_s5 + $0x6c0] sm:$0xff]  ;;  %v2035_v41 = vld [vmem:[%s8619_s5 + $0x6b0] sm:$0xff] }
 0x498   : > { %2220 = vmatprep.subr.mxu0 %v1946_v5  ;;  %2433 = vmatprep.subr.mxu1 %v2092_v33  ;;  %v2034_v5 = vld [vmem:[%s8619_s5 + $0x6a8] sm:$0xff]  ;;  %v2032_v33 = vld [vmem:[%s8619_s5 + $0x698] sm:$0xff] }
 0x499   : > { %2221 = vmatpush2.msra.mxu0 %v1945_v43  ;;  %2434 = vmatpush1.msra.mxu1 %v2091_v27  ;;  %v2031_v43 = vld [vmem:[%s8619_s5 + $0x690] sm:$0xff]  ;;  %v2030_v27 = vld [vmem:[%s8619_s5 + $0x688] sm:$0xff] }
 0x49a   : > { %2222 = vmatprep.subr.mxu0 %v1944_v45  ;;  %2435 = vmatprep.subr.mxu1 %v2090_v21  ;;  %v2029_v45 = vld [vmem:[%s8619_s5 + $0x680] sm:$0xff]  ;;  %v2028_v21 = vld [vmem:[%s8619_s5 + $0x678] sm:$0xff] }
 0x49b   : > { %2223 = vmatpush2.msra.mxu0 %v1943_v15  ;;  %2436 = vmatpush1.msra.mxu1 %v2089_v9  ;;  %v2027_v15 = vld [vmem:[%s8619_s5 + $0x670] sm:$0xff]  ;;  %v2026_v9 = vld [vmem:[%s8619_s5 + $0x668] sm:$0xff] }
 0x49c   : > { %2224 = vmatprep.subr.mxu0 %v1942_v42  ;;  %2437 = vmatprep.subr.mxu1 %v2088_v47  ;;  %v2025_v42 = vld [vmem:[%s8619_s5 + $0x660] sm:$0xff]  ;;  %v2024_v47 = vld [vmem:[%s8619_s5 + $0x658] sm:$0xff] }
 0x49d   : > { %2225 = vmatpush2.msra.mxu0 %v1941_v40  ;;  %2438 = vmatpush1.msra.mxu1 %v2087_v49  ;;  %v2023_v40 = vld [vmem:[%s8619_s5 + $0x650] sm:$0xff]  ;;  %v2022_v49 = vld [vmem:[%s8619_s5 + $0x648] sm:$0xff] }
 0x49e   : > { %2226 = vmatprep.subr.mxu0 %v1940_v38  ;;  %2439 = vmatprep.subr.mxu1 %v2086_v52  ;;  %v2021_v38 = vld [vmem:[%s8619_s5 + $0x640] sm:$0xff]  ;;  %v2020_v52 = vld [vmem:[%s8619_s5 + $0x638] sm:$0xff] }
 0x49f   : > { %2227 = vmatpush2.msra.mxu0 %v1939_v53  ;;  %2440 = vmatpush1.msra.mxu1 %v2085_v36  ;;  %v2019_v53 = vld [vmem:[%s8619_s5 + $0x630] sm:$0xff]  ;;  %v2018_v36 = vld [vmem:[%s8619_s5 + $0x628] sm:$0xff] }
 0x4a0   : > { %2228 = vmatprep.subr.mxu0 %v1938_v54  ;;  %2441 = vmatprep.subr.mxu1 %v2084_v34  ;;  %v2017_v54 = vld [vmem:[%s8619_s5 + $0x620] sm:$0xff]  ;;  %v2016_v34 = vld [vmem:[%s8619_s5 + $0x618] sm:$0xff] }
 0x4a1   : > { %2229 = vmatpush2.msra.mxu0 %v1937_v55  ;;  %2442 = vmatpush1.msra.mxu1 %v2083_v56  ;;  %v2015_v55 = vld [vmem:[%s8619_s5 + $0x610] sm:$0xff]  ;;  %v2014_v56 = vld [vmem:[%s8619_s5 + $0x608] sm:$0xff] }
 0x4a2   : > { %2230 = vmatprep.subr.mxu0 %v1936_v58  ;;  %2443 = vmatprep.subr.mxu1 %v2082_v59  ;;  %v2076_v58 = vld [vmem:[%s8619_s5 + $0x7f8] sm:$0xff]  ;;  %v2075_v59 = vld [vmem:[%s8619_s5 + $0x7f0] sm:$0xff] }
 0x4a3   : > { %2231 = vmatpush2.msra.mxu0 %v1935_v60  ;;  %2444 = vmatpush1.msra.mxu1 %v2081_v61  ;;  %v2074_v60 = vld [vmem:[%s8619_s5 + $0x7e8] sm:$0xff]  ;;  %v2073_v61 = vld [vmem:[%s8619_s5 + $0x7e0] sm:$0xff] }
 0x4a4   : > { %2232 = vmatprep.subr.mxu0 %v1934_v62  ;;  %2445 = vmatprep.subr.mxu1 %v2080_v3  ;;  %v2072_v62 = vld [vmem:[%s8619_s5 + $0x7d8] sm:$0xff]  ;;  %v2071_v3 = vld [vmem:[%s8619_s5 + $0x7d0] sm:$0xff] }
 0x4a5   : > { %2233 = vmatpush2.msra.mxu0 %v1933_v4  ;;  %2446 = vmatpush1.msra.mxu1 %v2079_v7  ;;  %v2070_v4 = vld [vmem:[%s8619_s5 + $0x7c8] sm:$0xff]  ;;  %v2068_v7 = vld [vmem:[%s8619_s5 + $0x7b8] sm:$0xff] }
 0x4a6   : > { %2234 = vmatprep.subr.mxu0 %v1932_v8  ;;  %2447 = vmatprep.subr.mxu1 %v2078_v10  ;;  %v2067_v8 = vld [vmem:[%s8619_s5 + $0x7b0] sm:$0xff]  ;;  %v2066_v10 = vld [vmem:[%s8619_s5 + $0x7a8] sm:$0xff] }
 0x4a7   : > { %2235 = vmatpush2.msra.mxu0 %v1931_v11  ;;  %2448 = vmatpush1.msra.mxu1 %v2077_v12  ;;  %v2065_v11 = vld [vmem:[%s8619_s5 + $0x7a0] sm:$0xff]  ;;  %v2064_v12 = vld [vmem:[%s8619_s5 + $0x798] sm:$0xff] }
 0x4a8   : > { %2236 = vmatprep.subr.mxu0 %v1930_v13  ;;  %2481 = vmatprep.mubr.f32.mxu1 %v4655_v1  ;;  %v2063_v13 = vld [vmem:[%s8619_s5 + $0x790] sm:$0xff] }
 0x4a9   : > { %2237 = vmatpush2.msra.mxu0 %v1929_v16  ;;  %2482 = vmatmul.mubr.f32.vlgmr.msra.gmra.mxu1 %v1812_v17  ;;  %v2062_v16 = vld [vmem:[%s8619_s5 + $0x788] sm:$0xff]  ;;  %v2061_v17 = vld [vmem:[%s8619_s5 + $0x780] sm:$0xff] }
 0x4aa   : > { %2238 = vmatprep.subr.mxu0 %v1928_v18  ;;  %2487 = vmatprep.mubr.f32.mxu1 %v4655_v1  ;;  %v2060_v18 = vld [vmem:[%s8619_s5 + $0x778] sm:$0xff] }
 0x4ab   : > { %2239 = vmatpush2.msra.mxu0 %v1927_v19  ;;  %v2059_v19 = vld [vmem:[%s8619_s5 + $0x770] sm:$0xff] }
 0x4ac   : > { %2240 = vmatprep.subr.mxu0 %v1926_v22  ;;  %v2058_v22 = vld [vmem:[%s8619_s5 + $0x768] sm:$0xff] }
 0x4ad   : > { %2241 = vmatpush2.msra.mxu0 %v1925_v23  ;;  %2488 = vmatmul.mubr.f32.gmra.mxu1 %v4456_v6  ;;  %v2069_v6 = vld [vmem:[%s8619_s5 + $0x7c0] sm:$0xff] }
 0x4ae   : > { %2242 = vmatprep.subr.mxu0 %v1924_v25  ;;  %v2057_v23 = vld [vmem:[%s8619_s5 + $0x760] sm:$0xff]  ;;  %v2056_v25 = vld [vmem:[%s8619_s5 + $0x758] sm:$0xff] }
 0x4af   : > { %2243 = vmatpush2.msra.mxu0 %v1923_v26  ;;  %v2055_v26 = vld [vmem:[%s8619_s5 + $0x750] sm:$0xff] }
 0x4b0   : > { %2244 = vmatprep.subr.mxu0 %v1922_v28  ;;  %v2054_v28 = vld [vmem:[%s8619_s5 + $0x748] sm:$0xff] }
 0x4b1   : > { %2245 = vmatpush2.msra.mxu0 %v1921_v29  ;;  %v2053_v29 = vld [vmem:[%s8619_s5 + $0x740] sm:$0xff] }
 0x4b2   : > { %2246 = vmatprep.subr.mxu0 %v1920_v30  ;;  %v2052_v30 = vld [vmem:[%s8619_s5 + $0x738] sm:$0xff] }
 0x4b3   : > { %2247 = vmatpush2.msra.mxu0 %v1919_v32  ;;  %v2051_v32 = vld [vmem:[%s8619_s5 + $0x730] sm:$0xff] }
 0x4b4   : > { %2248 = vmatprep.subr.mxu0 %v1918_v35  ;;  %v2050_v35 = vld [vmem:[%s8619_s5 + $0x728] sm:$0xff] }
 0x4b5   : > { %2249 = vmatpush2.msra.mxu0 %v1917_v37  ;;  %v2049_v37 = vld [vmem:[%s8619_s5 + $0x720] sm:$0xff] }
 0x4b6   : > { %2340 = vmatprep.subr.mxu0 %v2044_v2  ;;  %2251 = vmatmul.mubr.f32.vlgmr.msra.gmra.mxu0 %v6096_v48  ;;  %v2038_v48 = vld [vmem:[%s8619_s5 + $0x6c8] sm:$0xff]  ;;  %v2048_v2 = vld [vmem:[%s8619_s5 + $0x718] sm:$0xff] }
 0x4b7   : > { %2341 = vmatpush1.msra.mxu0 %v2043_v63  ;;  %2256 = vmatprep.mubr.f32.mxu0 %v6104_v50  ;;  %v2036_v50 = vld [vmem:[%s8619_s5 + $0x6b8] sm:$0xff]  ;;  %v2047_v63 = vld [vmem:[%s8619_s5 + $0x710] sm:$0xff] }
 0x4b8   : > { %2342 = vmatprep.subr.mxu0 %v2042_v0  ;;  %v2046_v0 = vld [vmem:[%s8619_s5 + $0x708] sm:$0xff] }
 0x4b9   : > { %2343 = vmatpush1.msra.mxu0 %v2041_v39  ;;  %v2045_v39 = vld [vmem:[%s8619_s5 + $0x700] sm:$0xff] }
 0x4ba   : > { %2344 = vmatprep.subr.mxu0 %v2040_v24  ;;  %2257 = vmatmul.mubr.f32.gmra.mxu0 %v6088_v46  ;;  %v2033_v46 = vld [vmem:[%s8619_s5 + $0x6a0] sm:$0xff]  ;;  %v2694_v24 = vld [vmem:[%s8580_s9 + $0xf8] sm:$0xff] }
 0x4bb   : > { %2345 = vmatpush1.msra.mxu0 %v2039_v20  ;;  %2404 = vmatprep.mubr.f32.mxu0 %v6295_v57  ;;  %v2013_v57 = vld [vmem:[%s8619_s5 + $0x600] sm:$0xff]  ;;  %v2693_v20 = vld [vmem:[%s8580_s9 + $0xf0] sm:$0xff]  ;;  %s4657_s5 = smov [#allocation2]  }
 0x4bc   : > { %2346 = vmatprep.subr.mxu0 %v2038_v48  ;;  %2951 = vmatprep.subr.mxu1 %v2694_v24  ;;  %v2689_v48 = vld [vmem:[%s8580_s9 + $0xd0] sm:$0xff]  ;;  %s4597_s28 = sshll.u32 %s4657_s5, 4  ;;  %s4598_s28 = int_to_ptr.vmem [resolvable:$false] %s4597_s28 }
 0x4bd   : > { %2347 = vmatpush1.msra.mxu0 %v2037_v14  ;;  %2952 = vmatpush1.msra.mxu1 %v2693_v20  ;;  %v2688_v14 = vld [vmem:[%s8580_s9 + $0xc8] sm:$0xff]  ;;  %s4599_s1 = scalar_lea.vmem %s4598_s28, 32  ;;  %p4600_p0 = scmp.lt.s32.totalorder %s4243_s27, %s4598_s28 }
 0x4be   : > { %2348 = vmatprep.subr.mxu0 %v2036_v50  ;;  %v2687_v50 = vld [vmem:[%s8580_s9 + $0xc0] sm:$0xff]  ;;  %p4601_p1 = scmp.lt.s32.totalorder %s4599_s1, %s4593_s4 }
 0x4bf   : > { %2349 = vmatpush1.msra.mxu0 %v2035_v41  ;;  %v2686_v41 = vld [vmem:[%s8580_s9 + $0xb8] sm:$0xff] }
 0x4c0   : > { %2350 = vmatprep.subr.mxu0 %v2034_v5  ;;  %v2685_v5 = vld [vmem:[%s8580_s9 + $0xb0] sm:$0xff]  ;;  %p4602_p2 = por %p4601_p1, %p4600_p0 }
 0x4c1   : > { %2351 = vmatpush1.msra.mxu0 %v2033_v46  ;;  %v2684_v46 = vld [vmem:[%s8580_s9 + $0xa8] sm:$0xff] }
 0x4c2   : > { %2352 = vmatprep.subr.mxu0 %v2032_v33  ;;  %v2683_v33 = vld [vmem:[%s8580_s9 + $0xa0] sm:$0xff]  ;;  %p4603_p3 = pnand %p4602_p2, %p4596_p13 }
 0x4c3   : > { %2353 = vmatpush1.msra.mxu0 %v2031_v43  ;;  %v2682_v43 = vld [vmem:[%s8580_s9 + $0x98] sm:$0xff] }
 0x4c4   : > { %2354 = vmatprep.subr.mxu0 %v2030_v27  ;;  %v2681_v27 = vld [vmem:[%s8580_s9 + $0x90] sm:$0xff] }
 0x4c5   : > { %2355 = vmatpush1.msra.mxu0 %v2029_v45  ;;  %v2680_v45 = vld [vmem:[%s8580_s9 + $0x88] sm:$0xff] }
 0x4c6   : > { %2356 = vmatprep.subr.mxu0 %v2028_v21  ;;  %v2679_v21 = vld [vmem:[%s8580_s9 + $0x80] sm:$0xff] }
 0x4c7   : > { %2357 = vmatpush1.msra.mxu0 %v2027_v15  ;;  %v2678_v15 = vld [vmem:[%s8580_s9 + $0x78] sm:$0xff] }
 0x4c8   : > { %2358 = vmatprep.subr.mxu0 %v2026_v9  ;;  %v2677_v9 = vld [vmem:[%s8580_s9 + $0x70] sm:$0xff] }
 0x4c9   : > { %2359 = vmatpush1.msra.mxu0 %v2025_v42  ;;  %v2676_v42 = vld [vmem:[%s8580_s9 + $0x68] sm:$0xff] }
 0x4ca   : > { %2360 = vmatprep.subr.mxu0 %v2024_v47  ;;  %v2675_v47 = vld [vmem:[%s8580_s9 + $0x60] sm:$0xff] }
 0x4cb   : > { %2361 = vmatpush1.msra.mxu0 %v2023_v40  ;;  %v2674_v40 = vld [vmem:[%s8580_s9 + $0x58] sm:$0xff] }
 0x4cc   : > { %2362 = vmatprep.subr.mxu0 %v2022_v49  ;;  %v2673_v49 = vld [vmem:[%s8580_s9 + $0x50] sm:$0xff] }
 0x4cd   : > { %2363 = vmatpush1.msra.mxu0 %v2021_v38  ;;  %v2672_v38 = vld [vmem:[%s8580_s9 + $0x48] sm:$0xff] }
 0x4ce   : > { %2364 = vmatprep.subr.mxu0 %v2020_v52  ;;  %v2671_v52 = vld [vmem:[%s8580_s9 + $0x40] sm:$0xff] }
 0x4cf   : > { %2365 = vmatpush1.msra.mxu0 %v2019_v53  ;;  %v2670_v53 = vld [vmem:[%s8580_s9 + $0x38] sm:$0xff] }
 0x4d0   : > { %2366 = vmatprep.subr.mxu0 %v2018_v36  ;;  %v2669_v36 = vld [vmem:[%s8580_s9 + $0x30] sm:$0xff] }
 0x4d1   : > { %2367 = vmatpush1.msra.mxu0 %v2017_v54  ;;  %v2668_v54 = vld [vmem:[%s8580_s9 + $0x28] sm:$0xff] }
 0x4d2   : > { %2368 = vmatprep.subr.mxu0 %v2016_v34  ;;  %v2667_v34 = vld [vmem:[%s8580_s9 + $0x20] sm:$0xff] }
 0x4d3   : > { %2369 = vmatpush1.msra.mxu0 %v2015_v55  ;;  %v2666_v55 = vld [vmem:[%s8580_s9 + $0x18] sm:$0xff] }
 0x4d4   : > { %2370 = vmatprep.subr.mxu0 %v2014_v56  ;;  %v2665_v56 = vld [vmem:[%s8580_s9 + $0x10] sm:$0xff] }
 0x4d5   : > { %2371 = vmatpush1.msra.mxu0 %v2013_v57  ;;  %v2664_v57 = vld [vmem:[%s8580_s9 + $0x8] sm:$0xff] }
 0x4d6   : > { %2372 = vmatprep.subr.mxu0 %v2076_v58  ;;  %v2663_v58 = vld [vmem:[%s8580_s9] sm:$0xff] }
 0x4d7   : > { %2373 = vmatpush2.msra.mxu0 %v2075_v59  ;;  %v2726_v59 = vld [vmem:[%s8580_s9 + $0x1f8] sm:$0xff] }
 0x4d8   : > { %2374 = vmatprep.subr.mxu0 %v2074_v60  ;;  %v2725_v60 = vld [vmem:[%s8580_s9 + $0x1f0] sm:$0xff] }
 0x4d9   : > { %2375 = vmatpush2.msra.mxu0 %v2073_v61  ;;  %v2724_v61 = vld [vmem:[%s8580_s9 + $0x1e8] sm:$0xff] }
 0x4da   : > { %2376 = vmatprep.subr.mxu0 %v2072_v62  ;;  %v2723_v62 = vld [vmem:[%s8580_s9 + $0x1e0] sm:$0xff] }
 0x4db   : > { %2377 = vmatpush2.msra.mxu0 %v2071_v3  ;;  %v2722_v3 = vld [vmem:[%s8580_s9 + $0x1d8] sm:$0xff] }
 0x4dc   : > { %2378 = vmatprep.subr.mxu0 %v2070_v4  ;;  %v2721_v4 = vld [vmem:[%s8580_s9 + $0x1d0] sm:$0xff] }
 0x4dd   : > { %2379 = vmatpush2.msra.mxu0 %v2069_v6  ;;  %v2720_v6 = vld [vmem:[%s8580_s9 + $0x1c8] sm:$0xff] }
 0x4de   : > { %2380 = vmatprep.subr.mxu0 %v2068_v7  ;;  %v2719_v7 = vld [vmem:[%s8580_s9 + $0x1c0] sm:$0xff] }
 0x4df   : > { %2381 = vmatpush2.msra.mxu0 %v2067_v8  ;;  %v2718_v8 = vld [vmem:[%s8580_s9 + $0x1b8] sm:$0xff] }
 0x4e0   : > { %2382 = vmatprep.subr.mxu0 %v2066_v10  ;;  %v2717_v10 = vld [vmem:[%s8580_s9 + $0x1b0] sm:$0xff] }
 0x4e1   : > { %2383 = vmatpush2.msra.mxu0 %v2065_v11  ;;  %v2716_v11 = vld [vmem:[%s8580_s9 + $0x1a8] sm:$0xff] }
 0x4e2   : > { %2384 = vmatprep.subr.mxu0 %v2064_v12  ;;  %v2715_v12 = vld [vmem:[%s8580_s9 + $0x1a0] sm:$0xff] }
 0x4e3   : > { %2385 = vmatpush2.msra.mxu0 %v2063_v13  ;;  %v2714_v13 = vld [vmem:[%s8580_s9 + $0x198] sm:$0xff] }
 0x4e4   : > { %2386 = vmatprep.subr.mxu0 %v2062_v16  ;;  %v2713_v16 = vld [vmem:[%s8580_s9 + $0x190] sm:$0xff] }
 0x4e5   : > { %2387 = vmatpush2.msra.mxu0 %v2061_v17  ;;  %v2712_v17 = vld [vmem:[%s8580_s9 + $0x188] sm:$0xff] }
 0x4e6   : > { %2388 = vmatprep.subr.mxu0 %v2060_v18  ;;  %v2711_v18 = vld [vmem:[%s8580_s9 + $0x180] sm:$0xff] }
 0x4e7   : > { %2389 = vmatpush2.msra.mxu0 %v2059_v19  ;;  %v2710_v19 = vld [vmem:[%s8580_s9 + $0x178] sm:$0xff] }
 0x4e8   : > { %2390 = vmatprep.subr.mxu0 %v2058_v22  ;;  %v2709_v22 = vld [vmem:[%s8580_s9 + $0x170] sm:$0xff] }
 0x4e9   : > { %2391 = vmatpush2.msra.mxu0 %v2057_v23  ;;  %v2708_v23 = vld [vmem:[%s8580_s9 + $0x168] sm:$0xff] }
 0x4ea   : > { %2392 = vmatprep.subr.mxu0 %v2056_v25  ;;  %v2707_v25 = vld [vmem:[%s8580_s9 + $0x160] sm:$0xff] }
 0x4eb   : > { %2393 = vmatpush2.msra.mxu0 %v2055_v26 }
 0x4ec   : > { %2394 = vmatprep.subr.mxu0 %v2054_v28  ;;  %v2706_v28 = vld [vmem:[%s8580_s9 + $0x158] sm:$0xff] }
 0x4ed   : > { %2395 = vmatpush2.msra.mxu0 %v2053_v29  ;;  %v2705_v29 = vld [vmem:[%s8580_s9 + $0x150] sm:$0xff] }
 0x4ee   : > { %2396 = vmatprep.subr.mxu0 %v2052_v30  ;;  %v2704_v30 = vld [vmem:[%s8580_s9 + $0x148] sm:$0xff] }
 0x4ef   : > { %2397 = vmatpush2.msra.mxu0 %v2051_v32  ;;  %v2703_v32 = vld [vmem:[%s8580_s9 + $0x140] sm:$0xff] }
 0x4f0   : > { %2398 = vmatprep.subr.mxu0 %v2050_v35 }
 0x4f1   : > { %2399 = vmatpush2.msra.mxu0 %v2049_v37  ;;  %v2702_v37 = vld [vmem:[%s8580_s9 + $0x138] sm:$0xff] }
 0x4f2   : > { %2400 = vmatprep.subr.mxu0 %v2048_v2  ;;  %v2701_v2 = vld [vmem:[%s8580_s9 + $0x130] sm:$0xff] }
 0x4f3   : > { %2401 = vmatpush2.msra.mxu0 %v2047_v63  ;;  %v2700_v63 = vld [vmem:[%s8580_s9 + $0x128] sm:$0xff] }
 0x4f4   : > { %2402 = vmatprep.subr.mxu0 %v2046_v0 }
 0x4f5   : > { %2403 = vmatpush2.msra.mxu0 %v2045_v39 }
 0x4f6   : > { %2405 = vmatmul.mubr.f32.vlgmr.msra.gmra.mxu0 %v6243_v44  ;;  %4457 = vmatprep.subr.mxu0 %v4655_v1  ;;  %v2692_v44 = vld [vmem:[%s8580_s9 + $0xe8] sm:$0xff] }
 0x4f7   : > { %2410 = vmatprep.mubr.f32.mxu0 %v6269_v51  ;;  %v2690_v51 = vld [vmem:[%s8580_s9 + $0xd8] sm:$0xff]  ;;  %2953 = vmatprep.subr.mxu1 %v2692_v44 }
 0x4fa   : > { %2411 = vmatmul.mubr.f32.gmra.mxu0 %v6217_v31  ;;  %v2691_v31 = vld [vmem:[%s8580_s9 + $0xe0] sm:$0xff] }
 0x4fb   : > { %4461 = vmatprep.mubr.msk.f32.mxu0 %vm4656_vm1, %v4655_v1  ;;  %2954 = vmatpush1.msra.mxu1 %v2691_v31 }
 0x4fc   : > { %2955 = vmatprep.subr.mxu1 %v2690_v51 }
 0x4fd   : > { %2956 = vmatpush1.msra.mxu1 %v2689_v48 }
 0x4fe   : > { %2957 = vmatprep.subr.mxu1 %v2688_v14 }
 0x4ff   : > { %2958 = vmatpush1.msra.mxu1 %v2687_v50 }
 0x500   : > { %2959 = vmatprep.subr.mxu1 %v2686_v41 }
 0x501   : > { %2960 = vmatpush1.msra.mxu1 %v2685_v5 }
 0x502   : > { %2961 = vmatprep.subr.mxu1 %v2684_v46 }
 0x503   : > { %2962 = vmatpush1.msra.mxu1 %v2683_v33 }
 0x504   : > { %2963 = vmatprep.subr.mxu1 %v2682_v43 }
 0x505   : > { %2964 = vmatpush1.msra.mxu1 %v2681_v27 }
 0x506   : > { %2965 = vmatprep.subr.mxu1 %v2680_v45 }
 0x507   : > { %2966 = vmatpush1.msra.mxu1 %v2679_v21 }
 0x508   : > { %2967 = vmatprep.subr.mxu1 %v2678_v15 }
 0x509   : > { %2968 = vmatpush1.msra.mxu1 %v2677_v9 }
 0x50a   : > { %2969 = vmatprep.subr.mxu1 %v2676_v42 }
 0x50b   : > { %2970 = vmatpush1.msra.mxu1 %v2675_v47 }
 0x50c   : > { %2971 = vmatprep.subr.mxu1 %v2674_v40 }
 0x50d   : > { %2972 = vmatpush1.msra.mxu1 %v2673_v49 }
 0x50e   : > { %2973 = vmatprep.subr.mxu1 %v2672_v38  ;;  %v4322_v38 = vld [vmem:[%s8577_s6] ss:$0 sm:$0xff] }
 0x50f   : > { %2974 = vmatpush1.msra.mxu1 %v2671_v52 }
 0x510   : > { %2975 = vmatprep.subr.mxu1 %v2670_v53 }
 0x511   : > { %2976 = vmatpush1.msra.mxu1 %v2669_v36 }
 0x512   : > { %2977 = vmatprep.subr.mxu1 %v2668_v54 }
 0x513   : > { %2978 = vmatpush1.msra.mxu1 %v2667_v34 }
 0x514   : > { %2979 = vmatprep.subr.mxu1 %v2666_v55 }
 0x515   : > { %2980 = vmatpush1.msra.mxu1 %v2665_v56 }
 0x516   : > { %2981 = vmatprep.subr.mxu1 %v2664_v57 }
 0x517   : > { %2982 = vmatpush1.msra.mxu1 %v2663_v58 }
 0x518   : > { %2983 = vmatprep.subr.mxu1 %v2726_v59  ;;  %v4323_v59 = vld [vmem:[%s8578_s7] ss:$0 sm:$0xff] }
 0x519   : > { %2984 = vmatpush2.msra.mxu1 %v2725_v60 }
 0x51a   : > { %2985 = vmatprep.subr.mxu1 %v2724_v61 }
 0x51b   : > { %2986 = vmatpush2.msra.mxu1 %v2723_v62 }
 0x51c   : > { %2987 = vmatprep.subr.mxu1 %v2722_v3 }
 0x51d   : > { %2988 = vmatpush2.msra.mxu1 %v2721_v4 }
 0x51e   : > { %2989 = vmatprep.subr.mxu1 %v2720_v6 }
 0x51f   : > { %2990 = vmatpush2.msra.mxu1 %v2719_v7 }
 0x520   : > { %2991 = vmatprep.subr.mxu1 %v2718_v8 }
 0x521   : > { %2992 = vmatpush2.msra.mxu1 %v2717_v10 }
 0x522   : > { %2993 = vmatprep.subr.mxu1 %v2716_v11  ;;  %v2516_v11 = vld [vmem:[%s8579_s8] sm:$0xff] }
 0x523   : > { %2994 = vmatpush2.msra.mxu1 %v2715_v12  ;;  %v2758_v12 = vld [vmem:[%s8580_s9 + $0x2f8] sm:$0xff] }
 0x524   : > { %2995 = vmatprep.subr.mxu1 %v2714_v13  ;;  %v2757_v13 = vld [vmem:[%s8580_s9 + $0x2f0] sm:$0xff] }
 0x525   : > { %2996 = vmatpush2.msra.mxu1 %v2713_v16  ;;  %v2756_v16 = vld [vmem:[%s8580_s9 + $0x2e8] sm:$0xff] }
 0x526   : > { %2997 = vmatprep.subr.mxu1 %v2712_v17  ;;  %v2755_v17 = vld [vmem:[%s8580_s9 + $0x2e0] sm:$0xff] }
 0x527   : > { %2998 = vmatpush2.msra.mxu1 %v2711_v18  ;;  %v2517_v18 = vld [vmem:[%s8579_s8 + $0x8] sm:$0xff] }
 0x528   : > { %2999 = vmatprep.subr.mxu1 %v2710_v19  ;;  %v2754_v19 = vld [vmem:[%s8580_s9 + $0x2d8] sm:$0xff] }
 0x529   : > { %3000 = vmatpush2.msra.mxu1 %v2709_v22  ;;  %v2753_v22 = vld [vmem:[%s8580_s9 + $0x2d0] sm:$0xff] }
 0x52a   : > { %3001 = vmatprep.subr.mxu1 %v2708_v23  ;;  %v2752_v23 = vld [vmem:[%s8580_s9 + $0x2c8] sm:$0xff] }
 0x52b   : > { %3002 = vmatpush2.msra.mxu1 %v2707_v25  ;;  %v2751_v25 = vld [vmem:[%s8580_s9 + $0x2c0] sm:$0xff] }
 0x52c   : > { %3003 = vmatprep.subr.mxu1 %v2706_v28  ;;  %v2750_v28 = vld [vmem:[%s8580_s9 + $0x2b8] sm:$0xff] }
 0x52d   : > { %3004 = vmatpush2.msra.mxu1 %v2705_v29  ;;  %v2749_v29 = vld [vmem:[%s8580_s9 + $0x2b0] sm:$0xff] }
 0x52e   : > { %3005 = vmatprep.subr.mxu1 %v2704_v30  ;;  %v2748_v30 = vld [vmem:[%s8580_s9 + $0x2a8] sm:$0xff] }
 0x52f   : > { %3006 = vmatpush2.msra.mxu1 %v2703_v32  ;;  %v2747_v32 = vld [vmem:[%s8580_s9 + $0x2a0] sm:$0xff] }
 0x530   : > { %3007 = vmatprep.subr.mxu1 %v2702_v37  ;;  %v2746_v37 = vld [vmem:[%s8580_s9 + $0x298] sm:$0xff] }
 0x531   : > { %3008 = vmatpush2.msra.mxu1 %v2701_v2  ;;  %v2745_v2 = vld [vmem:[%s8580_s9 + $0x290] sm:$0xff] }
 0x532   : > { %3009 = vmatprep.subr.mxu1 %v2700_v63  ;;  %v2744_v63 = vld [vmem:[%s8580_s9 + $0x288] sm:$0xff] }
 0x536   : > { %v2175_v26 = vpop.f32.mrf.mxu0 }
 0x538   : > { %v2177_v35 = vpop.f32.mrf.mxu0 }
 0x53a   : > { %v2181_v0 = vpop.f32.mrf.mxu0 }
 0x53c   : > { %v2183_v24 = vpop.f32.mrf.mxu0 }
 0x546   : > { %v2329_v39 = vpop.f32.mrf.mxu1 }
 0x548   : > { %v2331_v44 = vpop.f32.mrf.mxu1 }
 0x54b   : > { %v2335_v51 = vpop.f32.mrf.mxu1 }
 0x54d   : > { %v2337_v14 = vpop.f32.mrf.mxu1 }
 0x569   : > { %v2483_v41 = vpop.f32.mrf.mxu1 }
 0x56b   : > { %v2485_v45 = vpop.f32.mrf.mxu1 }
 0x56d   : > { %v2489_v53 = vpop.f32.mrf.mxu1 }
 0x56f   : > { %v2491_v60 = vpop.f32.mrf.mxu1 }
 0x576   : > { %v2252_v20 = vpop.f32.mrf.mxu0 }
 0x577   : > { %v2253_v50 = vadd.f32 %v2252_v20, %v2175_v26  ;;  %v2518_v26 = vld [vmem:[%s8579_s8 + $0x10] sm:$0xff] }
 0x578   : > { %v2254_v31 = vpop.f32.mrf.mxu0  ;;  %v2741_v20 = vld [vmem:[%s8580_s9 + $0x270] sm:$0xff] }
 0x579   : > { %v2255_v5 = vadd.f32 %v2254_v31, %v2177_v35  ;;  %v2330_v33 = vadd.f32 %v2329_v39, %v2253_v50  ;;  %v2519_v35 = vld [vmem:[%s8579_s8 + $0x18] sm:$0xff]  ;;  %v2520_v39 = vld [vmem:[%s8579_s8 + $0x20] sm:$0xff]  ;;  %v2736_v50 = vld [vmem:[%s8580_s9 + $0x248] sm:$0xff] }
 0x57a   : > { %v2258_v48 = vpop.f32.mrf.mxu0  ;;  %v2739_v31 = vld [vmem:[%s8580_s9 + $0x260] sm:$0xff] }
 0x57b   : > { %v2259_v43 = vadd.f32 %v2258_v48, %v2181_v0  ;;  %v2332_v21 = vadd.f32 %v2331_v44, %v2255_v5  ;;  %v2743_v0 = vld [vmem:[%s8580_s9 + $0x280] sm:$0xff]  ;;  %v2740_v44 = vld [vmem:[%s8580_s9 + $0x268] sm:$0xff]  ;;  %v2738_v48 = vld [vmem:[%s8580_s9 + $0x258] sm:$0xff] }
 0x57c   : > { %v2260_v46 = vpop.f32.mrf.mxu0  ;;  %v2522_v5 = vld [vmem:[%s8579_s8 + $0x30] sm:$0xff] }
 0x57d   : > { %v2261_v15 = vadd.f32 %v2260_v46, %v2183_v24  ;;  %v2336_v47 = vadd.f32 %v2335_v51, %v2259_v43  ;;  %v2742_v24 = vld [vmem:[%s8580_s9 + $0x278] sm:$0xff]  ;;  %v2521_v51 = vld [vmem:[%s8579_s8 + $0x28] sm:$0xff] }
 0x57e   : > { %v2734_v46 = vld [vmem:[%s8580_s9 + $0x238] sm:$0xff]  ;;  %v2732_v43 = vld [vmem:[%s8580_s9 + $0x228] sm:$0xff] }
 0x57f   : > { %v2338_v36 = vadd.f32 %v2337_v14, %v2261_v15  ;;  %v2737_v14 = vld [vmem:[%s8580_s9 + $0x250] sm:$0xff]  ;;  %v2524_v15 = vld [vmem:[%s8579_s8 + $0x40] sm:$0xff] }
 0x5b6   : > { %v2406_v27 = vpop.f32.mrf.mxu0 }
 0x5b7   : > { %v2407_v9 = vadd.f32 %v2406_v27, %v2330_v33  ;;  %v2733_v33 = vld [vmem:[%s8580_s9 + $0x230] sm:$0xff]  ;;  %v2731_v27 = vld [vmem:[%s8580_s9 + $0x220] sm:$0xff] }
 0x5b8   : > { %v2408_v42 = vpop.f32.mrf.mxu0 }
 0x5b9   : > { %v2409_v40 = vadd.f32 %v2408_v42, %v2332_v21  ;;  %v2484_v49 = vadd.f32 %v2483_v41, %v2407_v9  ;;  %v2735_v41 = vld [vmem:[%s8580_s9 + $0x240] sm:$0xff]  ;;  %v2730_v21 = vld [vmem:[%s8580_s9 + $0x218] sm:$0xff]  ;;  %v2729_v9 = vld [vmem:[%s8580_s9 + $0x210] sm:$0xff] }
 0x5ba   : > { %v2412_v52 = vpop.f32.mrf.mxu0  ;;  %v2728_v42 = vld [vmem:[%s8580_s9 + $0x208] sm:$0xff] }
 0x5bb   : > { %v2413_v54 = vadd.f32 %v2412_v52, %v2336_v47  ;;  %v2501_v55 = vadd.f32 %v4322_v38, %v2484_v49  ;;  %v2486_v56 = vadd.f32 %v2485_v45, %v2409_v40  ;;  %v2523_v45 = vld [vmem:[%s8579_s8 + $0x38] sm:$0xff]  ;;  %v2727_v47 = vld [vmem:[%s8580_s9 + $0x200] sm:$0xff]  ;;  %v2789_v49 = vld [vmem:[%s8580_s9 + $0x3f0] sm:$0xff] }
 0x5bc   : > { %v2414_v34 = vpop.f32.mrf.mxu0  ;;  %v2790_v40 = vld [vmem:[%s8580_s9 + $0x3f8] sm:$0xff]  ;;  %v2787_v52 = vld [vmem:[%s8580_s9 + $0x3e0] sm:$0xff] }
 0x5bd   : > { %v2415_v57 = vadd.f32 %v2414_v34, %v2338_v36  ;;  %v2490_v58 = vadd.f32 %v2489_v53, %v2413_v54  ;;  %v2503_v3 = vmax.f32 %v2501_v55, 0.0  ;;  %v2512_v4 = vadd.f32 %v4323_v59, %v2486_v56  ;;  %v2786_v53 = vld [vmem:[%s8580_s9 + $0x3d8] sm:$0xff]  ;;  %v2785_v36 = vld [vmem:[%s8580_s9 + $0x3d0] sm:$0xff]  ;;  %v2784_v54 = vld [vmem:[%s8580_s9 + $0x3c8] sm:$0xff] }
 0x5be   : > { %v2783_v34 = vld [vmem:[%s8580_s9 + $0x3c0] sm:$0xff]  ;;  %v2782_v55 = vld [vmem:[%s8580_s9 + $0x3b8] sm:$0xff]  ;;  %v2781_v56 = vld [vmem:[%s8580_s9 + $0x3b0] sm:$0xff] }
 0x5bf   : > { %v2502_v61 = vadd.f32 %v4322_v38, %v2490_v58  ;;  %v2492_v62 = vadd.f32 %v2491_v60, %v2415_v57  ;;  %v2514_v10 = vadd.f32 %v2512_v4, %v2503_v3  ;;  %v2788_v38 = vld [vmem:[%s8580_s9 + $0x3e8] sm:$0xff]  ;;  %v2779_v58 = vld [vmem:[%s8580_s9 + $0x3a0] sm:$0xff]  ;;  %v2777_v60 = vld [vmem:[%s8580_s9 + $0x390] sm:$0xff] }
 0x5c0   : > { %v2780_v57 = vld [vmem:[%s8580_s9 + $0x3a8] sm:$0xff]  ;;  %v2774_v3 = vld [vmem:[%s8580_s9 + $0x378] sm:$0xff]  ;;  %v2773_v4 = vld [vmem:[%s8580_s9 + $0x370] sm:$0xff] }
 0x5c1   : > { %v2504_v6 = vmax.f32 %v2502_v61, 0.0  ;;  %v2513_v7 = vadd.f32 %v4323_v59, %v2492_v62  ;;  %v2778_v59 = vld [vmem:[%s8580_s9 + $0x398] sm:$0xff]  ;;  %v2776_v61 = vld [vmem:[%s8580_s9 + $0x388] sm:$0xff]  ;;  %v2775_v62 = vld [vmem:[%s8580_s9 + $0x380] sm:$0xff] }
 0x5c3   : > { %v2515_v8 = vadd.f32 %v2513_v7, %v2504_v6  ;;  %v2699_v6 = vld [vmem:[%s8580_s9 + $0x120] sm:$0xff]  ;;  %v2772_v7 = vld [vmem:[%s8580_s9 + $0x368] sm:$0xff] }
 0x5c4   : > { %3010 = vmatpush2.msra.mxu1 %v2699_v6  ;;  %v2802_v6 = vld [vmem:[%s8580_s9 + $0x458] sm:$0xff] }
 0x5c5   : > { %4458 = vmatpush3.msra.mxu0 %v2515_v8  ;;  %v2698_v8 = vld [vmem:[%s8580_s9 + $0x118] sm:$0xff] }
 0x5c6   : > { %4459 = vmatprep.subr.mxu0 %v4655_v1  ;;  %3011 = vmatprep.subr.mxu1 %v2698_v8  ;;  %v2801_v8 = vld [vmem:[%s8580_s9 + $0x450] sm:$0xff] }
 0x5c7   : > { %4460 = vmatpush3.msra.mxu0 %v2514_v10  ;;  %v2771_v10 = vld [vmem:[%s8580_s9 + $0x360] sm:$0xff] }
 0x5c8   : > { %4462 = vmatmul.mubr.msk.f32.vlgmr.msra.gmra.mxu0 %vm2525_vm2, %v2516_v11  ;;  %3022 = vmatprep.subr.mxu0 %v2758_v12  ;;  %v2697_v11 = vld [vmem:[%s8580_s9 + $0x110] sm:$0xff]  ;;  %v2770_v12 = vld [vmem:[%s8580_s9 + $0x358] sm:$0xff] }
 0x5c9   : > { %4464 = vmatprep.mubr.msk.f32.mxu0 %vm4656_vm1, %v4655_v1  ;;  %3023 = vmatpush1.msra.mxu0 %v2757_v13  ;;  %v2696_v13 = vld [vmem:[%s8580_s9 + $0x108] sm:$0xff] }
 0x5ca   : > { %3024 = vmatprep.subr.mxu0 %v2756_v16  ;;  %3012 = vmatpush2.msra.mxu1 %v2697_v11  ;;  %v2769_v16 = vld [vmem:[%s8580_s9 + $0x350] sm:$0xff] }
 0x5cb   : > { %3025 = vmatpush1.msra.mxu0 %v2755_v17  ;;  %3013 = vmatprep.subr.mxu1 %v2696_v13  ;;  %v2695_v17 = vld [vmem:[%s8580_s9 + $0x100] sm:$0xff]  ;;  %v2872_v13 = vld [vmem:[%s8580_s9 + $0x688] sm:$0xff] }
 0x5cc   : > { %4465 = vmatmul.mubr.msk.f32.gmra.mxu0 %vm2525_vm2, %v2517_v18  ;;  %3026 = vmatprep.subr.mxu0 %v2754_v19  ;;  %v2768_v18 = vld [vmem:[%s8580_s9 + $0x348] sm:$0xff]  ;;  %v2822_v19 = vld [vmem:[%s8580_s9 + $0x4f8] sm:$0xff] }
 0x5cd   : > { %4467 = vmatprep.mubr.msk.f32.mxu0 %vm4656_vm1, %v4655_v1  ;;  %3027 = vmatpush1.msra.mxu0 %v2753_v22  ;;  %v2767_v22 = vld [vmem:[%s8580_s9 + $0x340] sm:$0xff] }
 0x5ce   : > { %3028 = vmatprep.subr.mxu0 %v2752_v23  ;;  %3014 = vmatpush2.msra.mxu1 %v2695_v17  ;;  %v2766_v23 = vld [vmem:[%s8580_s9 + $0x338] sm:$0xff]  ;;  %v2871_v17 = vld [vmem:[%s8580_s9 + $0x680] sm:$0xff] }
 0x5cf   : > { %3029 = vmatpush1.msra.mxu0 %v2751_v25  ;;  %3093 = vmatprep.subr.mxu1 %v2822_v19  ;;  %v2765_v25 = vld [vmem:[%s8580_s9 + $0x330] sm:$0xff]  ;;  %v2798_v19 = vld [vmem:[%s8580_s9 + $0x438] sm:$0xff] }
 0x5d0   : > { %4468 = vmatmul.mubr.msk.f32.gmra.mxu0 %vm2525_vm2, %v2518_v26  ;;  %3030 = vmatprep.subr.mxu0 %v2750_v28  ;;  %v2764_v26 = vld [vmem:[%s8580_s9 + $0x328] sm:$0xff]  ;;  %v2763_v28 = vld [vmem:[%s8580_s9 + $0x320] sm:$0xff] }
 0x5d1   : > { %4470 = vmatprep.mubr.msk.f32.mxu0 %vm4656_vm1, %v4655_v1  ;;  %3031 = vmatpush1.msra.mxu0 %v2749_v29  ;;  %v2762_v29 = vld [vmem:[%s8580_s9 + $0x318] sm:$0xff] }
 0x5d2   : > { %3032 = vmatprep.subr.mxu0 %v2748_v30  ;;  %v2761_v30 = vld [vmem:[%s8580_s9 + $0x310] sm:$0xff] }
 0x5d3   : > { %3033 = vmatpush1.msra.mxu0 %v2747_v32  ;;  %v2760_v32 = vld [vmem:[%s8580_s9 + $0x308] sm:$0xff] }
 0x5d4   : > { %4471 = vmatmul.mubr.msk.f32.gmra.mxu0 %vm2525_vm2, %v2519_v35  ;;  %3034 = vmatprep.subr.mxu0 %v2746_v37  ;;  %v2759_v35 = vld [vmem:[%s8580_s9 + $0x300] sm:$0xff]  ;;  %v2886_v37 = vld [vmem:[%s8580_s9 + $0x6f8] sm:$0xff] }
 0x5d5   : > { %4473 = vmatprep.mubr.msk.f32.mxu0 %vm4656_vm1, %v4655_v1  ;;  %3035 = vmatpush1.msra.mxu0 %v2745_v2 }
 0x5d6   : > { %3036 = vmatprep.subr.mxu0 %v2744_v63 }
 0x5d7   : > { %3037 = vmatpush1.msra.mxu0 %v2743_v0 }
 0x5d8   : > { %4474 = vmatmul.mubr.msk.f32.gmra.mxu0 %vm2525_vm2, %v2520_v39  ;;  %3038 = vmatprep.subr.mxu0 %v2742_v24  ;;  %v2821_v39 = vld [vmem:[%s8580_s9 + $0x4f0] sm:$0xff]  ;;  %v2820_v24 = vld [vmem:[%s8580_s9 + $0x4e8] sm:$0xff] }
 0x5d9   : > { %4476 = vmatprep.mubr.msk.f32.mxu0 %vm4656_vm1, %v4655_v1  ;;  %3039 = vmatpush1.msra.mxu0 %v2741_v20  ;;  %v2819_v20 = vld [vmem:[%s8580_s9 + $0x4e0] sm:$0xff] }
 0x5da   : > { %3040 = vmatprep.subr.mxu0 %v2740_v44 }
 0x5db   : > { %3041 = vmatpush1.msra.mxu0 %v2739_v31  ;;  %v2818_v31 = vld [vmem:[%s8580_s9 + $0x4d8] sm:$0xff] }
 0x5dc   : > { %4477 = vmatmul.mubr.msk.f32.gmra.mxu0 %vm2525_vm2, %v2521_v51  ;;  %3042 = vmatprep.subr.mxu0 %v2738_v48  ;;  %v2817_v51 = vld [vmem:[%s8580_s9 + $0x4d0] sm:$0xff] }
 0x5dd   : > { %4479 = vmatprep.mubr.msk.f32.mxu0 %vm4656_vm1, %v4655_v1  ;;  %3043 = vmatpush1.msra.mxu0 %v2737_v14  ;;  %v2816_v14 = vld [vmem:[%s8580_s9 + $0x4c8] sm:$0xff] }
 0x5de   : > { %3044 = vmatprep.subr.mxu0 %v2736_v50  ;;  %v2815_v50 = vld [vmem:[%s8580_s9 + $0x4c0] sm:$0xff] }
 0x5df   : > { %3045 = vmatpush1.msra.mxu0 %v2735_v41 }
 0x5e0   : > { %4480 = vmatmul.mubr.msk.f32.gmra.mxu0 %vm2525_vm2, %v2522_v5  ;;  %3046 = vmatprep.subr.mxu0 %v2734_v46  ;;  %v2814_v5 = vld [vmem:[%s8580_s9 + $0x4b8] sm:$0xff]  ;;  %v2813_v46 = vld [vmem:[%s8580_s9 + $0x4b0] sm:$0xff] }
 0x5e1   : > { %4482 = vmatprep.mubr.msk.f32.mxu0 %vm4656_vm1, %v4655_v1  ;;  %3047 = vmatpush1.msra.mxu0 %v2733_v33 }
 0x5e2   : > { %3048 = vmatprep.subr.mxu0 %v2732_v43  ;;  %v2885_v43 = vld [vmem:[%s8580_s9 + $0x6f0] sm:$0xff] }
 0x5e3   : > { %3049 = vmatpush1.msra.mxu0 %v2731_v27  ;;  %v2812_v27 = vld [vmem:[%s8580_s9 + $0x4a8] sm:$0xff] }
 0x5e4   : > { %4483 = vmatmul.mubr.msk.f32.gmra.mxu0 %vm2525_vm2, %v2523_v45  ;;  %3050 = vmatprep.subr.mxu0 %v2730_v21  ;;  %v2884_v45 = vld [vmem:[%s8580_s9 + $0x6e8] sm:$0xff]  ;;  %v2811_v21 = vld [vmem:[%s8580_s9 + $0x4a0] sm:$0xff] }
 0x5e5   : > { %4485 = vmatprep.mubr.msk.f32.mxu0 %vm4656_vm1, %v4655_v1  ;;  %3051 = vmatpush1.msra.mxu0 %v2729_v9 }
 0x5e6   : > { %3052 = vmatprep.subr.mxu0 %v2728_v42  ;;  %v2810_v42 = vld [vmem:[%s8580_s9 + $0x498] sm:$0xff] }
 0x5e7   : > { %3053 = vmatpush1.msra.mxu0 %v2727_v47  ;;  %v2882_v47 = vld [vmem:[%s8580_s9 + $0x6d8] sm:$0xff] }
 0x5e8   : > { %4486 = vmatmul.mubr.msk.f32.gmra.mxu0 %vm2525_vm2, %v2524_v15  ;;  %3054 = vmatprep.subr.mxu0 %v2790_v40  ;;  %v2883_v15 = vld [vmem:[%s8580_s9 + $0x6e0] sm:$0xff]  ;;  %v2809_v40 = vld [vmem:[%s8580_s9 + $0x490] sm:$0xff] }
 0x5e9   : > { %3055 = vmatpush2.msra.mxu0 %v2789_v49  ;;  %v2881_v49 = vld [vmem:[%s8580_s9 + $0x6d0] sm:$0xff] }
 0x5ea   : > { %3056 = vmatprep.subr.mxu0 %v2788_v38 }
 0x5eb   : > { %3057 = vmatpush2.msra.mxu0 %v2787_v52  ;;  %v2808_v52 = vld [vmem:[%s8580_s9 + $0x488] sm:$0xff] }
 0x5ec   : > { %3058 = vmatprep.subr.mxu0 %v2786_v53  ;;  %v2880_v53 = vld [vmem:[%s8580_s9 + $0x6c8] sm:$0xff] }
 0x5ed   : > { %3059 = vmatpush2.msra.mxu0 %v2785_v36  ;;  %v2807_v36 = vld [vmem:[%s8580_s9 + $0x480] sm:$0xff] }
 0x5ee   : > { %3060 = vmatprep.subr.mxu0 %v2784_v54  ;;  %v2879_v54 = vld [vmem:[%s8580_s9 + $0x6c0] sm:$0xff] }
 0x5ef   : > { %3061 = vmatpush2.msra.mxu0 %v2783_v34 }
 0x5f0   : > { %3062 = vmatprep.subr.mxu0 %v2782_v55  ;;  %v2806_v55 = vld [vmem:[%s8580_s9 + $0x478] sm:$0xff] }
 0x5f1   : > { %3063 = vmatpush2.msra.mxu0 %v2781_v56  ;;  %v2878_v56 = vld [vmem:[%s8580_s9 + $0x6b8] sm:$0xff] }
 0x5f2   : > { %3064 = vmatprep.subr.mxu0 %v2780_v57  ;;  %v2805_v57 = vld [vmem:[%s8580_s9 + $0x470] sm:$0xff] }
 0x5f3   : > { %3065 = vmatpush2.msra.mxu0 %v2779_v58  ;;  %v2877_v58 = vld [vmem:[%s8580_s9 + $0x6b0] sm:$0xff] }
 0x5f4   : > { %3066 = vmatprep.subr.mxu0 %v2778_v59 }
 0x5f5   : > { %3067 = vmatpush2.msra.mxu0 %v2777_v60  ;;  %v2804_v60 = vld [vmem:[%s8580_s9 + $0x468] sm:$0xff] }
 0x5f6   : > { %3068 = vmatprep.subr.mxu0 %v2776_v61  ;;  %v2876_v61 = vld [vmem:[%s8580_s9 + $0x6a8] sm:$0xff] }
 0x5f7   : > { %3069 = vmatpush2.msra.mxu0 %v2775_v62  ;;  %v2803_v62 = vld [vmem:[%s8580_s9 + $0x460] sm:$0xff] }
 0x5f8   : > { %3070 = vmatprep.subr.mxu0 %v2774_v3  ;;  %v2875_v3 = vld [vmem:[%s8580_s9 + $0x6a0] sm:$0xff] }
 0x5f9   : > { %3071 = vmatpush2.msra.mxu0 %v2773_v4 }
 0x5fa   : > { %3072 = vmatprep.subr.mxu0 %v2772_v7  ;;  %v2874_v7 = vld [vmem:[%s8580_s9 + $0x698] sm:$0xff] }
 0x5fb   : > { %3073 = vmatpush2.msra.mxu0 %v2771_v10  ;;  %v2873_v10 = vld [vmem:[%s8580_s9 + $0x690] sm:$0xff] }
 0x5fc   : > { %3074 = vmatprep.subr.mxu0 %v2770_v12  ;;  %v2800_v12 = vld [vmem:[%s8580_s9 + $0x448] sm:$0xff] }
 0x5fd   : > { %3075 = vmatpush2.msra.mxu0 %v2769_v16  ;;  %v2799_v16 = vld [vmem:[%s8580_s9 + $0x440] sm:$0xff] }
 0x5fe   : > { %3076 = vmatprep.subr.mxu0 %v2768_v18 }
 0x5ff   : > { %3077 = vmatpush2.msra.mxu0 %v2767_v22  ;;  %v2870_v22 = vld [vmem:[%s8580_s9 + $0x678] sm:$0xff] }
 0x600   : > { %3078 = vmatprep.subr.mxu0 %v2766_v23  ;;  %v2797_v23 = vld [vmem:[%s8580_s9 + $0x430] sm:$0xff] }
 0x601   : > { %3079 = vmatpush2.msra.mxu0 %v2765_v25  ;;  %v2869_v25 = vld [vmem:[%s8580_s9 + $0x670] sm:$0xff] }
 0x602   : > { %3080 = vmatprep.subr.mxu0 %v2764_v26 }
 0x603   : > { %3081 = vmatpush2.msra.mxu0 %v2763_v28  ;;  %v2796_v28 = vld [vmem:[%s8580_s9 + $0x428] sm:$0xff] }
 0x604   : > { %3082 = vmatprep.subr.mxu0 %v2762_v29  ;;  %v2868_v29 = vld [vmem:[%s8580_s9 + $0x668] sm:$0xff] }
 0x605   : > { %3083 = vmatpush2.msra.mxu0 %v2761_v30  ;;  %v2795_v30 = vld [vmem:[%s8580_s9 + $0x420] sm:$0xff] }
 0x606   : > { %3084 = vmatprep.subr.mxu0 %v2760_v32  ;;  %v2867_v32 = vld [vmem:[%s8580_s9 + $0x660] sm:$0xff] }
 0x607   : > { %3085 = vmatpush2.msra.mxu0 %v2759_v35 }
 0x608   : > { %3164 = vmatprep.subr.mxu0 %v2886_v37  ;;  %v2794_v37 = vld [vmem:[%s8580_s9 + $0x418] sm:$0xff] }
 0x688   : > { %v2619_v2 = vpop.f32.mrf.mxu0 }
 0x68a   : > { %v4463_v63 = vpop.f32.mrf.mxu0 }
 0x68b   : > { %v2793_v63 = vld [vmem:[%s8580_s9 + $0x410] sm:$0xff] }
 0x68c   : > { %v2624_v0 = vpop.f32.mrf.mxu0 }
 0x68d   : > { %3015 = vmatprep.mubr.f32.mxu1 %v2624_v0  ;;  %v2865_v0 = vld [vmem:[%s8580_s9 + $0x650] sm:$0xff] }
 0x68e   : > { %3016 = vmatmul.mubr.f32.vlgmr.msra.gmra.mxu1 %v2619_v2  ;;  %v4466_v44 = vpop.f32.mrf.mxu0  ;;  %v2866_v2 = vld [vmem:[%s8580_s9 + $0x658] sm:$0xff] }
 0x68f   : > { %3094 = vmatpush1.msra.mxu1 %v2821_v39  ;;  %v2791_v44 = vld [vmem:[%s8580_s9 + $0x400] sm:$0xff] }
 0x690   : > { %3095 = vmatprep.subr.mxu1 %v2820_v24  ;;  %v2629_v48 = vpop.f32.mrf.mxu0  ;;  %v2792_v24 = vld [vmem:[%s8580_s9 + $0x408] sm:$0xff] }
 0x691   : > { %3096 = vmatpush1.msra.mxu1 %v2819_v20  ;;  %v2864_v20 = vld [vmem:[%s8580_s9 + $0x648] sm:$0xff] }
 0x692   : > { %3097 = vmatprep.subr.mxu1 %v2818_v31  ;;  %v4469_v41 = vpop.f32.mrf.mxu0  ;;  %v2863_v31 = vld [vmem:[%s8580_s9 + $0x640] sm:$0xff] }
 0x693   : > { %3098 = vmatpush1.msra.mxu1 %v2817_v51  ;;  %v2861_v41 = vld [vmem:[%s8580_s9 + $0x630] sm:$0xff] }
 0x694   : > { %3099 = vmatprep.subr.mxu1 %v2816_v14  ;;  %v2634_v33 = vpop.f32.mrf.mxu0  ;;  %v2862_v14 = vld [vmem:[%s8580_s9 + $0x638] sm:$0xff] }
 0x695   : > { %3100 = vmatpush1.msra.mxu1 %v2815_v50  ;;  %3086 = vmatprep.mubr.f32.mxu0 %v2634_v33  ;;  %v2853_v50 = vld [vmem:[%s8580_s9 + $0x5f0] sm:$0xff]  ;;  %v2851_v33 = vld [vmem:[%s8580_s9 + $0x5e0] sm:$0xff] }
 0x696   : > { %3101 = vmatprep.subr.mxu1 %v2814_v5  ;;  %3087 = vmatmul.mubr.f32.vlgmr.msra.gmra.mxu0 %v2629_v48  ;;  %v4472_v9 = vpop.f32.mrf.mxu0  ;;  %v2854_v48 = vld [vmem:[%s8580_s9 + $0x5f8] sm:$0xff]  ;;  %v2852_v5 = vld [vmem:[%s8580_s9 + $0x5e8] sm:$0xff] }
 0x697   : > { %3102 = vmatpush1.msra.mxu1 %v2813_v46  ;;  %3165 = vmatpush1.msra.mxu0 %v2885_v43  ;;  %v2860_v46 = vld [vmem:[%s8580_s9 + $0x628] sm:$0xff]  ;;  %v2859_v43 = vld [vmem:[%s8580_s9 + $0x620] sm:$0xff] }
 0x698   : > { %3103 = vmatprep.subr.mxu1 %v2812_v27  ;;  %3166 = vmatprep.subr.mxu0 %v2884_v45  ;;  %v7082_v38 = vpop.f32.mrf.mxu0  ;;  %v2850_v27 = vld [vmem:[%s8580_s9 + $0x5d8] sm:$0xff]  ;;  %v2848_v9 = vld [vmem:[%s8580_s9 + $0x5c8] sm:$0xff] }
 0x699   : > { %3104 = vmatpush1.msra.mxu1 %v2811_v21  ;;  %3167 = vmatpush1.msra.mxu0 %v2883_v15  ;;  %v2858_v45 = vld [vmem:[%s8580_s9 + $0x618] sm:$0xff]  ;;  %v2849_v21 = vld [vmem:[%s8580_s9 + $0x5d0] sm:$0xff] }
 0x69a   : > { %3105 = vmatprep.subr.mxu1 %v2810_v42  ;;  %3168 = vmatprep.subr.mxu0 %v2882_v47  ;;  %v4475_v34 = vpop.f32.mrf.mxu0  ;;  %v2857_v15 = vld [vmem:[%s8580_s9 + $0x610] sm:$0xff]  ;;  %v2856_v42 = vld [vmem:[%s8580_s9 + $0x608] sm:$0xff]  ;;  %v2847_v47 = vld [vmem:[%s8580_s9 + $0x5c0] sm:$0xff] }
 0x69b   : > { %3106 = vmatpush1.msra.mxu1 %v2809_v40  ;;  %3169 = vmatpush1.msra.mxu0 %v2881_v49  ;;  %v2855_v40 = vld [vmem:[%s8580_s9 + $0x600] sm:$0xff]  ;;  %v2846_v49 = vld [vmem:[%s8580_s9 + $0x5b8] sm:$0xff] }
 0x69c   : > { %3107 = vmatprep.subr.mxu1 %v2808_v52  ;;  %3170 = vmatprep.subr.mxu0 %v2880_v53  ;;  %v7108_v59 = vpop.f32.mrf.mxu0  ;;  %v2918_v52 = vld [vmem:[%s8580_s9 + $0x7f8] sm:$0xff]  ;;  %v2845_v53 = vld [vmem:[%s8580_s9 + $0x5b0] sm:$0xff]  ;;  %v2843_v34 = vld [vmem:[%s8580_s9 + $0x5a0] sm:$0xff] }
 0x69d   : > { %3108 = vmatpush1.msra.mxu1 %v2807_v36  ;;  %3171 = vmatpush1.msra.mxu0 %v2879_v54  ;;  %v2917_v36 = vld [vmem:[%s8580_s9 + $0x7f0] sm:$0xff]  ;;  %v2844_v54 = vld [vmem:[%s8580_s9 + $0x5a8] sm:$0xff] }
 0x69e   : > { %3109 = vmatprep.subr.mxu1 %v2806_v55  ;;  %3172 = vmatprep.subr.mxu0 %v2878_v56  ;;  %v4478_v4 = vpop.f32.mrf.mxu0  ;;  %v2916_v55 = vld [vmem:[%s8580_s9 + $0x7e8] sm:$0xff]  ;;  %v2842_v56 = vld [vmem:[%s8580_s9 + $0x598] sm:$0xff] }
 0x69f   : > { %3110 = vmatpush1.msra.mxu1 %v2805_v57  ;;  %3173 = vmatpush1.msra.mxu0 %v2877_v58  ;;  %v2915_v57 = vld [vmem:[%s8580_s9 + $0x7e0] sm:$0xff]  ;;  %v2841_v58 = vld [vmem:[%s8580_s9 + $0x590] sm:$0xff]  ;;  %v2838_v4 = vld [vmem:[%s8580_s9 + $0x578] sm:$0xff] }
 0x6a0   : > { %3111 = vmatprep.subr.mxu1 %v2804_v60  ;;  %3174 = vmatprep.subr.mxu0 %v2876_v61  ;;  %v7134_v11 = vpop.f32.mrf.mxu0  ;;  %v2914_v60 = vld [vmem:[%s8580_s9 + $0x7d8] sm:$0xff]  ;;  %v2840_v61 = vld [vmem:[%s8580_s9 + $0x588] sm:$0xff] }
 0x6a1   : > { %3112 = vmatpush1.msra.mxu1 %v2803_v62  ;;  %3175 = vmatpush1.msra.mxu0 %v2875_v3  ;;  %v2913_v62 = vld [vmem:[%s8580_s9 + $0x7d0] sm:$0xff]  ;;  %v2839_v3 = vld [vmem:[%s8580_s9 + $0x580] sm:$0xff] }
 0x6a2   : > { %3113 = vmatprep.subr.mxu1 %v2802_v6  ;;  %3176 = vmatprep.subr.mxu0 %v2874_v7  ;;  %v4481_v18 = vpop.f32.mrf.mxu0  ;;  %v2911_v6 = vld [vmem:[%s8580_s9 + $0x7c0] sm:$0xff]  ;;  %v2837_v7 = vld [vmem:[%s8580_s9 + $0x570] sm:$0xff] }
 0x6a3   : > { %3114 = vmatpush1.msra.mxu1 %v2801_v8  ;;  %3177 = vmatpush1.msra.mxu0 %v2873_v10  ;;  %v2910_v8 = vld [vmem:[%s8580_s9 + $0x7b8] sm:$0xff]  ;;  %v2836_v10 = vld [vmem:[%s8580_s9 + $0x568] sm:$0xff]  ;;  %v2907_v18 = vld [vmem:[%s8580_s9 + $0x7a0] sm:$0xff] }
 0x6a4   : > { %3115 = vmatprep.subr.mxu1 %v2800_v12  ;;  %3178 = vmatprep.subr.mxu0 %v2872_v13  ;;  %v7160_v26 = vpop.f32.mrf.mxu0  ;;  %v2909_v12 = vld [vmem:[%s8580_s9 + $0x7b0] sm:$0xff]  ;;  %v2835_v13 = vld [vmem:[%s8580_s9 + $0x560] sm:$0xff] }
 0x6a5   : > { %3116 = vmatpush1.msra.mxu1 %v2799_v16  ;;  %3179 = vmatpush1.msra.mxu0 %v2871_v17  ;;  %v2908_v16 = vld [vmem:[%s8580_s9 + $0x7a8] sm:$0xff]  ;;  %v2834_v17 = vld [vmem:[%s8580_s9 + $0x558] sm:$0xff] }
 0x6a6   : > { %3117 = vmatprep.subr.mxu1 %v2798_v19  ;;  %3180 = vmatprep.subr.mxu0 %v2870_v22  ;;  %v4484_v35 = vpop.f32.mrf.mxu0  ;;  %v2833_v19 = vld [vmem:[%s8580_s9 + $0x550] sm:$0xff]  ;;  %v2906_v22 = vld [vmem:[%s8580_s9 + $0x798] sm:$0xff] }
 0x6a7   : > { %3118 = vmatpush1.msra.mxu1 %v2797_v23  ;;  %3181 = vmatpush1.msra.mxu0 %v2869_v25  ;;  %v2832_v23 = vld [vmem:[%s8580_s9 + $0x548] sm:$0xff]  ;;  %v2905_v25 = vld [vmem:[%s8580_s9 + $0x790] sm:$0xff] }
 0x6a8   : > { %3119 = vmatprep.subr.mxu1 %v2796_v28  ;;  %3182 = vmatprep.subr.mxu0 %v2868_v29  ;;  %v7186_v39 = vpop.f32.mrf.mxu0  ;;  %v2831_v28 = vld [vmem:[%s8580_s9 + $0x540] sm:$0xff]  ;;  %v2904_v29 = vld [vmem:[%s8580_s9 + $0x788] sm:$0xff]  ;;  %v2829_v35 = vld [vmem:[%s8580_s9 + $0x530] sm:$0xff] }
 0x6a9   : > { %3120 = vmatpush1.msra.mxu1 %v2795_v30  ;;  %3183 = vmatpush1.msra.mxu0 %v2867_v32  ;;  %v2830_v30 = vld [vmem:[%s8580_s9 + $0x538] sm:$0xff]  ;;  %v2903_v32 = vld [vmem:[%s8580_s9 + $0x780] sm:$0xff] }
 0x6aa   : > { %3121 = vmatprep.subr.mxu1 %v2794_v37  ;;  %3184 = vmatprep.subr.mxu0 %v2866_v2  ;;  %v4487_v51 = vpop.f32.mrf.mxu0  ;;  %v2902_v37 = vld [vmem:[%s8580_s9 + $0x778] sm:$0xff]  ;;  %v2828_v2 = vld [vmem:[%s8580_s9 + $0x528] sm:$0xff] }
 0x6ab   : > { %3122 = vmatpush1.msra.mxu1 %v2793_v63  ;;  %3185 = vmatpush1.msra.mxu0 %v2865_v0  ;;  %v2901_v63 = vld [vmem:[%s8580_s9 + $0x770] sm:$0xff]  ;;  %v2827_v0 = vld [vmem:[%s8580_s9 + $0x520] sm:$0xff]  ;;  %v2898_v51 = vld [vmem:[%s8580_s9 + $0x758] sm:$0xff] }
 0x6ac   : > { %3123 = vmatprep.subr.mxu1 %v2792_v24  ;;  %3186 = vmatprep.subr.mxu0 %v2864_v20  ;;  %v2900_v24 = vld [vmem:[%s8580_s9 + $0x768] sm:$0xff]  ;;  %v2826_v20 = vld [vmem:[%s8580_s9 + $0x518] sm:$0xff] }
 0x6ad   : > { %3124 = vmatpush1.msra.mxu1 %v2791_v44  ;;  %3187 = vmatpush1.msra.mxu0 %v2863_v31  ;;  %v2899_v44 = vld [vmem:[%s8580_s9 + $0x760] sm:$0xff]  ;;  %v2825_v31 = vld [vmem:[%s8580_s9 + $0x510] sm:$0xff] }
 0x6ae   : > { %3125 = vmatprep.subr.mxu1 %v2854_v48  ;;  %3188 = vmatprep.subr.mxu0 %v2862_v14  ;;  %v2824_v48 = vld [vmem:[%s8580_s9 + $0x508] sm:$0xff]  ;;  %v2897_v14 = vld [vmem:[%s8580_s9 + $0x750] sm:$0xff] }
 0x6af   : > { %3126 = vmatpush2.msra.mxu1 %v2853_v50  ;;  %3189 = vmatpush1.msra.mxu0 %v2861_v41  ;;  %v2823_v50 = vld [vmem:[%s8580_s9 + $0x500] sm:$0xff]  ;;  %v2896_v41 = vld [vmem:[%s8580_s9 + $0x748] sm:$0xff] }
 0x6b0   : > { %3127 = vmatprep.subr.mxu1 %v2852_v5  ;;  %3190 = vmatprep.subr.mxu0 %v2860_v46  ;;  %v2950_v5 = vld [vmem:[%s8580_s9 + $0x8f8] sm:$0xff]  ;;  %v2949_v46 = vld [vmem:[%s8580_s9 + $0x8f0] sm:$0xff] }
 0x6b1   : > { %3128 = vmatpush2.msra.mxu1 %v2851_v33  ;;  %3191 = vmatpush1.msra.mxu0 %v2859_v43  ;;  %v2895_v33 = vld [vmem:[%s8580_s9 + $0x740] sm:$0xff]  ;;  %v2948_v43 = vld [vmem:[%s8580_s9 + $0x8e8] sm:$0xff] }
 0x6b2   : > { %3129 = vmatprep.subr.mxu1 %v2850_v27  ;;  %3192 = vmatprep.subr.mxu0 %v2858_v45  ;;  %v2894_v27 = vld [vmem:[%s8580_s9 + $0x738] sm:$0xff]  ;;  %v2947_v45 = vld [vmem:[%s8580_s9 + $0x8e0] sm:$0xff] }
 0x6b3   : > { %3130 = vmatpush2.msra.mxu1 %v2849_v21  ;;  %3193 = vmatpush1.msra.mxu0 %v2857_v15  ;;  %v2893_v21 = vld [vmem:[%s8580_s9 + $0x730] sm:$0xff]  ;;  %v2946_v15 = vld [vmem:[%s8580_s9 + $0x8d8] sm:$0xff] }
 0x6b4   : > { %3131 = vmatprep.subr.mxu1 %v2848_v9  ;;  %3194 = vmatprep.subr.mxu0 %v2856_v42  ;;  %v2892_v9 = vld [vmem:[%s8580_s9 + $0x728] sm:$0xff]  ;;  %v2891_v42 = vld [vmem:[%s8580_s9 + $0x720] sm:$0xff] }
 0x6b5   : > { %3132 = vmatpush2.msra.mxu1 %v2847_v47  ;;  %3195 = vmatpush1.msra.mxu0 %v2855_v40  ;;  %v2944_v47 = vld [vmem:[%s8580_s9 + $0x8c8] sm:$0xff]  ;;  %v2890_v40 = vld [vmem:[%s8580_s9 + $0x718] sm:$0xff] }
 0x6b6   : > { %3133 = vmatprep.subr.mxu1 %v2846_v49  ;;  %3196 = vmatprep.subr.mxu0 %v2918_v52  ;;  %v2943_v49 = vld [vmem:[%s8580_s9 + $0x8c0] sm:$0xff]  ;;  %v2889_v52 = vld [vmem:[%s8580_s9 + $0x710] sm:$0xff] }
 0x6b7   : > { %3134 = vmatpush2.msra.mxu1 %v2845_v53  ;;  %3197 = vmatpush2.msra.mxu0 %v2917_v36  ;;  %v2942_v53 = vld [vmem:[%s8580_s9 + $0x8b8] sm:$0xff]  ;;  %v2888_v36 = vld [vmem:[%s8580_s9 + $0x708] sm:$0xff] }
 0x6b8   : > { %3135 = vmatprep.subr.mxu1 %v2844_v54  ;;  %3157 = vmatprep.mubr.f32.mxu1 %v7108_v59  ;;  %v2912_v59 = vld [vmem:[%s8580_s9 + $0x7c8] sm:$0xff]  ;;  %v2941_v54 = vld [vmem:[%s8580_s9 + $0x8b0] sm:$0xff] }
 0x6b9   : > { %3136 = vmatpush2.msra.mxu1 %v2843_v34  ;;  %3198 = vmatprep.subr.mxu0 %v2916_v55  ;;  %v2887_v34 = vld [vmem:[%s8580_s9 + $0x700] sm:$0xff]  ;;  %v2940_v55 = vld [vmem:[%s8580_s9 + $0x8a8] sm:$0xff] }
 0x6ba   : > { %3137 = vmatprep.subr.mxu1 %v2842_v56  ;;  %3199 = vmatpush2.msra.mxu0 %v2915_v57  ;;  %v2939_v56 = vld [vmem:[%s8580_s9 + $0x8a0] sm:$0xff]  ;;  %v2938_v57 = vld [vmem:[%s8580_s9 + $0x898] sm:$0xff] }
 0x6bb   : > { %3138 = vmatpush2.msra.mxu1 %v2841_v58  ;;  %3200 = vmatprep.subr.mxu0 %v2914_v60  ;;  %v2937_v58 = vld [vmem:[%s8580_s9 + $0x890] sm:$0xff]  ;;  %v2936_v60 = vld [vmem:[%s8580_s9 + $0x888] sm:$0xff] }
 0x6bc   : > { %3139 = vmatprep.subr.mxu1 %v2840_v61  ;;  %3201 = vmatpush2.msra.mxu0 %v2913_v62  ;;  %v2935_v61 = vld [vmem:[%s8580_s9 + $0x880] sm:$0xff]  ;;  %v2934_v62 = vld [vmem:[%s8580_s9 + $0x878] sm:$0xff] }
 0x6bd   : > { %3140 = vmatpush2.msra.mxu1 %v2839_v3  ;;  %3202 = vmatprep.subr.mxu0 %v2912_v59  ;;  %v2931_v3 = vld [vmem:[%s8580_s9 + $0x860] sm:$0xff]  ;;  %v2930_v59 = vld [vmem:[%s8580_s9 + $0x858] sm:$0xff] }
 0x6be   : > { %3141 = vmatprep.subr.mxu1 %v2838_v4  ;;  %3203 = vmatpush2.msra.mxu0 %v2911_v6  ;;  %v2929_v4 = vld [vmem:[%s8580_s9 + $0x850] sm:$0xff]  ;;  %v2928_v6 = vld [vmem:[%s8580_s9 + $0x848] sm:$0xff] }
 0x6bf   : > { %3142 = vmatpush2.msra.mxu1 %v2837_v7  ;;  %3204 = vmatprep.subr.mxu0 %v2910_v8  ;;  %v2927_v7 = vld [vmem:[%s8580_s9 + $0x840] sm:$0xff]  ;;  %v2926_v8 = vld [vmem:[%s8580_s9 + $0x838] sm:$0xff] }
 0x6c0   : > { %3143 = vmatprep.subr.mxu1 %v2836_v10  ;;  %3205 = vmatpush2.msra.mxu0 %v2909_v12  ;;  %v2925_v10 = vld [vmem:[%s8580_s9 + $0x830] sm:$0xff]  ;;  %v2924_v12 = vld [vmem:[%s8580_s9 + $0x828] sm:$0xff] }
 0x6c1   : > { %3144 = vmatpush2.msra.mxu1 %v2835_v13  ;;  %3206 = vmatprep.subr.mxu0 %v2908_v16  ;;  %v2923_v13 = vld [vmem:[%s8580_s9 + $0x820] sm:$0xff]  ;;  %v2922_v16 = vld [vmem:[%s8580_s9 + $0x818] sm:$0xff] }
 0x6c2   : > { %3145 = vmatprep.subr.mxu1 %v2834_v17  ;;  %3207 = vmatpush2.msra.mxu0 %v2907_v18  ;;  %v2921_v17 = vld [vmem:[%s8580_s9 + $0x810] sm:$0xff]  ;;  %v2920_v18 = vld [vmem:[%s8580_s9 + $0x808] sm:$0xff] }
 0x6c3   : > { %3146 = vmatpush2.msra.mxu1 %v2833_v19  ;;  %3208 = vmatprep.subr.mxu0 %v2906_v22  ;;  %v2919_v19 = vld [vmem:[%s8580_s9 + $0x800] sm:$0xff]  ;;  %v3566_v22 = vld [vmem:[%s8584_s13 + $0x2f8] sm:$0xff] }
 0x6c4   : > { %3147 = vmatprep.subr.mxu1 %v2832_v23  ;;  %3209 = vmatpush2.msra.mxu0 %v2905_v25  ;;  %v3565_v23 = vld [vmem:[%s8584_s13 + $0x2f0] sm:$0xff]  ;;  %v3564_v25 = vld [vmem:[%s8584_s13 + $0x2e8] sm:$0xff] }
 0x6c5   : > { %3148 = vmatpush2.msra.mxu1 %v2831_v28  ;;  %3210 = vmatprep.subr.mxu0 %v2904_v29  ;;  %v3563_v28 = vld [vmem:[%s8584_s13 + $0x2e0] sm:$0xff]  ;;  %v3561_v29 = vld [vmem:[%s8584_s13 + $0x2d0] sm:$0xff] }
 0x6c6   : > { %3149 = vmatprep.subr.mxu1 %v2830_v30  ;;  %3211 = vmatpush2.msra.mxu0 %v2903_v32  ;;  %v3560_v30 = vld [vmem:[%s8584_s13 + $0x2c8] sm:$0xff]  ;;  %v3559_v32 = vld [vmem:[%s8584_s13 + $0x2c0] sm:$0xff] }
 0x6c7   : > { %3150 = vmatpush2.msra.mxu1 %v2829_v35  ;;  %3212 = vmatprep.subr.mxu0 %v2902_v37  ;;  %v3558_v35 = vld [vmem:[%s8584_s13 + $0x2b8] sm:$0xff]  ;;  %v3557_v37 = vld [vmem:[%s8584_s13 + $0x2b0] sm:$0xff] }
 0x6c8   : > { %3151 = vmatprep.subr.mxu1 %v2828_v2  ;;  %3213 = vmatpush2.msra.mxu0 %v2901_v63  ;;  %v3556_v2 = vld [vmem:[%s8584_s13 + $0x2a8] sm:$0xff]  ;;  %v3555_v63 = vld [vmem:[%s8584_s13 + $0x2a0] sm:$0xff] }
 0x6c9   : > { %3152 = vmatpush2.msra.mxu1 %v2827_v0  ;;  %3214 = vmatprep.subr.mxu0 %v2900_v24  ;;  %v3554_v0 = vld [vmem:[%s8584_s13 + $0x298] sm:$0xff]  ;;  %v3553_v24 = vld [vmem:[%s8584_s13 + $0x290] sm:$0xff] }
 0x6ca   : > { %3153 = vmatprep.subr.mxu1 %v2826_v20  ;;  %3215 = vmatpush2.msra.mxu0 %v2899_v44  ;;  %v3552_v20 = vld [vmem:[%s8584_s13 + $0x288] sm:$0xff]  ;;  %v3551_v44 = vld [vmem:[%s8584_s13 + $0x280] sm:$0xff] }
 0x6cb   : > { %3154 = vmatpush2.msra.mxu1 %v2825_v31  ;;  %3216 = vmatprep.subr.mxu0 %v2898_v51  ;;  %v3550_v31 = vld [vmem:[%s8584_s13 + $0x278] sm:$0xff]  ;;  %v3549_v51 = vld [vmem:[%s8584_s13 + $0x270] sm:$0xff] }
 0x6cc   : > { %3155 = vmatprep.subr.mxu1 %v2824_v48  ;;  %3217 = vmatpush2.msra.mxu0 %v2897_v14  ;;  %v3548_v48 = vld [vmem:[%s8584_s13 + $0x268] sm:$0xff]  ;;  %v3547_v14 = vld [vmem:[%s8584_s13 + $0x260] sm:$0xff] }
 0x6cd   : > { %3156 = vmatpush2.msra.mxu1 %v2823_v50  ;;  %3218 = vmatprep.subr.mxu0 %v2896_v41  ;;  %v3546_v50 = vld [vmem:[%s8584_s13 + $0x258] sm:$0xff]  ;;  %v3545_v41 = vld [vmem:[%s8584_s13 + $0x250] sm:$0xff] }
 0x6ce   : > { %3235 = vmatprep.subr.mxu1 %v2950_v5  ;;  %3158 = vmatmul.mubr.f32.vlgmr.msra.gmra.mxu1 %v7082_v38  ;;  %v2945_v38 = vld [vmem:[%s8580_s9 + $0x8d0] sm:$0xff]  ;;  %v3544_v5 = vld [vmem:[%s8584_s13 + $0x248] sm:$0xff] }
 0x6cf   : > { %3236 = vmatpush1.msra.mxu1 %v2949_v46  ;;  %3219 = vmatpush2.msra.mxu0 %v2895_v33  ;;  %v3543_v46 = vld [vmem:[%s8584_s13 + $0x240] sm:$0xff]  ;;  %v3542_v33 = vld [vmem:[%s8584_s13 + $0x238] sm:$0xff] }
 0x6d0   : > { %3237 = vmatprep.subr.mxu1 %v2948_v43  ;;  %3220 = vmatprep.subr.mxu0 %v2894_v27  ;;  %v3541_v43 = vld [vmem:[%s8584_s13 + $0x230] sm:$0xff]  ;;  %v3540_v27 = vld [vmem:[%s8584_s13 + $0x228] sm:$0xff] }
 0x6d1   : > { %3238 = vmatpush1.msra.mxu1 %v2947_v45  ;;  %3221 = vmatpush2.msra.mxu0 %v2893_v21  ;;  %v3539_v45 = vld [vmem:[%s8584_s13 + $0x220] sm:$0xff]  ;;  %v3538_v21 = vld [vmem:[%s8584_s13 + $0x218] sm:$0xff] }
 0x6d2   : > { %3239 = vmatprep.subr.mxu1 %v2946_v15  ;;  %3222 = vmatprep.subr.mxu0 %v2892_v9 }
 0x6d3   : > { %3240 = vmatpush1.msra.mxu1 %v2945_v38  ;;  %3223 = vmatpush2.msra.mxu0 %v2891_v42 }
 0x6d4   : > { %3241 = vmatprep.subr.mxu1 %v2944_v47  ;;  %3224 = vmatprep.subr.mxu0 %v2890_v40 }
 0x6d5   : > { %3242 = vmatpush1.msra.mxu1 %v2943_v49  ;;  %3225 = vmatpush2.msra.mxu0 %v2889_v52 }
 0x6d6   : > { %3243 = vmatprep.subr.mxu1 %v2942_v53  ;;  %3226 = vmatprep.subr.mxu0 %v2888_v36 }
 0x6d7   : > { %3244 = vmatpush1.msra.mxu1 %v2941_v54  ;;  %3227 = vmatpush2.msra.mxu0 %v2887_v34 }
 0x6d8   : > { %3245 = vmatprep.subr.mxu1 %v2940_v55  ;;  %3228 = vmatprep.mubr.f32.mxu0 %v7160_v26  ;;  %v2933_v26 = vld [vmem:[%s8580_s9 + $0x870] sm:$0xff] }
 0x6d9   : > { %3246 = vmatpush1.msra.mxu1 %v2939_v56  ;;  %3229 = vmatmul.mubr.f32.vlgmr.msra.gmra.mxu0 %v7134_v11  ;;  %v2932_v11 = vld [vmem:[%s8580_s9 + $0x868] sm:$0xff] }
 0x6da   : > { %3247 = vmatprep.subr.mxu1 %v2938_v57  ;;  %3299 = vmatprep.mubr.f32.mxu1 %v4655_v1  ;;  %v4333_v57 = vld [vmem:[%s8581_s10] ss:$0 sm:$0xff] }
 0x6db   : > { %3248 = vmatpush1.msra.mxu1 %v2937_v58  ;;  %4488 = vmatprep.subr.mxu0 %v4655_v1 }
 0x6dc   : > { %3249 = vmatprep.subr.mxu1 %v2936_v60  ;;  %4490 = vmatprep.mubr.msk.f32.mxu0 %vm4656_vm1, %v4655_v1 }
 0x6dd   : > { %3250 = vmatpush1.msra.mxu1 %v2935_v61 }
 0x6de   : > { %3251 = vmatprep.subr.mxu1 %v2934_v62  ;;  %v4334_v62 = vld [vmem:[%s8582_s11] ss:$0 sm:$0xff] }
 0x6df   : > { %3252 = vmatpush1.msra.mxu1 %v2933_v26 }
 0x6e0   : > { %3253 = vmatprep.subr.mxu1 %v2932_v11 }
 0x6e1   : > { %3254 = vmatpush1.msra.mxu1 %v2931_v3 }
 0x6e2   : > { %3255 = vmatprep.subr.mxu1 %v2930_v59 }
 0x6e3   : > { %3256 = vmatpush1.msra.mxu1 %v2929_v4 }
 0x6e4   : > { %3257 = vmatprep.subr.mxu1 %v2928_v6  ;;  %v3324_v6 = vld [vmem:[%s8583_s12] sm:$0xff] }
 0x6e5   : > { %3258 = vmatpush1.msra.mxu1 %v2927_v7  ;;  %v3502_v7 = vld [vmem:[%s8584_s13 + $0xf8] sm:$0xff] }
 0x6e6   : > { %3259 = vmatprep.subr.mxu1 %v2926_v8  ;;  %v3501_v8 = vld [vmem:[%s8584_s13 + $0xf0] sm:$0xff] }
 0x6e7   : > { %3260 = vmatpush1.msra.mxu1 %v2925_v10  ;;  %v3500_v10 = vld [vmem:[%s8584_s13 + $0xe8] sm:$0xff] }
 0x6e8   : > { %3261 = vmatprep.subr.mxu1 %v2924_v12  ;;  %v3499_v12 = vld [vmem:[%s8584_s13 + $0xe0] sm:$0xff] }
 0x6e9   : > { %3262 = vmatpush1.msra.mxu1 %v2923_v13  ;;  %v3325_v13 = vld [vmem:[%s8583_s12 + $0x8] sm:$0xff] }
 0x6ea   : > { %3263 = vmatprep.subr.mxu1 %v2922_v16  ;;  %v3498_v16 = vld [vmem:[%s8584_s13 + $0xd8] sm:$0xff] }
 0x6eb   : > { %3264 = vmatpush1.msra.mxu1 %v2921_v17  ;;  %v3497_v17 = vld [vmem:[%s8584_s13 + $0xd0] sm:$0xff] }
 0x6ec   : > { %3265 = vmatprep.subr.mxu1 %v2920_v18  ;;  %v3496_v18 = vld [vmem:[%s8584_s13 + $0xc8] sm:$0xff] }
 0x6ed   : > { %3266 = vmatpush1.msra.mxu1 %v2919_v19  ;;  %v3495_v19 = vld [vmem:[%s8584_s13 + $0xc0] sm:$0xff] }
 0x6ee   : > { %3300 = vmatmul.mubr.f32.vlgmr.msra.gmra.mxu1 %v7186_v39  ;;  %3830 = vmatprep.subr.mxu1 %v3566_v22  ;;  %v3562_v39 = vld [vmem:[%s8584_s13 + $0x2d8] sm:$0xff]  ;;  %v3326_v22 = vld [vmem:[%s8583_s12 + $0x10] sm:$0xff] }
 0x6ef   : > { %3831 = vmatpush1.msra.mxu1 %v3565_v23  ;;  %v3494_v23 = vld [vmem:[%s8584_s13 + $0xb8] sm:$0xff] }
 0x6f0   : > { %3832 = vmatprep.subr.mxu1 %v3564_v25  ;;  %v3493_v25 = vld [vmem:[%s8584_s13 + $0xb0] sm:$0xff] }
 0x6f1   : > { %3833 = vmatpush1.msra.mxu1 %v3563_v28  ;;  %v3492_v28 = vld [vmem:[%s8584_s13 + $0xa8] sm:$0xff] }
 0x6f2   : > { %3834 = vmatprep.subr.mxu1 %v3562_v39  ;;  %v3491_v39 = vld [vmem:[%s8584_s13 + $0xa0] sm:$0xff] }
 0x6f3   : > { %3835 = vmatpush1.msra.mxu1 %v3561_v29  ;;  %v3327_v29 = vld [vmem:[%s8583_s12 + $0x18] sm:$0xff] }
 0x6f4   : > { %3836 = vmatprep.subr.mxu1 %v3560_v30  ;;  %v3490_v30 = vld [vmem:[%s8584_s13 + $0x98] sm:$0xff] }
 0x6f5   : > { %3837 = vmatpush1.msra.mxu1 %v3559_v32  ;;  %v3489_v32 = vld [vmem:[%s8584_s13 + $0x90] sm:$0xff] }
 0x6f6   : > { %3838 = vmatprep.subr.mxu1 %v3558_v35  ;;  %v3488_v35 = vld [vmem:[%s8584_s13 + $0x88] sm:$0xff] }
 0x6f7   : > { %3839 = vmatpush1.msra.mxu1 %v3557_v37  ;;  %v3487_v37 = vld [vmem:[%s8584_s13 + $0x80] sm:$0xff] }
 0x6f8   : > { %3840 = vmatprep.subr.mxu1 %v3556_v2  ;;  %v3328_v2 = vld [vmem:[%s8583_s12 + $0x20] sm:$0xff] }
 0x6f9   : > { %3841 = vmatpush1.msra.mxu1 %v3555_v63  ;;  %v3486_v63 = vld [vmem:[%s8584_s13 + $0x78] sm:$0xff] }
 0x6fa   : > { %3842 = vmatprep.subr.mxu1 %v3554_v0  ;;  %v3485_v0 = vld [vmem:[%s8584_s13 + $0x70] sm:$0xff] }
 0x6fb   : > { %3843 = vmatpush1.msra.mxu1 %v3553_v24  ;;  %v3484_v24 = vld [vmem:[%s8584_s13 + $0x68] sm:$0xff] }
 0x6fc   : > { %3844 = vmatprep.subr.mxu1 %v3552_v20  ;;  %v3483_v20 = vld [vmem:[%s8584_s13 + $0x60] sm:$0xff] }
 0x6fd   : > { %3845 = vmatpush1.msra.mxu1 %v3551_v44  ;;  %v3329_v44 = vld [vmem:[%s8583_s12 + $0x28] sm:$0xff] }
 0x6fe   : > { %3846 = vmatprep.subr.mxu1 %v3550_v31  ;;  %v3482_v31 = vld [vmem:[%s8584_s13 + $0x58] sm:$0xff] }
 0x6ff   : > { %3847 = vmatpush1.msra.mxu1 %v3549_v51  ;;  %v3481_v51 = vld [vmem:[%s8584_s13 + $0x50] sm:$0xff] }
 0x700   : > { %3848 = vmatprep.subr.mxu1 %v3548_v48  ;;  %v3480_v48 = vld [vmem:[%s8584_s13 + $0x48] sm:$0xff] }
 0x701   : > { %3849 = vmatpush1.msra.mxu1 %v3547_v14  ;;  %v3479_v14 = vld [vmem:[%s8584_s13 + $0x40] sm:$0xff] }
 0x702   : > { %3850 = vmatprep.subr.mxu1 %v3546_v50  ;;  %v3330_v50 = vld [vmem:[%s8583_s12 + $0x30] sm:$0xff] }
 0x703   : > { %3851 = vmatpush1.msra.mxu1 %v3545_v41  ;;  %v3478_v41 = vld [vmem:[%s8584_s13 + $0x38] sm:$0xff] }
 0x704   : > { %3852 = vmatprep.subr.mxu1 %v3544_v5  ;;  %v3477_v5 = vld [vmem:[%s8584_s13 + $0x30] sm:$0xff] }
 0x705   : > { %3853 = vmatpush1.msra.mxu1 %v3543_v46  ;;  %v3476_v46 = vld [vmem:[%s8584_s13 + $0x28] sm:$0xff] }
 0x706   : > { %3854 = vmatprep.subr.mxu1 %v3542_v33  ;;  %v3475_v33 = vld [vmem:[%s8584_s13 + $0x20] sm:$0xff] }
 0x707   : > { %3855 = vmatpush1.msra.mxu1 %v3541_v43  ;;  %v3331_v43 = vld [vmem:[%s8583_s12 + $0x38] sm:$0xff] }
 0x708   : > { %3856 = vmatprep.subr.mxu1 %v3540_v27  ;;  %v3474_v27 = vld [vmem:[%s8584_s13 + $0x18] sm:$0xff] }
 0x709   : > { %3857 = vmatpush1.msra.mxu1 %v3539_v45  ;;  %v3473_v45 = vld [vmem:[%s8584_s13 + $0x10] sm:$0xff] }
 0x70a   : > { %3858 = vmatprep.subr.mxu1 %v3538_v21  ;;  %v3472_v21 = vld [vmem:[%s8584_s13 + $0x8] sm:$0xff] }
 0x74e   : > { %v3017_v15 = vpop.f32.mrf.mxu1 }
 0x750   : > { %v3019_v38 = vpop.f32.mrf.mxu1 }
 0x756   : > { %v3088_v9 = vpop.f32.mrf.mxu0 }
 0x757   : > { %v3089_v49 = vadd.f32 %v3088_v9, %v3017_v15  ;;  %v3471_v15 = vld [vmem:[%s8584_s13] sm:$0xff] }
 0x758   : > { %v3090_v42 = vpop.f32.mrf.mxu0  ;;  %v3332_v9 = vld [vmem:[%s8583_s12 + $0x40] sm:$0xff] }
 0x759   : > { %v3091_v53 = vadd.f32 %v3090_v42, %v3019_v38  ;;  %v3534_v38 = vld [vmem:[%s8584_s13 + $0x1f8] sm:$0xff]  ;;  %v3533_v42 = vld [vmem:[%s8584_s13 + $0x1f0] sm:$0xff] }
 0x78e   : > { %v3159_v47 = vpop.f32.mrf.mxu1 }
 0x78f   : > { %v3160_v36 = vadd.f32 %v3159_v47, %v3089_v49  ;;  %v3532_v47 = vld [vmem:[%s8584_s13 + $0x1e8] sm:$0xff]  ;;  %v3530_v49 = vld [vmem:[%s8584_s13 + $0x1d8] sm:$0xff] }
 0x790   : > { %v3161_v52 = vpop.f32.mrf.mxu1 }
 0x791   : > { %v3162_v34 = vadd.f32 %v3161_v52, %v3091_v53  ;;  %v3529_v52 = vld [vmem:[%s8584_s13 + $0x1d0] sm:$0xff]  ;;  %v3528_v53 = vld [vmem:[%s8584_s13 + $0x1c8] sm:$0xff] }
 0x799   : > { %v3230_v40 = vpop.f32.mrf.mxu0 }
 0x79a   : > { %v3231_v55 = vadd.f32 %v3230_v40, %v3160_v36  ;;  %v3531_v40 = vld [vmem:[%s8584_s13 + $0x1e0] sm:$0xff] }
 0x79b   : > { %v3232_v54 = vpop.f32.mrf.mxu0  ;;  %v3527_v36 = vld [vmem:[%s8584_s13 + $0x1c0] sm:$0xff] }
 0x79c   : > { %v3233_v58 = vadd.f32 %v3232_v54, %v3162_v34  ;;  %v3526_v54 = vld [vmem:[%s8584_s13 + $0x1b8] sm:$0xff]  ;;  %v3525_v34 = vld [vmem:[%s8584_s13 + $0x1b0] sm:$0xff] }
 0x7ae   : > { %v3301_v56 = vpop.f32.mrf.mxu1 }
 0x7af   : > { %v3302_v60 = vadd.f32 %v3301_v56, %v3231_v55  ;;  %v3524_v55 = vld [vmem:[%s8584_s13 + $0x1a8] sm:$0xff]  ;;  %v3523_v56 = vld [vmem:[%s8584_s13 + $0x1a0] sm:$0xff] }
 0x7b0   : > { %v3303_v61 = vpop.f32.mrf.mxu1 }
 0x7b1   : > { %v3313_v26 = vadd.f32 %v4333_v57, %v3302_v60  ;;  %v3304_v11 = vadd.f32 %v3303_v61, %v3233_v58  ;;  %v3522_v57 = vld [vmem:[%s8584_s13 + $0x198] sm:$0xff]  ;;  %v3521_v58 = vld [vmem:[%s8584_s13 + $0x190] sm:$0xff]  ;;  %v3520_v60 = vld [vmem:[%s8584_s13 + $0x188] sm:$0xff] }
 0x7b2   : > { %v3519_v61 = vld [vmem:[%s8584_s13 + $0x180] sm:$0xff] }
 0x7b3   : > { %v3314_v3 = vmax.f32 %v3313_v26, 0.0  ;;  %v3322_v59 = vadd.f32 %v4334_v62, %v3304_v11  ;;  %v3537_v62 = vld [vmem:[%s8584_s13 + $0x210] sm:$0xff]  ;;  %v3518_v26 = vld [vmem:[%s8584_s13 + $0x178] sm:$0xff]  ;;  %v3536_v11 = vld [vmem:[%s8584_s13 + $0x208] sm:$0xff] }
 0x7b4   : > { %3859 = vmatpush1.msra.mxu1 %v3537_v62  ;;  %v3624_v62 = vld [vmem:[%s8584_s13 + $0x4c8] sm:$0xff] }
 0x7b5   : > { %v3323_v4 = vadd.f32 %v3322_v59, %v3314_v3  ;;  %v3517_v3 = vld [vmem:[%s8584_s13 + $0x170] sm:$0xff]  ;;  %3860 = vmatprep.subr.mxu1 %v3536_v11  ;;  %v3535_v59 = vld [vmem:[%s8584_s13 + $0x200] sm:$0xff] }
 0x7b6   : > { %3861 = vmatpush1.msra.mxu1 %v3535_v59  ;;  %v3621_v59 = vld [vmem:[%s8584_s13 + $0x4b0] sm:$0xff] }
 0x7b7   : > { %4489 = vmatpush3.msra.mxu0 %v3323_v4  ;;  %v3516_v4 = vld [vmem:[%s8584_s13 + $0x168] sm:$0xff] }
 0x7b8   : > { %4491 = vmatmul.mubr.msk.f32.vlgmr.msra.gmra.mxu0 %vm3333_vm3, %v3324_v6  ;;  %3759 = vmatprep.subr.mxu0 %v3502_v7  ;;  %v3598_v6 = vld [vmem:[%s8584_s13 + $0x3f8] sm:$0xff]  ;;  %v3515_v7 = vld [vmem:[%s8584_s13 + $0x160] sm:$0xff] }
 0x7b9   : > { %4493 = vmatprep.mubr.msk.f32.mxu0 %vm4656_vm1, %v4655_v1  ;;  %3760 = vmatpush1.msra.mxu0 %v3501_v8  ;;  %v3597_v8 = vld [vmem:[%s8584_s13 + $0x3f0] sm:$0xff] }
 0x7ba   : > { %3761 = vmatprep.subr.mxu0 %v3500_v10  ;;  %3862 = vmatprep.subr.mxu1 %v3598_v6  ;;  %v3514_v10 = vld [vmem:[%s8584_s13 + $0x158] sm:$0xff]  ;;  %v3693_v6 = vld [vmem:[%s8584_s13 + $0x6f0] sm:$0xff] }
 0x7bb   : > { %3762 = vmatpush1.msra.mxu0 %v3499_v12  ;;  %3863 = vmatpush2.msra.mxu1 %v3597_v8  ;;  %v3596_v12 = vld [vmem:[%s8584_s13 + $0x3e8] sm:$0xff] }
 0x7bc   : > { %4494 = vmatmul.mubr.msk.f32.gmra.mxu0 %vm3333_vm3, %v3325_v13  ;;  %3763 = vmatprep.subr.mxu0 %v3498_v16  ;;  %v3513_v13 = vld [vmem:[%s8584_s13 + $0x150] sm:$0xff]  ;;  %v3595_v16 = vld [vmem:[%s8584_s13 + $0x3e0] sm:$0xff]  ;;  %v3692_v8 = vld [vmem:[%s8584_s13 + $0x6e8] sm:$0xff] }
 0x7bd   : > { %4496 = vmatprep.mubr.msk.f32.mxu0 %vm4656_vm1, %v4655_v1  ;;  %3764 = vmatpush1.msra.mxu0 %v3497_v17  ;;  %v3512_v17 = vld [vmem:[%s8584_s13 + $0x148] sm:$0xff] }
 0x7be   : > { %3765 = vmatprep.subr.mxu0 %v3496_v18  ;;  %3864 = vmatprep.subr.mxu1 %v3596_v12  ;;  %v3594_v18 = vld [vmem:[%s8584_s13 + $0x3d8] sm:$0xff]  ;;  %v3691_v12 = vld [vmem:[%s8584_s13 + $0x6e0] sm:$0xff] }
 0x7bf   : > { %3766 = vmatpush1.msra.mxu0 %v3495_v19  ;;  %3865 = vmatpush2.msra.mxu1 %v3595_v16  ;;  %v3511_v19 = vld [vmem:[%s8584_s13 + $0x140] sm:$0xff]  ;;  %v3618_v16 = vld [vmem:[%s8584_s13 + $0x498] sm:$0xff] }
 0x7c0   : > { %4497 = vmatmul.mubr.msk.f32.gmra.mxu0 %vm3333_vm3, %v3326_v22  ;;  %3767 = vmatprep.subr.mxu0 %v3494_v23  ;;  %v3593_v22 = vld [vmem:[%s8584_s13 + $0x3d0] sm:$0xff]  ;;  %v3510_v23 = vld [vmem:[%s8584_s13 + $0x138] sm:$0xff] }
 0x7c1   : > { %4499 = vmatprep.mubr.msk.f32.mxu0 %vm4656_vm1, %v4655_v1  ;;  %3768 = vmatpush1.msra.mxu0 %v3493_v25  ;;  %v3592_v25 = vld [vmem:[%s8584_s13 + $0x3c8] sm:$0xff] }
 0x7c2   : > { %3769 = vmatprep.subr.mxu0 %v3492_v28  ;;  %3866 = vmatprep.subr.mxu1 %v3594_v18  ;;  %v3509_v28 = vld [vmem:[%s8584_s13 + $0x130] sm:$0xff] }
 0x7c3   : > { %3770 = vmatpush1.msra.mxu0 %v3491_v39  ;;  %3867 = vmatpush2.msra.mxu1 %v3593_v22  ;;  %v3591_v39 = vld [vmem:[%s8584_s13 + $0x3c0] sm:$0xff]  ;;  %v3617_v18 = vld [vmem:[%s8584_s13 + $0x490] sm:$0xff] }
 0x7c4   : > { %4500 = vmatmul.mubr.msk.f32.gmra.mxu0 %vm3333_vm3, %v3327_v29  ;;  %3771 = vmatprep.subr.mxu0 %v3490_v30  ;;  %v3508_v29 = vld [vmem:[%s8584_s13 + $0x128] sm:$0xff]  ;;  %v3590_v30 = vld [vmem:[%s8584_s13 + $0x3b8] sm:$0xff] }
 0x7c5   : > { %4502 = vmatprep.mubr.msk.f32.mxu0 %vm4656_vm1, %v4655_v1  ;;  %3772 = vmatpush1.msra.mxu0 %v3489_v32  ;;  %v3589_v32 = vld [vmem:[%s8584_s13 + $0x3b0] sm:$0xff] }
 0x7c6   : > { %3773 = vmatprep.subr.mxu0 %v3488_v35  ;;  %3868 = vmatprep.subr.mxu1 %v3592_v25  ;;  %v3588_v35 = vld [vmem:[%s8584_s13 + $0x3a8] sm:$0xff] }
 0x7c7   : > { %3774 = vmatpush1.msra.mxu0 %v3487_v37  ;;  %3869 = vmatpush2.msra.mxu1 %v3591_v39  ;;  %v3587_v37 = vld [vmem:[%s8584_s13 + $0x3a0] sm:$0xff]  ;;  %v3688_v25 = vld [vmem:[%s8584_s13 + $0x6c8] sm:$0xff] }
 0x7c8   : > { %4503 = vmatmul.mubr.msk.f32.gmra.mxu0 %vm3333_vm3, %v3328_v2  ;;  %3775 = vmatprep.subr.mxu0 %v3486_v63  ;;  %v3586_v2 = vld [vmem:[%s8584_s13 + $0x398] sm:$0xff]  ;;  %v3585_v63 = vld [vmem:[%s8584_s13 + $0x390] sm:$0xff]  ;;  %v3687_v39 = vld [vmem:[%s8584_s13 + $0x6c0] sm:$0xff] }
 0x7c9   : > { %4505 = vmatprep.mubr.msk.f32.mxu0 %vm4656_vm1, %v4655_v1  ;;  %3776 = vmatpush1.msra.mxu0 %v3485_v0  ;;  %v3584_v0 = vld [vmem:[%s8584_s13 + $0x388] sm:$0xff] }
 0x7ca   : > { %3777 = vmatprep.subr.mxu0 %v3484_v24  ;;  %3870 = vmatprep.subr.mxu1 %v3590_v30  ;;  %v3583_v24 = vld [vmem:[%s8584_s13 + $0x380] sm:$0xff]  ;;  %v3614_v30 = vld [vmem:[%s8584_s13 + $0x478] sm:$0xff] }
 0x7cb   : > { %3778 = vmatpush1.msra.mxu0 %v3483_v20  ;;  %3871 = vmatpush2.msra.mxu1 %v3589_v32  ;;  %v3582_v20 = vld [vmem:[%s8584_s13 + $0x378] sm:$0xff] }
 0x7cc   : > { %4506 = vmatmul.mubr.msk.f32.gmra.mxu0 %vm3333_vm3, %v3329_v44  ;;  %3779 = vmatprep.subr.mxu0 %v3482_v31  ;;  %v3507_v44 = vld [vmem:[%s8584_s13 + $0x120] sm:$0xff]  ;;  %v3506_v31 = vld [vmem:[%s8584_s13 + $0x118] sm:$0xff] }
 0x7cd   : > { %4508 = vmatprep.mubr.msk.f32.mxu0 %vm4656_vm1, %v4655_v1  ;;  %3780 = vmatpush1.msra.mxu0 %v3481_v51  ;;  %v3581_v51 = vld [vmem:[%s8584_s13 + $0x370] sm:$0xff]  ;;  %v3686_v32 = vld [vmem:[%s8584_s13 + $0x6b8] sm:$0xff] }
 0x7ce   : > { %3781 = vmatprep.subr.mxu0 %v3480_v48  ;;  %3872 = vmatprep.subr.mxu1 %v3588_v35  ;;  %v3580_v48 = vld [vmem:[%s8584_s13 + $0x368] sm:$0xff]  ;;  %v3613_v35 = vld [vmem:[%s8584_s13 + $0x470] sm:$0xff] }
 0x7cf   : > { %3782 = vmatpush1.msra.mxu0 %v3479_v14  ;;  %3873 = vmatpush2.msra.mxu1 %v3587_v37  ;;  %v3505_v14 = vld [vmem:[%s8584_s13 + $0x110] sm:$0xff] }
 0x7d0   : > { %4509 = vmatmul.mubr.msk.f32.gmra.mxu0 %vm3333_vm3, %v3330_v50  ;;  %3783 = vmatprep.subr.mxu0 %v3478_v41  ;;  %v3504_v50 = vld [vmem:[%s8584_s13 + $0x108] sm:$0xff]  ;;  %v3579_v41 = vld [vmem:[%s8584_s13 + $0x360] sm:$0xff]  ;;  %v3685_v37 = vld [vmem:[%s8584_s13 + $0x6b0] sm:$0xff] }
 0x7d1   : > { %4511 = vmatprep.mubr.msk.f32.mxu0 %vm4656_vm1, %v4655_v1  ;;  %3784 = vmatpush1.msra.mxu0 %v3477_v5  ;;  %v3578_v5 = vld [vmem:[%s8584_s13 + $0x358] sm:$0xff] }
 0x7d2   : > { %3785 = vmatprep.subr.mxu0 %v3476_v46  ;;  %3874 = vmatprep.subr.mxu1 %v3586_v2  ;;  %v3503_v46 = vld [vmem:[%s8584_s13 + $0x100] sm:$0xff] }
 0x7d3   : > { %3786 = vmatpush1.msra.mxu0 %v3475_v33  ;;  %3875 = vmatpush2.msra.mxu1 %v3585_v63  ;;  %v3577_v33 = vld [vmem:[%s8584_s13 + $0x350] sm:$0xff]  ;;  %v3612_v63 = vld [vmem:[%s8584_s13 + $0x468] sm:$0xff] }
 0x7d4   : > { %4512 = vmatmul.mubr.msk.f32.gmra.mxu0 %vm3333_vm3, %v3331_v43  ;;  %3787 = vmatprep.subr.mxu0 %v3474_v27  ;;  %v3630_v43 = vld [vmem:[%s8584_s13 + $0x4f8] sm:$0xff]  ;;  %v3576_v27 = vld [vmem:[%s8584_s13 + $0x348] sm:$0xff] }
 0x7d5   : > { %4514 = vmatprep.mubr.msk.f32.mxu0 %vm4656_vm1, %v4655_v1  ;;  %3788 = vmatpush1.msra.mxu0 %v3473_v45  ;;  %v3575_v45 = vld [vmem:[%s8584_s13 + $0x340] sm:$0xff] }
 0x7d6   : > { %3789 = vmatprep.subr.mxu0 %v3472_v21  ;;  %3876 = vmatprep.subr.mxu1 %v3584_v0  ;;  %v3574_v21 = vld [vmem:[%s8584_s13 + $0x338] sm:$0xff]  ;;  %v3684_v0 = vld [vmem:[%s8584_s13 + $0x6a8] sm:$0xff] }
 0x7d7   : > { %3790 = vmatpush1.msra.mxu0 %v3471_v15  ;;  %3877 = vmatpush2.msra.mxu1 %v3583_v24  ;;  %v3573_v15 = vld [vmem:[%s8584_s13 + $0x330] sm:$0xff]  ;;  %v3611_v24 = vld [vmem:[%s8584_s13 + $0x460] sm:$0xff] }
 0x7d8   : > { %4515 = vmatmul.mubr.msk.f32.gmra.mxu0 %vm3333_vm3, %v3332_v9  ;;  %3791 = vmatprep.subr.mxu0 %v3534_v38  ;;  %v3572_v9 = vld [vmem:[%s8584_s13 + $0x328] sm:$0xff]  ;;  %v3571_v38 = vld [vmem:[%s8584_s13 + $0x320] sm:$0xff] }
 0x7d9   : > { %3792 = vmatpush2.msra.mxu0 %v3533_v42  ;;  %3878 = vmatprep.subr.mxu1 %v3582_v20  ;;  %v3570_v42 = vld [vmem:[%s8584_s13 + $0x318] sm:$0xff]  ;;  %v3683_v20 = vld [vmem:[%s8584_s13 + $0x6a0] sm:$0xff] }
 0x7da   : > { %3793 = vmatprep.subr.mxu0 %v3532_v47  ;;  %3879 = vmatpush2.msra.mxu1 %v3581_v51  ;;  %v3569_v47 = vld [vmem:[%s8584_s13 + $0x310] sm:$0xff]  ;;  %v3682_v51 = vld [vmem:[%s8584_s13 + $0x698] sm:$0xff] }
 0x7db   : > { %3794 = vmatpush2.msra.mxu0 %v3531_v40  ;;  %3880 = vmatprep.subr.mxu1 %v3580_v48  ;;  %v3568_v40 = vld [vmem:[%s8584_s13 + $0x308] sm:$0xff]  ;;  %v3609_v48 = vld [vmem:[%s8584_s13 + $0x450] sm:$0xff] }
 0x7dc   : > { %3795 = vmatprep.subr.mxu0 %v3530_v49  ;;  %3881 = vmatpush2.msra.mxu1 %v3579_v41  ;;  %v3567_v49 = vld [vmem:[%s8584_s13 + $0x300] sm:$0xff]  ;;  %v3608_v41 = vld [vmem:[%s8584_s13 + $0x448] sm:$0xff] }
 0x7dd   : > { %3796 = vmatpush2.msra.mxu0 %v3529_v52  ;;  %3882 = vmatprep.subr.mxu1 %v3578_v5  ;;  %v3694_v52 = vld [vmem:[%s8584_s13 + $0x6f8] sm:$0xff]  ;;  %v3680_v5 = vld [vmem:[%s8584_s13 + $0x688] sm:$0xff] }
 0x7de   : > { %3797 = vmatprep.subr.mxu0 %v3528_v53  ;;  %3883 = vmatpush2.msra.mxu1 %v3577_v33  ;;  %v3679_v33 = vld [vmem:[%s8584_s13 + $0x680] sm:$0xff] }
 0x7df   : > { %3798 = vmatpush2.msra.mxu0 %v3527_v36  ;;  %3884 = vmatprep.subr.mxu1 %v3576_v27  ;;  %v3606_v27 = vld [vmem:[%s8584_s13 + $0x438] sm:$0xff] }
 0x7e0   : > { %3799 = vmatprep.subr.mxu0 %v3526_v54  ;;  %3885 = vmatpush2.msra.mxu1 %v3575_v45  ;;  %v3678_v45 = vld [vmem:[%s8584_s13 + $0x678] sm:$0xff] }
 0x7e1   : > { %3800 = vmatpush2.msra.mxu0 %v3525_v34  ;;  %3886 = vmatprep.subr.mxu1 %v3574_v21  ;;  %v3629_v34 = vld [vmem:[%s8584_s13 + $0x4f0] sm:$0xff] }
 0x7e2   : > { %3801 = vmatprep.subr.mxu0 %v3524_v55  ;;  %3887 = vmatpush2.msra.mxu1 %v3573_v15  ;;  %v3628_v55 = vld [vmem:[%s8584_s13 + $0x4e8] sm:$0xff]  ;;  %v3605_v21 = vld [vmem:[%s8584_s13 + $0x430] sm:$0xff] }
 0x7e3   : > { %3802 = vmatpush2.msra.mxu0 %v3523_v56  ;;  %3888 = vmatprep.subr.mxu1 %v3572_v9  ;;  %v3627_v56 = vld [vmem:[%s8584_s13 + $0x4e0] sm:$0xff]  ;;  %v3677_v15 = vld [vmem:[%s8584_s13 + $0x670] sm:$0xff] }
 0x7e4   : > { %3803 = vmatprep.subr.mxu0 %v3522_v57  ;;  %3889 = vmatpush2.msra.mxu1 %v3571_v38  ;;  %v3604_v38 = vld [vmem:[%s8584_s13 + $0x428] sm:$0xff] }
 0x7e5   : > { %3804 = vmatpush2.msra.mxu0 %v3521_v58  ;;  %3890 = vmatprep.subr.mxu1 %v3570_v42  ;;  %v3626_v58 = vld [vmem:[%s8584_s13 + $0x4d8] sm:$0xff]  ;;  %v3676_v42 = vld [vmem:[%s8584_s13 + $0x668] sm:$0xff] }
 0x7e6   : > { %3805 = vmatprep.subr.mxu0 %v3520_v60  ;;  %3891 = vmatpush2.msra.mxu1 %v3569_v47  ;;  %v3625_v60 = vld [vmem:[%s8584_s13 + $0x4d0] sm:$0xff]  ;;  %v3603_v47 = vld [vmem:[%s8584_s13 + $0x420] sm:$0xff] }
 0x7e7   : > { %3806 = vmatpush2.msra.mxu0 %v3519_v61  ;;  %3892 = vmatprep.subr.mxu1 %v3568_v40  ;;  %v3675_v40 = vld [vmem:[%s8584_s13 + $0x660] sm:$0xff] }
 0x7e8   : > { %3807 = vmatprep.subr.mxu0 %v3518_v26  ;;  %3893 = vmatpush2.msra.mxu1 %v3567_v49  ;;  %v3623_v26 = vld [vmem:[%s8584_s13 + $0x4c0] sm:$0xff] }
 0x7e9   : > { %3808 = vmatpush2.msra.mxu0 %v3517_v3  ;;  %3972 = vmatprep.subr.mxu1 %v3694_v52  ;;  %v3622_v3 = vld [vmem:[%s8584_s13 + $0x4b8] sm:$0xff] }
 0x7ea   : > { %3809 = vmatprep.subr.mxu0 %v3516_v4  ;;  %v3602_v52 = vld [vmem:[%s8584_s13 + $0x418] sm:$0xff] }
 0x7eb   : > { %3810 = vmatpush2.msra.mxu0 %v3515_v7  ;;  %v3620_v7 = vld [vmem:[%s8584_s13 + $0x4a8] sm:$0xff] }
 0x7ec   : > { %3811 = vmatprep.subr.mxu0 %v3514_v10  ;;  %v3619_v10 = vld [vmem:[%s8584_s13 + $0x4a0] sm:$0xff] }
 0x7ed   : > { %3812 = vmatpush2.msra.mxu0 %v3513_v13 }
 0x7ee   : > { %3813 = vmatprep.subr.mxu0 %v3512_v17  ;;  %v3690_v17 = vld [vmem:[%s8584_s13 + $0x6d8] sm:$0xff] }
 0x7ef   : > { %3814 = vmatpush2.msra.mxu0 %v3511_v19  ;;  %v3689_v19 = vld [vmem:[%s8584_s13 + $0x6d0] sm:$0xff] }
 0x7f0   : > { %3815 = vmatprep.subr.mxu0 %v3510_v23  ;;  %v3616_v23 = vld [vmem:[%s8584_s13 + $0x488] sm:$0xff] }
 0x7f1   : > { %3816 = vmatpush2.msra.mxu0 %v3509_v28  ;;  %v3615_v28 = vld [vmem:[%s8584_s13 + $0x480] sm:$0xff] }
 0x7f2   : > { %3817 = vmatprep.subr.mxu0 %v3508_v29 }
 0x7f3   : > { %3818 = vmatpush2.msra.mxu0 %v3507_v44 }
 0x7f4   : > { %3819 = vmatprep.subr.mxu0 %v3506_v31  ;;  %v3610_v31 = vld [vmem:[%s8584_s13 + $0x458] sm:$0xff] }
 0x7f5   : > { %3820 = vmatpush2.msra.mxu0 %v3505_v14  ;;  %v3681_v14 = vld [vmem:[%s8584_s13 + $0x690] sm:$0xff] }
 0x7f6   : > { %3821 = vmatprep.subr.mxu0 %v3504_v50 }
 0x7f7   : > { %3822 = vmatpush2.msra.mxu0 %v3503_v46  ;;  %v3607_v46 = vld [vmem:[%s8584_s13 + $0x440] sm:$0xff] }
 0x7f8   : > { %3901 = vmatprep.subr.mxu0 %v3630_v43 }
 0x878   : > { %v3427_v53 = vpop.f32.mrf.mxu0 }
 0x87a   : > { %v4492_v36 = vpop.f32.mrf.mxu0 }
 0x87b   : > { %v3601_v36 = vld [vmem:[%s8584_s13 + $0x410] sm:$0xff] }
 0x87c   : > { %v3432_v54 = vpop.f32.mrf.mxu0 }
 0x87d   : > { %3823 = vmatprep.mubr.f32.mxu0 %v3432_v54  ;;  %v3673_v54 = vld [vmem:[%s8584_s13 + $0x650] sm:$0xff] }
 0x87e   : > { %3824 = vmatmul.mubr.f32.vlgmr.msra.gmra.mxu0 %v3427_v53  ;;  %v4495_v57 = vpop.f32.mrf.mxu0  ;;  %v3674_v53 = vld [vmem:[%s8584_s13 + $0x658] sm:$0xff] }
 0x87f   : > { %3902 = vmatpush1.msra.mxu0 %v3629_v34  ;;  %v3599_v57 = vld [vmem:[%s8584_s13 + $0x400] sm:$0xff] }
 0x880   : > { %3903 = vmatprep.subr.mxu0 %v3628_v55  ;;  %v3437_v61 = vpop.f32.mrf.mxu0  ;;  %v3600_v55 = vld [vmem:[%s8584_s13 + $0x408] sm:$0xff] }
 0x881   : > { %3904 = vmatpush1.msra.mxu0 %v3627_v56  ;;  %v3672_v56 = vld [vmem:[%s8584_s13 + $0x648] sm:$0xff] }
 0x882   : > { %3905 = vmatprep.subr.mxu0 %v3626_v58  ;;  %v4498_v11 = vpop.f32.mrf.mxu0  ;;  %v3671_v58 = vld [vmem:[%s8584_s13 + $0x640] sm:$0xff] }
 0x883   : > { %3906 = vmatpush1.msra.mxu0 %v3625_v60  ;;  %v3669_v11 = vld [vmem:[%s8584_s13 + $0x630] sm:$0xff] }
 0x884   : > { %3907 = vmatprep.subr.mxu0 %v3624_v62  ;;  %v3442_v4 = vpop.f32.mrf.mxu0  ;;  %v3670_v62 = vld [vmem:[%s8584_s13 + $0x638] sm:$0xff] }
 0x885   : > { %3908 = vmatpush1.msra.mxu0 %v3623_v26  ;;  %3894 = vmatprep.mubr.f32.mxu1 %v3442_v4  ;;  %v3661_v26 = vld [vmem:[%s8584_s13 + $0x5f0] sm:$0xff]  ;;  %v3659_v4 = vld [vmem:[%s8584_s13 + $0x5e0] sm:$0xff] }
 0x886   : > { %3909 = vmatprep.subr.mxu0 %v3622_v3  ;;  %3895 = vmatmul.mubr.f32.vlgmr.msra.gmra.mxu1 %v3437_v61  ;;  %v4501_v13 = vpop.f32.mrf.mxu0  ;;  %v3662_v61 = vld [vmem:[%s8584_s13 + $0x5f8] sm:$0xff]  ;;  %v3660_v3 = vld [vmem:[%s8584_s13 + $0x5e8] sm:$0xff] }
 0x887   : > { %3910 = vmatpush1.msra.mxu0 %v3621_v59  ;;  %3973 = vmatpush1.msra.mxu1 %v3693_v6  ;;  %v3668_v59 = vld [vmem:[%s8584_s13 + $0x628] sm:$0xff]  ;;  %v3667_v6 = vld [vmem:[%s8584_s13 + $0x620] sm:$0xff] }
 0x888   : > { %3911 = vmatprep.subr.mxu0 %v3620_v7  ;;  %3974 = vmatprep.subr.mxu1 %v3692_v8  ;;  %v8023_v22 = vpop.f32.mrf.mxu0  ;;  %v3658_v7 = vld [vmem:[%s8584_s13 + $0x5d8] sm:$0xff]  ;;  %v3656_v13 = vld [vmem:[%s8584_s13 + $0x5c8] sm:$0xff] }
 0x889   : > { %3912 = vmatpush1.msra.mxu0 %v3619_v10  ;;  %3975 = vmatpush1.msra.mxu1 %v3691_v12  ;;  %v3666_v8 = vld [vmem:[%s8584_s13 + $0x618] sm:$0xff]  ;;  %v3657_v10 = vld [vmem:[%s8584_s13 + $0x5d0] sm:$0xff] }
 0x88a   : > { %3913 = vmatprep.subr.mxu0 %v3618_v16  ;;  %3976 = vmatprep.subr.mxu1 %v3690_v17  ;;  %v4504_v29 = vpop.f32.mrf.mxu0  ;;  %v3665_v12 = vld [vmem:[%s8584_s13 + $0x610] sm:$0xff]  ;;  %v3664_v16 = vld [vmem:[%s8584_s13 + $0x608] sm:$0xff]  ;;  %v3655_v17 = vld [vmem:[%s8584_s13 + $0x5c0] sm:$0xff] }
 0x88b   : > { %3914 = vmatpush1.msra.mxu0 %v3617_v18  ;;  %3977 = vmatpush1.msra.mxu1 %v3689_v19  ;;  %v3663_v18 = vld [vmem:[%s8584_s13 + $0x600] sm:$0xff]  ;;  %v3654_v19 = vld [vmem:[%s8584_s13 + $0x5b8] sm:$0xff] }
 0x88c   : > { %3915 = vmatprep.subr.mxu0 %v3616_v23  ;;  %3978 = vmatprep.subr.mxu1 %v3688_v25  ;;  %v8049_v2 = vpop.f32.mrf.mxu0  ;;  %v3726_v23 = vld [vmem:[%s8584_s13 + $0x7f8] sm:$0xff]  ;;  %v3653_v25 = vld [vmem:[%s8584_s13 + $0x5b0] sm:$0xff]  ;;  %v3651_v29 = vld [vmem:[%s8584_s13 + $0x5a0] sm:$0xff] }
 0x88d   : > { %3916 = vmatpush1.msra.mxu0 %v3615_v28  ;;  %3979 = vmatpush1.msra.mxu1 %v3687_v39  ;;  %v3725_v28 = vld [vmem:[%s8584_s13 + $0x7f0] sm:$0xff]  ;;  %v3652_v39 = vld [vmem:[%s8584_s13 + $0x5a8] sm:$0xff] }
 0x88e   : > { %3917 = vmatprep.subr.mxu0 %v3614_v30  ;;  %3980 = vmatprep.subr.mxu1 %v3686_v32  ;;  %v4507_v44 = vpop.f32.mrf.mxu0  ;;  %v3724_v30 = vld [vmem:[%s8584_s13 + $0x7e8] sm:$0xff]  ;;  %v3650_v32 = vld [vmem:[%s8584_s13 + $0x598] sm:$0xff] }
 0x88f   : > { %3918 = vmatpush1.msra.mxu0 %v3613_v35  ;;  %3981 = vmatpush1.msra.mxu1 %v3685_v37  ;;  %v3723_v35 = vld [vmem:[%s8584_s13 + $0x7e0] sm:$0xff]  ;;  %v3649_v37 = vld [vmem:[%s8584_s13 + $0x590] sm:$0xff]  ;;  %v3646_v44 = vld [vmem:[%s8584_s13 + $0x578] sm:$0xff] }
 0x890   : > { %3919 = vmatprep.subr.mxu0 %v3612_v63  ;;  %3982 = vmatprep.subr.mxu1 %v3684_v0  ;;  %v8075_v50 = vpop.f32.mrf.mxu0  ;;  %v3722_v63 = vld [vmem:[%s8584_s13 + $0x7d8] sm:$0xff]  ;;  %v3648_v0 = vld [vmem:[%s8584_s13 + $0x588] sm:$0xff] }
 0x891   : > { %3920 = vmatpush1.msra.mxu0 %v3611_v24  ;;  %3983 = vmatpush1.msra.mxu1 %v3683_v20  ;;  %v3721_v24 = vld [vmem:[%s8584_s13 + $0x7d0] sm:$0xff]  ;;  %v3647_v20 = vld [vmem:[%s8584_s13 + $0x580] sm:$0xff] }
 0x892   : > { %3921 = vmatprep.subr.mxu0 %v3610_v31  ;;  %3984 = vmatprep.subr.mxu1 %v3682_v51  ;;  %v4510_v43 = vpop.f32.mrf.mxu0  ;;  %v3719_v31 = vld [vmem:[%s8584_s13 + $0x7c0] sm:$0xff]  ;;  %v3645_v51 = vld [vmem:[%s8584_s13 + $0x570] sm:$0xff] }
 0x893   : > { %3922 = vmatpush1.msra.mxu0 %v3609_v48  ;;  %3985 = vmatpush1.msra.mxu1 %v3681_v14  ;;  %v3718_v48 = vld [vmem:[%s8584_s13 + $0x7b8] sm:$0xff]  ;;  %v3644_v14 = vld [vmem:[%s8584_s13 + $0x568] sm:$0xff]  ;;  %v3715_v43 = vld [vmem:[%s8584_s13 + $0x7a0] sm:$0xff] }
 0x894   : > { %3923 = vmatprep.subr.mxu0 %v3608_v41  ;;  %3986 = vmatprep.subr.mxu1 %v3680_v5  ;;  %v8101_v9 = vpop.f32.mrf.mxu0  ;;  %v3717_v41 = vld [vmem:[%s8584_s13 + $0x7b0] sm:$0xff]  ;;  %v3643_v5 = vld [vmem:[%s8584_s13 + $0x560] sm:$0xff] }
 0x895   : > { %3924 = vmatpush1.msra.mxu0 %v3607_v46  ;;  %3987 = vmatpush1.msra.mxu1 %v3679_v33  ;;  %v3716_v46 = vld [vmem:[%s8584_s13 + $0x7a8] sm:$0xff]  ;;  %v3642_v33 = vld [vmem:[%s8584_s13 + $0x558] sm:$0xff] }
 0x896   : > { %3925 = vmatprep.subr.mxu0 %v3606_v27  ;;  %3988 = vmatprep.subr.mxu1 %v3678_v45  ;;  %v4513_v49 = vpop.f32.mrf.mxu0  ;;  %v3641_v27 = vld [vmem:[%s8584_s13 + $0x550] sm:$0xff]  ;;  %v3714_v45 = vld [vmem:[%s8584_s13 + $0x798] sm:$0xff] }
 0x897   : > { %3926 = vmatpush1.msra.mxu0 %v3605_v21  ;;  %3989 = vmatpush1.msra.mxu1 %v3677_v15  ;;  %v3640_v21 = vld [vmem:[%s8584_s13 + $0x548] sm:$0xff]  ;;  %v3713_v15 = vld [vmem:[%s8584_s13 + $0x790] sm:$0xff] }
 0x898   : > { %3927 = vmatprep.subr.mxu0 %v3604_v38  ;;  %3990 = vmatprep.subr.mxu1 %v3676_v42  ;;  %v8127_v34 = vpop.f32.mrf.mxu0  ;;  %v3639_v38 = vld [vmem:[%s8584_s13 + $0x540] sm:$0xff]  ;;  %v3712_v42 = vld [vmem:[%s8584_s13 + $0x788] sm:$0xff]  ;;  %v3637_v49 = vld [vmem:[%s8584_s13 + $0x530] sm:$0xff] }
 0x899   : > { %3928 = vmatpush1.msra.mxu0 %v3603_v47  ;;  %3991 = vmatpush1.msra.mxu1 %v3675_v40  ;;  %v3638_v47 = vld [vmem:[%s8584_s13 + $0x538] sm:$0xff]  ;;  %v3711_v40 = vld [vmem:[%s8584_s13 + $0x780] sm:$0xff] }
 0x89a   : > { %3929 = vmatprep.subr.mxu0 %v3602_v52  ;;  %3992 = vmatprep.subr.mxu1 %v3674_v53  ;;  %v4516_v60 = vpop.f32.mrf.mxu0  ;;  %v3710_v52 = vld [vmem:[%s8584_s13 + $0x778] sm:$0xff]  ;;  %v3636_v53 = vld [vmem:[%s8584_s13 + $0x528] sm:$0xff] }
 0x89b   : > { %3930 = vmatpush1.msra.mxu0 %v3601_v36  ;;  %3993 = vmatpush1.msra.mxu1 %v3673_v54  ;;  %v3709_v36 = vld [vmem:[%s8584_s13 + $0x770] sm:$0xff]  ;;  %v3635_v54 = vld [vmem:[%s8584_s13 + $0x520] sm:$0xff]  ;;  %v3706_v60 = vld [vmem:[%s8584_s13 + $0x758] sm:$0xff] }
 0x89c   : > { %3931 = vmatprep.subr.mxu0 %v3600_v55  ;;  %3994 = vmatprep.subr.mxu1 %v3672_v56  ;;  %v3708_v55 = vld [vmem:[%s8584_s13 + $0x768] sm:$0xff]  ;;  %v3634_v56 = vld [vmem:[%s8584_s13 + $0x518] sm:$0xff] }
 0x89d   : > { %3932 = vmatpush1.msra.mxu0 %v3599_v57  ;;  %3995 = vmatpush1.msra.mxu1 %v3671_v58  ;;  %v3707_v57 = vld [vmem:[%s8584_s13 + $0x760] sm:$0xff]  ;;  %v3633_v58 = vld [vmem:[%s8584_s13 + $0x510] sm:$0xff] }
 0x89e   : > { %3933 = vmatprep.subr.mxu0 %v3662_v61  ;;  %3996 = vmatprep.subr.mxu1 %v3670_v62  ;;  %v3632_v61 = vld [vmem:[%s8584_s13 + $0x508] sm:$0xff]  ;;  %v3705_v62 = vld [vmem:[%s8584_s13 + $0x750] sm:$0xff] }
 0x89f   : > { %3934 = vmatpush2.msra.mxu0 %v3661_v26  ;;  %3997 = vmatpush1.msra.mxu1 %v3669_v11  ;;  %v3631_v26 = vld [vmem:[%s8584_s13 + $0x500] sm:$0xff]  ;;  %v3704_v11 = vld [vmem:[%s8584_s13 + $0x748] sm:$0xff] }
 0x8a0   : > { %3935 = vmatprep.subr.mxu0 %v3660_v3  ;;  %3998 = vmatprep.subr.mxu1 %v3668_v59  ;;  %v3758_v3 = vld [vmem:[%s8584_s13 + $0x8f8] sm:$0xff]  ;;  %v3757_v59 = vld [vmem:[%s8584_s13 + $0x8f0] sm:$0xff] }
 0x8a1   : > { %3936 = vmatpush2.msra.mxu0 %v3659_v4  ;;  %3999 = vmatpush1.msra.mxu1 %v3667_v6  ;;  %v3703_v4 = vld [vmem:[%s8584_s13 + $0x740] sm:$0xff]  ;;  %v3756_v6 = vld [vmem:[%s8584_s13 + $0x8e8] sm:$0xff] }
 0x8a2   : > { %3937 = vmatprep.subr.mxu0 %v3658_v7  ;;  %4000 = vmatprep.subr.mxu1 %v3666_v8  ;;  %v3702_v7 = vld [vmem:[%s8584_s13 + $0x738] sm:$0xff]  ;;  %v3755_v8 = vld [vmem:[%s8584_s13 + $0x8e0] sm:$0xff] }
 0x8a3   : > { %3938 = vmatpush2.msra.mxu0 %v3657_v10  ;;  %4001 = vmatpush1.msra.mxu1 %v3665_v12  ;;  %v3701_v10 = vld [vmem:[%s8584_s13 + $0x730] sm:$0xff]  ;;  %v3754_v12 = vld [vmem:[%s8584_s13 + $0x8d8] sm:$0xff] }
 0x8a4   : > { %3939 = vmatprep.subr.mxu0 %v3656_v13  ;;  %4002 = vmatprep.subr.mxu1 %v3664_v16  ;;  %v3700_v13 = vld [vmem:[%s8584_s13 + $0x728] sm:$0xff]  ;;  %v3699_v16 = vld [vmem:[%s8584_s13 + $0x720] sm:$0xff] }
 0x8a5   : > { %3940 = vmatpush2.msra.mxu0 %v3655_v17  ;;  %4003 = vmatpush1.msra.mxu1 %v3663_v18  ;;  %v3752_v17 = vld [vmem:[%s8584_s13 + $0x8c8] sm:$0xff]  ;;  %v3698_v18 = vld [vmem:[%s8584_s13 + $0x718] sm:$0xff] }
 0x8a6   : > { %3941 = vmatprep.subr.mxu0 %v3654_v19  ;;  %4004 = vmatprep.subr.mxu1 %v3726_v23  ;;  %v3751_v19 = vld [vmem:[%s8584_s13 + $0x8c0] sm:$0xff]  ;;  %v3697_v23 = vld [vmem:[%s8584_s13 + $0x710] sm:$0xff] }
 0x8a7   : > { %3942 = vmatpush2.msra.mxu0 %v3653_v25  ;;  %4005 = vmatpush2.msra.mxu1 %v3725_v28  ;;  %v3750_v25 = vld [vmem:[%s8584_s13 + $0x8b8] sm:$0xff]  ;;  %v3696_v28 = vld [vmem:[%s8584_s13 + $0x708] sm:$0xff] }
 0x8a8   : > { %3943 = vmatprep.subr.mxu0 %v3652_v39  ;;  %3965 = vmatprep.mubr.f32.mxu0 %v8049_v2  ;;  %v3720_v2 = vld [vmem:[%s8584_s13 + $0x7c8] sm:$0xff]  ;;  %v3749_v39 = vld [vmem:[%s8584_s13 + $0x8b0] sm:$0xff] }
 0x8a9   : > { %3944 = vmatpush2.msra.mxu0 %v3651_v29  ;;  %4006 = vmatprep.subr.mxu1 %v3724_v30  ;;  %v3695_v29 = vld [vmem:[%s8584_s13 + $0x700] sm:$0xff]  ;;  %v3748_v30 = vld [vmem:[%s8584_s13 + $0x8a8] sm:$0xff] }
 0x8aa   : > { %3945 = vmatprep.subr.mxu0 %v3650_v32  ;;  %4007 = vmatpush2.msra.mxu1 %v3723_v35  ;;  %v3747_v32 = vld [vmem:[%s8584_s13 + $0x8a0] sm:$0xff]  ;;  %v3746_v35 = vld [vmem:[%s8584_s13 + $0x898] sm:$0xff] }
 0x8ab   : > { %3946 = vmatpush2.msra.mxu0 %v3649_v37  ;;  %4008 = vmatprep.subr.mxu1 %v3722_v63  ;;  %v3745_v37 = vld [vmem:[%s8584_s13 + $0x890] sm:$0xff]  ;;  %v3744_v63 = vld [vmem:[%s8584_s13 + $0x888] sm:$0xff] }
 0x8ac   : > { %3947 = vmatprep.subr.mxu0 %v3648_v0  ;;  %4009 = vmatpush2.msra.mxu1 %v3721_v24  ;;  %v4147_v0 = vld [vmem:[%s8588_s17 + $0x78] sm:$0xff]  ;;  %v3743_v24 = vld [vmem:[%s8584_s13 + $0x880] sm:$0xff] }
 0x8ad   : > { %3948 = vmatpush2.msra.mxu0 %v3647_v20  ;;  %4010 = vmatprep.subr.mxu1 %v3720_v2  ;;  %v3741_v20 = vld [vmem:[%s8584_s13 + $0x870] sm:$0xff]  ;;  %v3740_v2 = vld [vmem:[%s8584_s13 + $0x868] sm:$0xff] }
 0x8ae   : > { %3949 = vmatprep.subr.mxu0 %v3646_v44  ;;  %4011 = vmatpush2.msra.mxu1 %v3719_v31  ;;  %v4145_v44 = vld [vmem:[%s8588_s17 + $0x68] sm:$0xff]  ;;  %v3739_v31 = vld [vmem:[%s8584_s13 + $0x860] sm:$0xff] }
 0x8af   : > { %3950 = vmatpush2.msra.mxu0 %v3645_v51  ;;  %4012 = vmatprep.subr.mxu1 %v3718_v48  ;;  %v3738_v51 = vld [vmem:[%s8584_s13 + $0x858] sm:$0xff]  ;;  %v4144_v48 = vld [vmem:[%s8588_s17 + $0x60] sm:$0xff] }
 0x8b0   : > { %3951 = vmatprep.subr.mxu0 %v3644_v14  ;;  %4013 = vmatpush2.msra.mxu1 %v3717_v41  ;;  %v3737_v14 = vld [vmem:[%s8584_s13 + $0x850] sm:$0xff]  ;;  %v3736_v41 = vld [vmem:[%s8584_s13 + $0x848] sm:$0xff] }
 0x8b1   : > { %3952 = vmatpush2.msra.mxu0 %v3643_v5  ;;  %4014 = vmatprep.subr.mxu1 %v3716_v46  ;;  %v4143_v5 = vld [vmem:[%s8588_s17 + $0x58] sm:$0xff]  ;;  %v3735_v46 = vld [vmem:[%s8584_s13 + $0x840] sm:$0xff] }
 0x8b2   : > { %3953 = vmatprep.subr.mxu0 %v3642_v33  ;;  %4015 = vmatpush2.msra.mxu1 %v3715_v43  ;;  %v3734_v33 = vld [vmem:[%s8584_s13 + $0x838] sm:$0xff]  ;;  %v4142_v43 = vld [vmem:[%s8588_s17 + $0x50] sm:$0xff] }
 0x8b3   : > { %3954 = vmatpush2.msra.mxu0 %v3641_v27  ;;  %4016 = vmatprep.subr.mxu1 %v3714_v45  ;;  %v3733_v27 = vld [vmem:[%s8584_s13 + $0x830] sm:$0xff]  ;;  %v3732_v45 = vld [vmem:[%s8584_s13 + $0x828] sm:$0xff] }
 0x8b4   : > { %3955 = vmatprep.subr.mxu0 %v3640_v21  ;;  %4017 = vmatpush2.msra.mxu1 %v3713_v15  ;;  %v4141_v21 = vld [vmem:[%s8588_s17 + $0x48] sm:$0xff]  ;;  %v3731_v15 = vld [vmem:[%s8584_s13 + $0x820] sm:$0xff] }
 0x8b5   : > { %3956 = vmatpush2.msra.mxu0 %v3639_v38  ;;  %4018 = vmatprep.subr.mxu1 %v3712_v42  ;;  %v3730_v38 = vld [vmem:[%s8584_s13 + $0x818] sm:$0xff]  ;;  %v4140_v42 = vld [vmem:[%s8588_s17 + $0x40] sm:$0xff] }
 0x8b6   : > { %3957 = vmatprep.subr.mxu0 %v3638_v47  ;;  %4019 = vmatpush2.msra.mxu1 %v3711_v40  ;;  %v3729_v47 = vld [vmem:[%s8584_s13 + $0x810] sm:$0xff]  ;;  %v3728_v40 = vld [vmem:[%s8584_s13 + $0x808] sm:$0xff] }
 0x8b7   : > { %3958 = vmatpush2.msra.mxu0 %v3637_v49  ;;  %4020 = vmatprep.subr.mxu1 %v3710_v52  ;;  %v4139_v49 = vld [vmem:[%s8588_s17 + $0x38] sm:$0xff]  ;;  %v3727_v52 = vld [vmem:[%s8584_s13 + $0x800] sm:$0xff] }
 0x8b8   : > { %3959 = vmatprep.subr.mxu0 %v3636_v53  ;;  %4021 = vmatpush2.msra.mxu1 %v3709_v36  ;;  %v4138_v53 = vld [vmem:[%s8588_s17 + $0x30] sm:$0xff]  ;;  %v4137_v36 = vld [vmem:[%s8588_s17 + $0x28] sm:$0xff] }
 0x8b9   : > { %3960 = vmatpush2.msra.mxu0 %v3635_v54  ;;  %4022 = vmatprep.subr.mxu1 %v3708_v55  ;;  %v4135_v54 = vld [vmem:[%s8588_s17 + $0x18] sm:$0xff]  ;;  %v4134_v55 = vld [vmem:[%s8588_s17 + $0x10] sm:$0xff] }
 0x8ba   : > { %3961 = vmatprep.subr.mxu0 %v3634_v56  ;;  %4023 = vmatpush2.msra.mxu1 %v3707_v57  ;;  %v4133_v56 = vld [vmem:[%s8588_s17 + $0x8] sm:$0xff]  ;;  %v4132_v57 = vld [vmem:[%s8588_s17] sm:$0xff] }
 0x8bb   : > { %3962 = vmatpush2.msra.mxu0 %v3633_v58  ;;  %4024 = vmatprep.subr.mxu1 %v3706_v60 }
 0x8bc   : > { %3963 = vmatprep.subr.mxu0 %v3632_v61  ;;  %4025 = vmatpush2.msra.mxu1 %v3705_v62 }
 0x8bd   : > { %3964 = vmatpush2.msra.mxu0 %v3631_v26  ;;  %4026 = vmatprep.subr.mxu1 %v3704_v11 }
 0x8be   : > { %4043 = vmatprep.subr.mxu0 %v3758_v3  ;;  %3966 = vmatmul.mubr.f32.vlgmr.msra.gmra.mxu0 %v8023_v22  ;;  %v3753_v22 = vld [vmem:[%s8584_s13 + $0x8d0] sm:$0xff] }
 0x8bf   : > { %4044 = vmatpush1.msra.mxu0 %v3757_v59  ;;  %4027 = vmatpush2.msra.mxu1 %v3703_v4 }
 0x8c0   : > { %4045 = vmatprep.subr.mxu0 %v3756_v6  ;;  %4028 = vmatprep.subr.mxu1 %v3702_v7 }
 0x8c1   : > { %4046 = vmatpush1.msra.mxu0 %v3755_v8  ;;  %4029 = vmatpush2.msra.mxu1 %v3701_v10 }
 0x8c2   : > { %4047 = vmatprep.subr.mxu0 %v3754_v12  ;;  %4030 = vmatprep.subr.mxu1 %v3700_v13  ;;  %v4344_v13 = vld [vmem:[%s8585_s14] ss:$0 sm:$0xff] }
 0x8c3   : > { %4048 = vmatpush1.msra.mxu0 %v3753_v22  ;;  %4031 = vmatpush2.msra.mxu1 %v3699_v16 }
 0x8c4   : > { %4049 = vmatprep.subr.mxu0 %v3752_v17  ;;  %4032 = vmatprep.subr.mxu1 %v3698_v18  ;;  %v4345_v17 = vld [vmem:[%s8586_s15] ss:$0 sm:$0xff] }
 0x8c5   : > { %4050 = vmatpush1.msra.mxu0 %v3751_v19  ;;  %4033 = vmatpush2.msra.mxu1 %v3697_v23 }
 0x8c6   : > { %4051 = vmatprep.subr.mxu0 %v3750_v25  ;;  %4034 = vmatprep.subr.mxu1 %v3696_v28 }
 0x8c7   : > { %4052 = vmatpush1.msra.mxu0 %v3749_v39  ;;  %4035 = vmatpush2.msra.mxu1 %v3695_v29  ;;  %v4218_v39 = vld [vmem:[%s8587_s16] sm:$0xff] }
 0x8c8   : > { %4053 = vmatprep.subr.mxu0 %v3748_v30  ;;  %4036 = vmatprep.mubr.f32.mxu1 %v8101_v9  ;;  %v3742_v9 = vld [vmem:[%s8584_s13 + $0x878] sm:$0xff] }
 0x8c9   : > { %4054 = vmatpush1.msra.mxu0 %v3747_v32  ;;  %4037 = vmatmul.mubr.f32.vlgmr.msra.gmra.mxu1 %v8075_v50  ;;  %v4146_v50 = vld [vmem:[%s8588_s17 + $0x70] sm:$0xff] }
 0x8ca   : > { %4055 = vmatprep.subr.mxu0 %v3746_v35  ;;  %4107 = vmatprep.mubr.f32.mxu0 %v4655_v1 }
 0x8cb   : > { %4056 = vmatpush1.msra.mxu0 %v3745_v37  ;;  %4517 = vmatprep.subr.mxu1 %v4655_v1 }
 0x8cc   : > { %4057 = vmatprep.subr.mxu0 %v3744_v63  ;;  %4518 = vmatpush3.msra.mxu1 %v4147_v0 }
 0x8cd   : > { %4058 = vmatpush1.msra.mxu0 %v3743_v24  ;;  %4519 = vmatprep.subr.mxu1 %v4655_v1 }
 0x8ce   : > { %4059 = vmatprep.subr.mxu0 %v3742_v9  ;;  %4520 = vmatpush3.msra.mxu1 %v4146_v50  ;;  %v4226_v9 = vld [vmem:[%s8589_s18] sm:$0x1] }
 0x8cf   : > { %4060 = vmatpush1.msra.mxu0 %v3741_v20  ;;  %4521 = vmatprep.subr.mxu1 %v4655_v1 }
 0x8d0   : > { %4061 = vmatprep.subr.mxu0 %v3740_v2  ;;  %4522 = vmatpush3.msra.mxu1 %v4145_v44 }
 0x8d1   : > { %4062 = vmatpush1.msra.mxu0 %v3739_v31  ;;  %4523 = vmatprep.subr.mxu1 %v4655_v1 }
 0x8d2   : > { %4063 = vmatprep.subr.mxu0 %v3738_v51  ;;  %4524 = vmatpush3.msra.mxu1 %v4144_v48 }
 0x8d3   : > { %4064 = vmatpush1.msra.mxu0 %v3737_v14  ;;  %4525 = vmatprep.subr.mxu1 %v4655_v1 }
 0x8d4   : > { %4065 = vmatprep.subr.mxu0 %v3736_v41  ;;  %4526 = vmatpush3.msra.mxu1 %v4143_v5 }
 0x8d5   : > { %4066 = vmatpush1.msra.mxu0 %v3735_v46  ;;  %4527 = vmatprep.subr.mxu1 %v4655_v1 }
 0x8d6   : > { %4067 = vmatprep.subr.mxu0 %v3734_v33  ;;  %4528 = vmatpush3.msra.mxu1 %v4142_v43 }
 0x8d7   : > { %4068 = vmatpush1.msra.mxu0 %v3733_v27  ;;  %4529 = vmatprep.subr.mxu1 %v4655_v1 }
 0x8d8   : > { %4069 = vmatprep.subr.mxu0 %v3732_v45  ;;  %4530 = vmatpush3.msra.mxu1 %v4141_v21 }
 0x8d9   : > { %4070 = vmatpush1.msra.mxu0 %v3731_v15  ;;  %4531 = vmatprep.subr.mxu1 %v4655_v1 }
 0x8da   : > { %4071 = vmatprep.subr.mxu0 %v3730_v38  ;;  %4532 = vmatpush3.msra.mxu1 %v4140_v42 }
 0x8db   : > { %4072 = vmatpush1.msra.mxu0 %v3729_v47  ;;  %4533 = vmatprep.subr.mxu1 %v4655_v1 }
 0x8dc   : > { %4073 = vmatprep.subr.mxu0 %v3728_v40  ;;  %4534 = vmatpush3.msra.mxu1 %v4139_v49 }
 0x8dd   : > { %4074 = vmatpush1.msra.mxu0 %v3727_v52  ;;  %4535 = vmatprep.subr.mxu1 %v4655_v1 }
 0x8de   : > { %4108 = vmatmul.mubr.f32.vlgmr.msra.gmra.mxu0 %v8127_v34  ;;  %4549 = vmatprep.mubr.msk.f32.mxu1 %vm4656_vm1, %v4655_v1  ;;  %v4136_v34 = vld [vmem:[%s8588_s17 + $0x20] sm:$0xff] }
 0x8df   : > { %4536 = vmatpush3.msra.mxu1 %v4138_v53 }
 0x8e0   : > { %4537 = vmatprep.subr.mxu1 %v4655_v1 }
 0x8e1   : > { %4538 = vmatpush3.msra.mxu1 %v4137_v36 }
 0x8e2   : > { %4539 = vmatprep.subr.mxu1 %v4655_v1 }
 0x8e3   : > { %4540 = vmatpush3.msra.mxu1 %v4136_v34 }
 0x8e4   : > { %4541 = vmatprep.subr.mxu1 %v4655_v1 }
 0x8e5   : > { %4542 = vmatpush3.msra.mxu1 %v4135_v54 }
 0x8e6   : > { %4543 = vmatprep.subr.mxu1 %v4655_v1 }
 0x8e7   : > { %4544 = vmatpush3.msra.mxu1 %v4134_v55 }
 0x8e8   : > { %4545 = vmatprep.subr.mxu1 %v4655_v1 }
 0x8e9   : > { %4546 = vmatpush3.msra.mxu1 %v4133_v56 }
 0x8ea   : > { %4547 = vmatprep.subr.mxu1 %v4655_v1 }
 0x8eb   : > { %4548 = vmatpush3.msra.mxu1 %v4132_v57 }
 0x93e   : > { %v3825_v58 = vpop.f32.mrf.mxu0 }
 0x940   : > { %v3827_v61 = vpop.f32.mrf.mxu0 }
 0x946   : > { %v3896_v60 = vpop.f32.mrf.mxu1 }
 0x947   : > { %v3897_v3 = vadd.f32 %v3896_v60, %v3825_v58 }
 0x948   : > { %v3898_v62 = vpop.f32.mrf.mxu1 }
 0x949   : > { %v3899_v4 = vadd.f32 %v3898_v62, %v3827_v61 }
 0x97e   : > { %v3967_v26 = vpop.f32.mrf.mxu0 }
 0x97f   : > { %v3968_v6 = vadd.f32 %v3967_v26, %v3897_v3 }
 0x980   : > { %v3969_v59 = vpop.f32.mrf.mxu0 }
 0x981   : > { %v3970_v8 = vadd.f32 %v3969_v59, %v3899_v4 }
 0x989   : > { %v4038_v11 = vpop.f32.mrf.mxu1 }
 0x98a   : > { %v4039_v10 = vadd.f32 %v4038_v11, %v3968_v6 }
 0x98b   : > { %v4040_v7 = vpop.f32.mrf.mxu1 }
 0x98c   : > { %v4041_v1 = vadd.f32 %v4040_v7, %v3970_v8 }
 0x99e   : > { %v4109_v12 = vpop.f32.mrf.mxu0 }
 0x99f   : > { %v4110_v22 = vadd.f32 %v4109_v12, %v4039_v10 }
 0x9a0   : > { %v4111_v16 = vpop.f32.mrf.mxu0 }
 0x9a1   : > { %v4121_v18 = vadd.f32 %v4344_v13, %v4110_v22  ;;  %v4112_v19 = vadd.f32 %v4111_v16, %v4041_v1 }
 0x9a3   : > { %v4122_v23 = vmax.f32 %v4121_v18, 0.0  ;;  %v4130_v25 = vadd.f32 %v4345_v17, %v4112_v19 }
 0x9a5   : > { %v4131_v28 = vadd.f32 %v4130_v25, %v4122_v23 }
 0x9a7   : > { %4550 = vmatmul.mubr.f32.vlgmr.msra.gmra.mxu1 %v4131_v28 }
 0xa67   : > { %v4214_v29 = vpop.f32.mrf.mxu1 }
 0xa68   : > { %v4219_v30 = vmul.f32 %v4218_v39, %v4214_v29 }
 0xa69   : > { %v4551_v32 = vpop.f32.mrf.mxu1 }
 0xa6a   : > { %v4220_v35 = vrot.slane %v4219_v30, 4 }
 0xa6c   : > { %v4221_v37 = vadd.f32 %v4220_v35, %v4219_v30 }
 0xa6e   : > { %v4222_v63 = vrot.slane %v4221_v37, 2 }
 0xa70   : > { %v4223_v0 = vadd.f32 %v4222_v63, %v4221_v37 }
 0xa72   : > { %v4224_v24 = vrot.slane %v4223_v0, 1 }
 0xa74   : > { %v4225_v50 = vadd.f32 %v4224_v24, %v4223_v0 }
 0xa76   : > { %v4227_v20 = vadd.f32 %v4226_v9, %v4225_v50 }
 0xa78   : > { %4228 = vst [vmem:[%s594_s21] sm:$0x1] %v4227_v20 }
 0xa79   : > { %4606 = shalt.err (!%p4603_p3)
}
 0xa7a   : > { %s4607_s20 = scalar_lea.hbm %s4240_s25, 16  ;;  %s4611_s21 = scalar_lea.hbm %s8590_s19, 32 }
 0xa7b   : > { %p4608_p4 = scmp.ne.s32.totalorder %s4240_s25, %s4607_s20  ;;  %p4612_p9 = scmp.lt.s32.totalorder %s4240_s25, %s8590_s19 }
 0xa7c   : > { %p4613_p10 = scmp.lt.s32.totalorder %s4611_s21, %s4607_s20 }
 0xa7d   : > { %p4609_p7 = pnand %p4608_p4, %p4796_p5 }
 0xa7e   : > { %p4614_p11 = por %p4613_p10, %p4612_p9 }
 0xa7f   : > { %p4610_p8 = pneg %p4609_p7 }
 0xa81   : > { %p4615_p12 = pnand %p4614_p11, %p4610_p8 }
 0xa83   : > { %4618 = shalt.err (!%p4615_p12)
}
 0xa84   : > { %4552 = dma.vmem_to_hbm [thread:$0]  (%p4796_p5), %s4243_s27, 16, %s4240_s25, %s4230_s24  }
 0xa85 PF: > { %s8620_s4 = sld [smem:[#allocation7_spill]] }
 0xa86   : > { %s8621_s5 = sld [smem:[#allocation5_spill]] }
 0xa8b   : > { %p4558_p13 = scmp.ge.s32.totalorder %s8620_s4, 2 }
 0xa8c   : > { %s4254_s1 = sand.u32 1, %s8621_s5  }
 0xa8d   : > { %p4555_p0 = pnand %p4558_p13, %p4800_p6  ;;  %s4255_s2 = scalar_lea.sflag [#allocation3], %s4254_s1 }
 0xa8f   : > { %p4556_p1 = pneg %p4555_p0 }
 0xa91   : > { %4636 = dma.done.wait (%p4556_p1), %s4255_s2, 16  }
 0xa92   : > { %4638 = vsyncadd (%p4556_p1), %s4255_s2, 4294967280  ;;  %s8623_s21 = sld [smem:[#allocation8_spill]]  ;;  %s8626_s0 = smov %s4645_s30 }
 0xa93   : > { %s8624_s20 = sld [smem:[#allocation6_spill]] }
 0xa94   : > { %s8625_s22 = sld [smem:[#allocation9_spill]] }
 0xa98   : > { %p29_p2 = scmp.ge.s32.totalorder %s8623_s21, 4  }
 0xa99   : > { %s8627_s30 = smov %s8624_s20 }
 0xa9a   : > { %s8628_s20 = smov %s8625_s22  ;;  %31 = sbr.rel (!%p29_p2) target bundleno = 10 (0xa), region = 131 }
 0xa9f   :  { %4259 = vsyncpa [#allocation3], 1 }
 0xaa0   :  { %4261 = vsyncpa [#allocation3 + $0x1], 1 }

</bundles_post_ra>
